<compile_context>
chip_gen: v7x
topology: tpu7x:2x2x1
jax: 0.10.0
libtpu: 0.0.40
codegen_flags: <defaults>
</compile_context>

<pallas_src>
import functools
import math

import jax
import jax.numpy as jnp
from jax.experimental import pallas as pl
from jax.experimental.pallas import tpu as pltpu

BF16 = jnp.bfloat16
F32 = jnp.float32
LN_EPS = 1e-5


def _pick_tile(dim, target):
    """Largest tile <= target that divides dim (dims here are nice multiples)."""
    t = min(dim, target)
    while dim % t:
        t -= 1
    return t


def _gelu(x):
    # TODO(synk): HF Whisper uses exact erf-GELU; tanh approximation is used since
    # erf is not guaranteed to lower in Mosaic (|diff| ~1e-3).
    c = 0.7978845608028654  # sqrt(2/pi)
    return 0.5 * x * (1.0 + jnp.tanh(c * (x + 0.044715 * x * x * x)))


def _ln_f32(x, g, b):
    mu = jnp.mean(x, axis=-1, keepdims=True)
    var = jnp.mean(jnp.square(x - mu), axis=-1, keepdims=True)
    return (x - mu) * jax.lax.rsqrt(var + LN_EPS) * g + b


# --------------------- conv (k=3) as three shifted matmuls ----------------------

def _conv3_kernel(x0_ref, x1_ref, x2_ref, w_ref, b_ref, o_ref):
    acc = jnp.dot(x0_ref[0], w_ref[0], preferred_element_type=jnp.float32)
    acc += jnp.dot(x1_ref[0], w_ref[1], preferred_element_type=jnp.float32)
    acc += jnp.dot(x2_ref[0], w_ref[2], preferred_element_type=jnp.float32)
    o_ref[0] = _gelu(acc + b_ref[...]).astype(o_ref.dtype)


def _conv3_pos_kernel(x0_ref, x1_ref, x2_ref, w_ref, b_ref, pos_ref, o_ref):
    acc = jnp.dot(x0_ref[0], w_ref[0], preferred_element_type=jnp.float32)
    acc += jnp.dot(x1_ref[0], w_ref[1], preferred_element_type=jnp.float32)
    acc += jnp.dot(x2_ref[0], w_ref[2], preferred_element_type=jnp.float32)
    o_ref[0] = (_gelu(acc + b_ref[...]) + pos_ref[...]).astype(o_ref.dtype)


def conv3_gelu(x0, x1, x2, w, b, pos=None, out_dtype=jnp.float32, time_tile=512):
    """GELU(sum_j x_j @ w_j + b) [+ pos].  x_j: (B, L, C) tap-shifted bf16 inputs,
    w: (3, C, D) bf16.  Tiled over (batch, time) — no im2col materialization."""
    B, L, C = x0.shape
    D = w.shape[-1]
    tl = _pick_tile(L, time_tile)
    x_spec = pl.BlockSpec((1, tl, C), lambda bi, ti: (bi, ti, 0))
    in_specs = [x_spec, x_spec, x_spec,
                pl.BlockSpec((3, C, D), lambda bi, ti: (0, 0, 0)),
                pl.BlockSpec((1, D), lambda bi, ti: (0, 0))]
    args = [x0, x1, x2, w, b.reshape(1, D)]
    if pos is not None:
        in_specs.append(pl.BlockSpec((tl, D), lambda bi, ti: (ti, 0)))
        args.append(pos)
        kernel = _conv3_pos_kernel
    else:
        kernel = _conv3_kernel
    return pl.pallas_call(
        kernel,
        grid=(B, L // tl),
        in_specs=in_specs,
        out_specs=pl.BlockSpec((1, tl, D), lambda bi, ti: (bi, ti, 0)),
        out_shape=jax.ShapeDtypeStruct((B, L, D), out_dtype),
        compiler_params=pltpu.CompilerParams(
            dimension_semantics=("parallel", "parallel")),
        cost_estimate=pl.CostEstimate(
            flops=2 * 3 * B * L * C * D, transcendentals=B * L * D,
            bytes_accessed=3 * 2 * B * L * C + 2 * 3 * C * D + 4 * B * L * D),
    )(*args)


# --------------------- fused LayerNorm + projection (QKV) -----------------------

def _ln_matmul_kernel(x_ref, g_ref, be_ref, w_ref, b_ref, o_ref, xn_sc):
    # LayerNorm is computed once per row tile (j == 0) and reused for every
    # output-column tile from VMEM scratch.
    @pl.when(pl.program_id(1) == 0)
    def _():
        y = _ln_f32(x_ref[...].astype(jnp.float32), g_ref[...], be_ref[...])
        xn_sc[...] = y.astype(jnp.bfloat16)

    acc = jnp.dot(xn_sc[...], w_ref[...], preferred_element_type=jnp.float32)
    o_ref[...] = (acc + b_ref[...]).astype(o_ref.dtype)


def ln_matmul(x, g, be, w, b, out_dtype=jnp.bfloat16, tm=256, tn=256):
    """out = LayerNorm(x) @ w + b.  x: (M, K) f32 (K untiled: LN needs full rows),
    w: (K, N) bf16.  Tiled over (M, N); N axis is "arbitrary" so the per-row-tile
    LN scratch is carried sequentially across column tiles."""
    M, K = x.shape
    N = w.shape[1]
    tm = _pick_tile(M, tm)
    tn = _pick_tile(N, tn)
    return pl.pallas_call(
        _ln_matmul_kernel,
        grid=(M // tm, N // tn),
        in_specs=[pl.BlockSpec((tm, K), lambda i, j: (i, 0)),
                  pl.BlockSpec((1, K), lambda i, j: (0, 0)),
                  pl.BlockSpec((1, K), lambda i, j: (0, 0)),
                  pl.BlockSpec((K, tn), lambda i, j: (0, j)),
                  pl.BlockSpec((1, tn), lambda i, j: (0, j))],
        out_specs=pl.BlockSpec((tm, tn), lambda i, j: (i, j)),
        out_shape=jax.ShapeDtypeStruct((M, N), out_dtype),
        scratch_shapes=[pltpu.VMEM((tm, K), jnp.bfloat16)],
        compiler_params=pltpu.CompilerParams(
            dimension_semantics=("parallel", "arbitrary")),
        cost_estimate=pl.CostEstimate(
            flops=2 * M * K * N, transcendentals=0,
            bytes_accessed=4 * M * K + 2 * K * N + 2 * M * N),
    )(x, g.reshape(1, K), be.reshape(1, K), w, b.reshape(1, N))


# --------------------- matmul + bias + residual (attention out-proj) ------------

def _matmul_residual_kernel(x_ref, w_ref, b_ref, r_ref, o_ref):
    acc = jnp.dot(x_ref[...], w_ref[...], preferred_element_type=jnp.float32)
    o_ref[...] = (r_ref[...].astype(jnp.float32) + acc + b_ref[...]).astype(o_ref.dtype)


def matmul_residual(x, w, b, res, tm=256, tn=256):
    """out = res + x @ w + b.  x: (M, K) bf16, w: (K, N) bf16, res: (M, N) f32."""
    M, K = x.shape
    N = w.shape[1]
    tm = _pick_tile(M, tm)
    tn = _pick_tile(N, tn)
    return pl.pallas_call(
        _matmul_residual_kernel,
        grid=(M // tm, N // tn),
        in_specs=[pl.BlockSpec((tm, K), lambda i, j: (i, 0)),
                  pl.BlockSpec((K, tn), lambda i, j: (0, j)),
                  pl.BlockSpec((1, tn), lambda i, j: (0, j)),
                  pl.BlockSpec((tm, tn), lambda i, j: (i, j))],
        out_specs=pl.BlockSpec((tm, tn), lambda i, j: (i, j)),
        out_shape=jax.ShapeDtypeStruct((M, N), res.dtype),
        compiler_params=pltpu.CompilerParams(
            dimension_semantics=("parallel", "parallel")),
        cost_estimate=pl.CostEstimate(
            flops=2 * M * K * N, transcendentals=0,
            bytes_accessed=2 * M * K + 2 * K * N + 8 * M * N),
    )(x, w, b.reshape(1, N), res)


# --------------------- flash-style attention (grid over B, H, kv) ---------------

def _flash_attn_kernel(q_ref, k_ref, v_ref, o_ref, m_sc, l_sc, acc_sc):
    kv = pl.program_id(2)

    @pl.when(kv == 0)
    def _():
        m_sc[...] = jnp.full_like(m_sc, -jnp.inf)
        l_sc[...] = jnp.zeros_like(l_sc)
        acc_sc[...] = jnp.zeros_like(acc_sc)

    q = q_ref[0]                                   # (S, Dh) bf16 (scale pre-folded)
    k = k_ref[0]                                   # (Tkv, Dh) bf16
    v = v_ref[0]
    s = jax.lax.dot_general(q, k, (((1,), (1,)), ((), ())),
                            preferred_element_type=jnp.float32)
    m_prev = m_sc[...]
    m_new = jnp.maximum(m_prev, jnp.max(s, axis=-1, keepdims=True))
    alpha = jnp.exp(m_prev - m_new)
    p = jnp.exp(s - m_new)
    l_sc[...] = alpha * l_sc[...] + jnp.sum(p, axis=-1, keepdims=True)
    acc_sc[...] = alpha * acc_sc[...] + jnp.dot(p.astype(v.dtype), v,
                                                preferred_element_type=jnp.float32)
    m_sc[...] = m_new

    @pl.when(kv == pl.num_programs(2) - 1)
    def _():
        o_ref[0] = (acc_sc[...] * pl.reciprocal(l_sc[...], approx=True)
                    ).astype(o_ref.dtype)


def mha_attention(qkv, n_heads, head_dim, kv_tile=512):
    """qkv: (B, S, 3*D) bf16 with columns [q | k | v]; each head's Dh columns are
    sliced via the BlockSpec index_map (no head split/merge transposes in HBM).
    The softmax 1/sqrt(Dh) scale is already folded into the q projection.
    Returns context (B, S, D) bf16."""
    # TODO(synk): for head_dim not a multiple of 128 (e.g. real Whisper Dh=64), pad
    # heads to 128 lanes or pack two heads per block to keep column slices aligned.
    B, S, three_d = qkv.shape
    D = three_d // 3
    H = n_heads
    tkv = _pick_tile(S, kv_tile)
    q_spec = pl.BlockSpec((1, S, head_dim), lambda b, h, kv: (b, 0, h))
    k_spec = pl.BlockSpec((1, tkv, head_dim), lambda b, h, kv: (b, kv, H + h))
    v_spec = pl.BlockSpec((1, tkv, head_dim), lambda b, h, kv: (b, kv, 2 * H + h))
    return pl.pallas_call(
        _flash_attn_kernel,
        grid=(B, H, S // tkv),
        in_specs=[q_spec, k_spec, v_spec],
        out_specs=pl.BlockSpec((1, S, head_dim), lambda b, h, kv: (b, 0, h)),
        out_shape=jax.ShapeDtypeStruct((B, S, D), jnp.bfloat16),
        scratch_shapes=[pltpu.VMEM((S, 1), jnp.float32),
                        pltpu.VMEM((S, 1), jnp.float32),
                        pltpu.VMEM((S, head_dim), jnp.float32)],
        compiler_params=pltpu.CompilerParams(
            dimension_semantics=("parallel", "parallel", "arbitrary")),
        cost_estimate=pl.CostEstimate(
            flops=4 * B * H * S * S * head_dim, transcendentals=B * H * S * S,
            bytes_accessed=3 * 2 * B * S * D + 2 * B * S * D),
    )(qkv, qkv, qkv)


# --------------------- fully fused FFN block -------------------------------------

def _ffn_kernel(x_ref, g_ref, be_ref, w1_ref, b1_ref, w2_ref, b2_ref, o_ref,
                hn_sc, acc_sc):
    f = pl.program_id(1)

    @pl.when(f == 0)
    def _():
        y = _ln_f32(x_ref[...].astype(jnp.float32), g_ref[...], be_ref[...])
        hn_sc[...] = y.astype(jnp.bfloat16)
        acc_sc[...] = jnp.zeros_like(acc_sc)

    a = jnp.dot(hn_sc[...], w1_ref[...], preferred_element_type=jnp.float32)
    a = _gelu(a + b1_ref[...])
    acc_sc[...] += jnp.dot(a.astype(jnp.bfloat16), w2_ref[...],
                           preferred_element_type=jnp.float32)

    @pl.when(f == pl.num_programs(1) - 1)
    def _():
        o_ref[...] = (x_ref[...].astype(jnp.float32) + acc_sc[...] + b2_ref[...]
                      ).astype(o_ref.dtype)


def ffn_block(x, g, be, w1, b1, w2, b2, tm=256, tf=512):
    """out = x + GELU(LayerNorm(x) @ w1 + b1) @ w2 + b2.  The (M, ffn) intermediate
    never touches HBM: the ffn dim is the reduction grid axis with an f32 VMEM acc."""
    M, D = x.shape
    F = w1.shape[1]
    tm = _pick_tile(M, tm)
    tf = _pick_tile(F, tf)
    return pl.pallas_call(
        _ffn_kernel,
        grid=(M // tm, F // tf),
        in_specs=[pl.BlockSpec((tm, D), lambda i, f: (i, 0)),
                  pl.BlockSpec((1, D), lambda i, f: (0, 0)),
                  pl.BlockSpec((1, D), lambda i, f: (0, 0)),
                  pl.BlockSpec((D, tf), lambda i, f: (0, f)),
                  pl.BlockSpec((1, tf), lambda i, f: (0, f)),
                  pl.BlockSpec((tf, D), lambda i, f: (f, 0)),
                  pl.BlockSpec((1, D), lambda i, f: (0, 0))],
        out_specs=pl.BlockSpec((tm, D), lambda i, f: (i, 0)),
        out_shape=jax.ShapeDtypeStruct((M, D), x.dtype),
        scratch_shapes=[pltpu.VMEM((tm, D), jnp.bfloat16),
                        pltpu.VMEM((tm, D), jnp.float32)],
        compiler_params=pltpu.CompilerParams(
            dimension_semantics=("parallel", "arbitrary")),
        cost_estimate=pl.CostEstimate(
            flops=4 * M * D * F, transcendentals=M * F,
            bytes_accessed=8 * M * D + 4 * D * F),
    )(x, g.reshape(1, D), be.reshape(1, D), w1, b1.reshape(1, F), w2,
      b2.reshape(1, D))


# --------------------- final LayerNorm + masked mean pool ------------------------

def _ln_pool_kernel(x_ref, g_ref, be_ref, m_ref, o_ref):
    y = _ln_f32(x_ref[0].astype(jnp.float32), g_ref[...], be_ref[...])   # (S, D)
    m = m_ref[0].astype(jnp.float32)                                     # (1, S) lane-dense
    num = jnp.dot(m, y, preferred_element_type=jnp.float32)              # (1, D)
    den = jnp.maximum(jnp.sum(m, axis=-1, keepdims=True), 1.0)           # clamp: no NaN
    o_ref[0] = (num / den).astype(o_ref.dtype)


def ln_masked_mean_pool(x, g, be, mask):
    """x: (B, S, D) f32; mask: (B, S) -> (B, 1, D): final LN then masked time-mean."""
    B, S, D = x.shape
    return pl.pallas_call(
        _ln_pool_kernel,
        grid=(B,),
        in_specs=[pl.BlockSpec((1, S, D), lambda b: (b, 0, 0)),
                  pl.BlockSpec((1, D), lambda b: (0, 0)),
                  pl.BlockSpec((1, D), lambda b: (0, 0)),
                  pl.BlockSpec((1, 1, S), lambda b: (b, 0, 0))],
        out_specs=pl.BlockSpec((1, 1, D), lambda b: (b, 0, 0)),
        out_shape=jax.ShapeDtypeStruct((B, 1, D), jnp.float32),
        compiler_params=pltpu.CompilerParams(dimension_semantics=("parallel",)),
    )(x, g.reshape(1, D), be.reshape(1, D),
      mask.reshape(B, 1, S).astype(jnp.float32))


# ----------------------------- parameter creation --------------------------------

def init_params(key, n_mels, d_model, ffn, n_layers, max_pos):
    def nrm(k, shape, scale=0.02):
        return scale * jax.random.normal(k, shape, dtype=jnp.float32)

    keys = iter(jax.random.split(key, 8 + 12 * n_layers))
    p = {
        "conv1_w": nrm(next(keys), (d_model, n_mels, 3)),   # PyTorch (out, in, k)
        "conv1_b": nrm(next(keys), (d_model,)),
        "conv2_w": nrm(next(keys), (d_model, d_model, 3)),
        "conv2_b": nrm(next(keys), (d_model,)),
        "pos": nrm(next(keys), (max_pos, d_model)),          # embed_positions[:offset]
        "lnf_g": jnp.ones((d_model,), jnp.float32),
        "lnf_b": jnp.zeros((d_model,), jnp.float32),
    }
    layers = []
    for _ in range(n_layers):
        layers.append({
            "ln1_g": jnp.ones((d_model,), jnp.float32),
            "ln1_b": jnp.zeros((d_model,), jnp.float32),
            "wq": nrm(next(keys), (d_model, d_model)), "bq": nrm(next(keys), (d_model,)),
            "wk": nrm(next(keys), (d_model, d_model)),   # Whisper k_proj has no bias
            "wv": nrm(next(keys), (d_model, d_model)), "bv": nrm(next(keys), (d_model,)),
            "wo": nrm(next(keys), (d_model, d_model)), "bo": nrm(next(keys), (d_model,)),
            "ln2_g": jnp.ones((d_model,), jnp.float32),
            "ln2_b": jnp.zeros((d_model,), jnp.float32),
            "w1": nrm(next(keys), (d_model, ffn)), "b1": nrm(next(keys), (ffn,)),
            "w2": nrm(next(keys), (ffn, d_model)), "b2": nrm(next(keys), (d_model,)),
        })
    p["layers"] = layers
    return p


# ------------------------------- forward pass -------------------------------------

def whisper_backbone_forward(params, input_values, attention_mask, n_heads):
    """input_values: (B, n_mels, T) [PyTorch Conv1d NCL]; attention_mask: (B, T)."""
    B, C_in, T = input_values.shape
    assert T % 2 == 0, "Whisper mel frame count must be even"
    D = params["conv1_w"].shape[0]
    head_dim = D // n_heads
    S = T // 2
    scale = 1.0 / math.sqrt(head_dim)

    # ---- one-time weight prep: bf16 matmul operands, fused QKV (with the attention
    #      1/sqrt(Dh) scale folded into the q projection), conv tap layout ------------
    w_c1 = params["conv1_w"].transpose(2, 1, 0).astype(BF16)     # (3, C_in, D)
    w_c2 = params["conv2_w"].transpose(2, 1, 0).astype(BF16)     # (3, D, D)
    zeros_d = jnp.zeros((D,), F32)
    layers = []
    for l in params["layers"]:
        layers.append(dict(
            l,
            wqkv=jnp.concatenate([l["wq"] * scale, l["wk"], l["wv"]],
                                 axis=1).astype(BF16),
            bqkv=jnp.concatenate([l["bq"] * scale, zeros_d, l["bv"]], axis=0),
            wo=l["wo"].astype(BF16),
            w1=l["w1"].astype(BF16),
            w2=l["w2"].astype(BF16)))

    # ---- conv1: Conv1d(k=3, s=1, p=1) + GELU (3 shifted matmuls, no im2col) --------
    x = input_values.transpose(0, 2, 1)                          # (B, T, C) time-major
    xp = jnp.pad(x, ((0, 0), (1, 1), (0, 0))).astype(BF16)       # (B, T+2, C)
    h = conv3_gelu(xp[:, 0:T], xp[:, 1:T + 1], xp[:, 2:T + 2],
                   w_c1, params["conv1_b"], out_dtype=BF16)      # (B, T, D)

    # ---- conv2: Conv1d(k=3, s=2, p=1) + GELU, fused with + positional embedding ----
    hp = jnp.pad(h, ((0, 0), (1, 1), (0, 0)))                    # (B, T+2, D)
    h = conv3_gelu(hp[:, 0:2 * S:2], hp[:, 1:2 * S:2], hp[:, 2:2 * S + 2:2],
                   w_c2, params["conv2_b"], pos=params["pos"][:S],
                   out_dtype=F32)                                # (B, S, D)

    # ---- Whisper encoder layers (pre-LN). HF Whisper ignores attention_mask inside
    #      encoder self-attention; it is only used for pooling. ----------------------
    for l in layers:
        h2 = h.reshape(B * S, D)
        qkv = ln_matmul(h2, l["ln1_g"], l["ln1_b"], l["wqkv"], l["bqkv"])   # bf16
        ctx = mha_attention(qkv.reshape(B, S, 3 * D), n_heads, head_dim)
        h = matmul_residual(ctx.reshape(B * S, D), l["wo"], l["bo"], h2)    # f32
        h = ffn_block(h, l["ln2_g"], l["ln2_b"], l["w1"], l["b1"], l["w2"], l["b2"])
        h = h.reshape(B, S, D)

    # ---- final LayerNorm + masked mean pooling over time (mask[:, ::2]) ------------
    mask2 = attention_mask[:, ::2]                               # (B, S)
    pooled = ln_masked_mean_pool(h, params["lnf_g"], params["lnf_b"], mask2)
    return jnp.squeeze(pooled, axis=1)                           # torch .squeeze(), B>1


# ------------------------------------ main -----------------------------------------

if __name__ == "__main__":
    # Small synthetic Whisper-like config. head_dim = 128 keeps the per-head
    # BlockSpec column slices lane-aligned (real Whisper Dh=64: see TODO above).
    B, n_mels, T = 2, 8, 16          # input_values: (B, n_mels, T)  [NCL]
    d_model, n_heads = 256, 2
    ffn_dim, n_layers = 512, 2
    S = T // 2                       # encoder output length (conv2 stride 2)

    key = jax.random.PRNGKey(0)
    k_param, k_in = jax.random.split(key)
    params = init_params(k_param, n_mels, d_model, ffn_dim, n_layers, max_pos=S)

    input_values = jax.random.normal(k_in, (B, n_mels, T), dtype=jnp.float32)
    lengths = jnp.array([[T], [T - 4]], dtype=jnp.int32)
    attention_mask = (jnp.arange(T)[None, :] < lengths).astype(jnp.int32)   # (B, T)

    fwd = jax.jit(functools.partial(whisper_backbone_forward, n_heads=n_heads))
    out = fwd(params, input_values, attention_mask)
    jax.block_until_ready(out)

    assert out.shape == (B, d_model), out.shape
    assert bool(jnp.all(jnp.isfinite(out)))
    print("KERNEL_OK")
</pallas_src>

<mosaic_0001>
module attributes {stable_mosaic.version = 11 : i64} {
  func.func @_conv3_kernel(%arg0: i32, %arg1: i32, %arg2: memref<1x16x8xbf16, #tpu.memory_space<vmem>>, %arg3: memref<1x16x8xbf16, #tpu.memory_space<vmem>>, %arg4: memref<1x16x8xbf16, #tpu.memory_space<vmem>>, %arg5: memref<3x8x256xbf16, #tpu.memory_space<vmem>>, %arg6: memref<1x256xf32, #tpu.memory_space<vmem>>, %arg7: memref<1x16x256xbf16, #tpu.memory_space<vmem>>) attributes {dimension_semantics = [#tpu.dimension_semantics<parallel>, #tpu.dimension_semantics<parallel>], iteration_bounds = array<i64: 2, 1>, scalar_prefetch = 0 : i64, scratch_operands = 0 : i64, tpu.core_type = #tpu.core_type<tc>, window_params = [{transform_indices = @transform_0, window_bounds = array<i64: 1, 16, 8>}, {transform_indices = @transform_1, window_bounds = array<i64: 1, 16, 8>}, {transform_indices = @transform_2, window_bounds = array<i64: 1, 16, 8>}, {pipeline_mode = #tpu.pipeline_mode<synchronous>, transform_indices = @transform_3, window_bounds = array<i64: 3, 8, 256>}, {pipeline_mode = #tpu.pipeline_mode<synchronous>, transform_indices = @transform_4, window_bounds = array<i64: 1, 256>}, {transform_indices = @transform_5, window_bounds = array<i64: 1, 16, 256>}]} {
    %c0 = arith.constant 0 : index
    %c0_0 = arith.constant 0 : index
    %c0_1 = arith.constant 0 : index
    %0 = vector.load %arg2[%c0, %c0_0, %c0_1] : memref<1x16x8xbf16, #tpu.memory_space<vmem>>, vector<1x16x8xbf16>
    %1 = vector.shape_cast %0 : vector<1x16x8xbf16> to vector<16x8xbf16>
    %c0_2 = arith.constant 0 : index
    %c0_3 = arith.constant 0 : index
    %c0_4 = arith.constant 0 : index
    %2 = vector.load %arg5[%c0_2, %c0_3, %c0_4] : memref<3x8x256xbf16, #tpu.memory_space<vmem>>, vector<1x8x256xbf16>
    %3 = vector.shape_cast %2 : vector<1x8x256xbf16> to vector<8x256xbf16>
    %cst = arith.constant dense<0.000000e+00> : vector<16x256xf32>
    %4 = tpu.matmul %1, %3, %cst {dimension_numbers = #tpu.dot_dimension_numbers<[1], [0], [0], [1], [0, 0, 1, 1], [], []>} : vector<16x8xbf16>, vector<8x256xbf16>, vector<16x256xf32> -> vector<16x256xf32>
    %c0_5 = arith.constant 0 : index
    %c0_6 = arith.constant 0 : index
    %c0_7 = arith.constant 0 : index
    %5 = vector.load %arg3[%c0_5, %c0_6, %c0_7] : memref<1x16x8xbf16, #tpu.memory_space<vmem>>, vector<1x16x8xbf16>
    %6 = vector.shape_cast %5 : vector<1x16x8xbf16> to vector<16x8xbf16>
    %c1 = arith.constant 1 : index
    %c0_8 = arith.constant 0 : index
    %c0_9 = arith.constant 0 : index
    %7 = vector.load %arg5[%c1, %c0_8, %c0_9] : memref<3x8x256xbf16, #tpu.memory_space<vmem>>, vector<1x8x256xbf16>
    %8 = vector.shape_cast %7 : vector<1x8x256xbf16> to vector<8x256xbf16>
    %cst_10 = arith.constant dense<0.000000e+00> : vector<16x256xf32>
    %9 = tpu.matmul %6, %8, %cst_10 {dimension_numbers = #tpu.dot_dimension_numbers<[1], [0], [0], [1], [0, 0, 1, 1], [], []>} : vector<16x8xbf16>, vector<8x256xbf16>, vector<16x256xf32> -> vector<16x256xf32>
    %10 = arith.addf %4, %9 : vector<16x256xf32>
    %c0_11 = arith.constant 0 : index
    %c0_12 = arith.constant 0 : index
    %c0_13 = arith.constant 0 : index
    %11 = vector.load %arg4[%c0_11, %c0_12, %c0_13] : memref<1x16x8xbf16, #tpu.memory_space<vmem>>, vector<1x16x8xbf16>
    %12 = vector.shape_cast %11 : vector<1x16x8xbf16> to vector<16x8xbf16>
    %c2 = arith.constant 2 : index
    %c0_14 = arith.constant 0 : index
    %c0_15 = arith.constant 0 : index
    %13 = vector.load %arg5[%c2, %c0_14, %c0_15] : memref<3x8x256xbf16, #tpu.memory_space<vmem>>, vector<1x8x256xbf16>
    %14 = vector.shape_cast %13 : vector<1x8x256xbf16> to vector<8x256xbf16>
    %cst_16 = arith.constant dense<0.000000e+00> : vector<16x256xf32>
    %15 = tpu.matmul %12, %14, %cst_16 {dimension_numbers = #tpu.dot_dimension_numbers<[1], [0], [0], [1], [0, 0, 1, 1], [], []>} : vector<16x8xbf16>, vector<8x256xbf16>, vector<16x256xf32> -> vector<16x256xf32>
    %16 = arith.addf %10, %15 : vector<16x256xf32>
    %c0_17 = arith.constant 0 : index
    %c0_18 = arith.constant 0 : index
    %17 = vector.load %arg6[%c0_17, %c0_18] : memref<1x256xf32, #tpu.memory_space<vmem>>, vector<1x256xf32>
    %18 = vector.broadcast %17 : vector<1x256xf32> to vector<16x256xf32>
    %19 = arith.addf %16, %18 : vector<16x256xf32>
    %cst_19 = arith.constant 5.000000e-01 : f32
    %20 = vector.broadcast %cst_19 : f32 to vector<16x256xf32>
    %21 = arith.mulf %20, %19 : vector<16x256xf32>
    %cst_20 = arith.constant 4.471500e-02 : f32
    %22 = vector.broadcast %cst_20 : f32 to vector<16x256xf32>
    %23 = arith.mulf %22, %19 : vector<16x256xf32>
    %24 = arith.mulf %23, %19 : vector<16x256xf32>
    %25 = arith.mulf %24, %19 : vector<16x256xf32>
    %26 = arith.addf %19, %25 : vector<16x256xf32>
    %cst_21 = arith.constant 0.797884583 : f32
    %27 = vector.broadcast %cst_21 : f32 to vector<16x256xf32>
    %28 = arith.mulf %27, %26 : vector<16x256xf32>
    %29 = math.tanh %28 : vector<16x256xf32>
    %cst_22 = arith.constant 1.000000e+00 : f32
    %30 = vector.broadcast %cst_22 : f32 to vector<16x256xf32>
    %31 = arith.addf %30, %29 : vector<16x256xf32>
    %32 = arith.mulf %21, %31 : vector<16x256xf32>
    %33 = arith.truncf %32 : vector<16x256xf32> to vector<16x256xbf16>
    %c0_23 = arith.constant 0 : index
    %c0_24 = arith.constant 0 : index
    %c0_25 = arith.constant 0 : index
    %34 = vector.load %arg7[%c0_23, %c0_24, %c0_25] : memref<1x16x256xbf16, #tpu.memory_space<vmem>>, vector<1x16x256xbf16>
    %35 = vector.shape_cast %34 : vector<1x16x256xbf16> to vector<16x256xbf16>
    %36 = vector.shape_cast %33 : vector<16x256xbf16> to vector<1x16x256xbf16>
    tpu.vector_store %arg7[%c0_23, %c0_24, %c0_25], %36 {strides = array<i32>} : memref<1x16x256xbf16, #tpu.memory_space<vmem>>, vector<1x16x256xbf16>,
    return
  }
  func.func @transform_0(%arg0: i32, %arg1: i32) -> (i32, i32, i32) {
    %c0_i32 = arith.constant 0 : i32
    %c0_i32_0 = arith.constant 0 : i32
    return %arg0, %arg1, %c0_i32 : i32, i32, i32
  }
  func.func @transform_1(%arg0: i32, %arg1: i32) -> (i32, i32, i32) {
    %c0_i32 = arith.constant 0 : i32
    %c0_i32_0 = arith.constant 0 : i32
    return %arg0, %arg1, %c0_i32 : i32, i32, i32
  }
  func.func @transform_2(%arg0: i32, %arg1: i32) -> (i32, i32, i32) {
    %c0_i32 = arith.constant 0 : i32
    %c0_i32_0 = arith.constant 0 : i32
    return %arg0, %arg1, %c0_i32 : i32, i32, i32
  }
  func.func @transform_3(%arg0: i32, %arg1: i32) -> (i32, i32, i32) {
    %c0_i32 = arith.constant 0 : i32
    %c0_i32_0 = arith.constant 0 : i32
    %c0_i32_1 = arith.constant 0 : i32
    %c0_i32_2 = arith.constant 0 : i32
    return %c0_i32, %c0_i32_0, %c0_i32_1 : i32, i32, i32
  }
  func.func @transform_4(%arg0: i32, %arg1: i32) -> (i32, i32) {
    %c0_i32 = arith.constant 0 : i32
    %c0_i32_0 = arith.constant 0 : i32
    %c0_i32_1 = arith.constant 0 : i32
    return %c0_i32, %c0_i32_0 : i32, i32
  }
  func.func @transform_5(%arg0: i32, %arg1: i32) -> (i32, i32, i32) {
    %c0_i32 = arith.constant 0 : i32
    %c0_i32_0 = arith.constant 0 : i32
    return %arg0, %arg1, %c0_i32 : i32, i32, i32
  }
}

module attributes {stable_mosaic.version = 11 : i64} {
  func.func @_conv3_pos_kernel(%arg0: i32, %arg1: i32, %arg2: memref<1x8x256xbf16, #tpu.memory_space<vmem>>, %arg3: memref<1x8x256xbf16, #tpu.memory_space<vmem>>, %arg4: memref<1x8x256xbf16, #tpu.memory_space<vmem>>, %arg5: memref<3x256x256xbf16, #tpu.memory_space<vmem>>, %arg6: memref<1x256xf32, #tpu.memory_space<vmem>>, %arg7: memref<8x256xf32, #tpu.memory_space<vmem>>, %arg8: memref<1x8x256xf32, #tpu.memory_space<vmem>>) attributes {dimension_semantics = [#tpu.dimension_semantics<parallel>, #tpu.dimension_semantics<parallel>], iteration_bounds = array<i64: 2, 1>, scalar_prefetch = 0 : i64, scratch_operands = 0 : i64, tpu.core_type = #tpu.core_type<tc>, window_params = [{transform_indices = @transform_0, window_bounds = array<i64: 1, 8, 256>}, {transform_indices = @transform_1, window_bounds = array<i64: 1, 8, 256>}, {transform_indices = @transform_2, window_bounds = array<i64: 1, 8, 256>}, {pipeline_mode = #tpu.pipeline_mode<synchronous>, transform_indices = @transform_3, window_bounds = array<i64: 3, 256, 256>}, {pipeline_mode = #tpu.pipeline_mode<synchronous>, transform_indices = @transform_4, window_bounds = array<i64: 1, 256>}, {transform_indices = @transform_5, window_bounds = array<i64: 8, 256>}, {transform_indices = @transform_6, window_bounds = array<i64: 1, 8, 256>}]} {
    %c0 = arith.constant 0 : index
    %c0_0 = arith.constant 0 : index
    %c0_1 = arith.constant 0 : index
    %0 = vector.load %arg2[%c0, %c0_0, %c0_1] : memref<1x8x256xbf16, #tpu.memory_space<vmem>>, vector<1x8x256xbf16>
    %1 = vector.shape_cast %0 : vector<1x8x256xbf16> to vector<8x256xbf16>
    %c0_2 = arith.constant 0 : index
    %c0_3 = arith.constant 0 : index
    %c0_4 = arith.constant 0 : index
    %2 = vector.load %arg5[%c0_2, %c0_3, %c0_4] : memref<3x256x256xbf16, #tpu.memory_space<vmem>>, vector<1x256x256xbf16>
    %3 = vector.shape_cast %2 : vector<1x256x256xbf16> to vector<256x256xbf16>
    %cst = arith.constant dense<0.000000e+00> : vector<8x256xf32>
    %4 = tpu.matmul %1, %3, %cst {dimension_numbers = #tpu.dot_dimension_numbers<[1], [0], [0], [1], [0, 0, 1, 1], [], []>} : vector<8x256xbf16>, vector<256x256xbf16>, vector<8x256xf32> -> vector<8x256xf32>
    %c0_5 = arith.constant 0 : index
    %c0_6 = arith.constant 0 : index
    %c0_7 = arith.constant 0 : index
    %5 = vector.load %arg3[%c0_5, %c0_6, %c0_7] : memref<1x8x256xbf16, #tpu.memory_space<vmem>>, vector<1x8x256xbf16>
    %6 = vector.shape_cast %5 : vector<1x8x256xbf16> to vector<8x256xbf16>
    %c1 = arith.constant 1 : index
    %c0_8 = arith.constant 0 : index
    %c0_9 = arith.constant 0 : index
    %7 = vector.load %arg5[%c1, %c0_8, %c0_9] : memref<3x256x256xbf16, #tpu.memory_space<vmem>>, vector<1x256x256xbf16>
    %8 = vector.shape_cast %7 : vector<1x256x256xbf16> to vector<256x256xbf16>
    %cst_10 = arith.constant dense<0.000000e+00> : vector<8x256xf32>
    %9 = tpu.matmul %6, %8, %cst_10 {dimension_numbers = #tpu.dot_dimension_numbers<[1], [0], [0], [1], [0, 0, 1, 1], [], []>} : vector<8x256xbf16>, vector<256x256xbf16>, vector<8x256xf32> -> vector<8x256xf32>
    %10 = arith.addf %4, %9 : vector<8x256xf32>
    %c0_11 = arith.constant 0 : index
    %c0_12 = arith.constant 0 : index
    %c0_13 = arith.constant 0 : index
    %11 = vector.load %arg4[%c0_11, %c0_12, %c0_13] : memref<1x8x256xbf16, #tpu.memory_space<vmem>>, vector<1x8x256xbf16>
    %12 = vector.shape_cast %11 : vector<1x8x256xbf16> to vector<8x256xbf16>
    %c2 = arith.constant 2 : index
    %c0_14 = arith.constant 0 : index
    %c0_15 = arith.constant 0 : index
    %13 = vector.load %arg5[%c2, %c0_14, %c0_15] : memref<3x256x256xbf16, #tpu.memory_space<vmem>>, vector<1x256x256xbf16>
    %14 = vector.shape_cast %13 : vector<1x256x256xbf16> to vector<256x256xbf16>
    %cst_16 = arith.constant dense<0.000000e+00> : vector<8x256xf32>
    %15 = tpu.matmul %12, %14, %cst_16 {dimension_numbers = #tpu.dot_dimension_numbers<[1], [0], [0], [1], [0, 0, 1, 1], [], []>} : vector<8x256xbf16>, vector<256x256xbf16>, vector<8x256xf32> -> vector<8x256xf32>
    %16 = arith.addf %10, %15 : vector<8x256xf32>
    %c0_17 = arith.constant 0 : index
    %c0_18 = arith.constant 0 : index
    %17 = vector.load %arg6[%c0_17, %c0_18] : memref<1x256xf32, #tpu.memory_space<vmem>>, vector<1x256xf32>
    %18 = vector.broadcast %17 : vector<1x256xf32> to vector<8x256xf32>
    %19 = arith.addf %16, %18 : vector<8x256xf32>
    %cst_19 = arith.constant 5.000000e-01 : f32
    %20 = vector.broadcast %cst_19 : f32 to vector<8x256xf32>
    %21 = arith.mulf %20, %19 : vector<8x256xf32>
    %cst_20 = arith.constant 4.471500e-02 : f32
    %22 = vector.broadcast %cst_20 : f32 to vector<8x256xf32>
    %23 = arith.mulf %22, %19 : vector<8x256xf32>
    %24 = arith.mulf %23, %19 : vector<8x256xf32>
    %25 = arith.mulf %24, %19 : vector<8x256xf32>
    %26 = arith.addf %19, %25 : vector<8x256xf32>
    %cst_21 = arith.constant 0.797884583 : f32
    %27 = vector.broadcast %cst_21 : f32 to vector<8x256xf32>
    %28 = arith.mulf %27, %26 : vector<8x256xf32>
    %29 = math.tanh %28 : vector<8x256xf32>
    %cst_22 = arith.constant 1.000000e+00 : f32
    %30 = vector.broadcast %cst_22 : f32 to vector<8x256xf32>
    %31 = arith.addf %30, %29 : vector<8x256xf32>
    %32 = arith.mulf %21, %31 : vector<8x256xf32>
    %c0_23 = arith.constant 0 : index
    %c0_24 = arith.constant 0 : index
    %33 = vector.load %arg7[%c0_23, %c0_24] : memref<8x256xf32, #tpu.memory_space<vmem>>, vector<8x256xf32>
    %34 = arith.addf %32, %33 : vector<8x256xf32>
    %c0_25 = arith.constant 0 : index
    %c0_26 = arith.constant 0 : index
    %c0_27 = arith.constant 0 : index
    %35 = vector.load %arg8[%c0_25, %c0_26, %c0_27] : memref<1x8x256xf32, #tpu.memory_space<vmem>>, vector<1x8x256xf32>
    %36 = vector.shape_cast %35 : vector<1x8x256xf32> to vector<8x256xf32>
    %37 = vector.shape_cast %34 : vector<8x256xf32> to vector<1x8x256xf32>
    tpu.vector_store %arg8[%c0_25, %c0_26, %c0_27], %37 {strides = array<i32>} : memref<1x8x256xf32, #tpu.memory_space<vmem>>, vector<1x8x256xf32>,
    return
  }
  func.func @transform_0(%arg0: i32, %arg1: i32) -> (i32, i32, i32) {
    %c0_i32 = arith.constant 0 : i32
    %c0_i32_0 = arith.constant 0 : i32
    return %arg0, %arg1, %c0_i32 : i32, i32, i32
  }
  func.func @transform_1(%arg0: i32, %arg1: i32) -> (i32, i32, i32) {
    %c0_i32 = arith.constant 0 : i32
    %c0_i32_0 = arith.constant 0 : i32
    return %arg0, %arg1, %c0_i32 : i32, i32, i32
  }
  func.func @transform_2(%arg0: i32, %arg1: i32) -> (i32, i32, i32) {
    %c0_i32 = arith.constant 0 : i32
    %c0_i32_0 = arith.constant 0 : i32
    return %arg0, %arg1, %c0_i32 : i32, i32, i32
  }
  func.func @transform_3(%arg0: i32, %arg1: i32) -> (i32, i32, i32) {
    %c0_i32 = arith.constant 0 : i32
    %c0_i32_0 = arith.constant 0 : i32
    %c0_i32_1 = arith.constant 0 : i32
    %c0_i32_2 = arith.constant 0 : i32
    return %c0_i32, %c0_i32_0, %c0_i32_1 : i32, i32, i32
  }
  func.func @transform_4(%arg0: i32, %arg1: i32) -> (i32, i32) {
    %c0_i32 = arith.constant 0 : i32
    %c0_i32_0 = arith.constant 0 : i32
    %c0_i32_1 = arith.constant 0 : i32
    return %c0_i32, %c0_i32_0 : i32, i32
  }
  func.func @transform_5(%arg0: i32, %arg1: i32) -> (i32, i32) {
    %c0_i32 = arith.constant 0 : i32
    %c0_i32_0 = arith.constant 0 : i32
    return %arg1, %c0_i32 : i32, i32
  }
  func.func @transform_6(%arg0: i32, %arg1: i32) -> (i32, i32, i32) {
    %c0_i32 = arith.constant 0 : i32
    %c0_i32_0 = arith.constant 0 : i32
    return %arg0, %arg1, %c0_i32 : i32, i32, i32
  }
}

module attributes {stable_mosaic.version = 11 : i64} {
  func.func @_flash_attn_kernel(%arg0: i32, %arg1: i32, %arg2: i32, %arg3: memref<1x8x128xbf16, #tpu.memory_space<vmem>>, %arg4: memref<1x8x128xbf16, #tpu.memory_space<vmem>>, %arg5: memref<1x8x128xbf16, #tpu.memory_space<vmem>>, %arg6: memref<1x8x128xbf16, #tpu.memory_space<vmem>>, %arg7: memref<8x1xf32, #tpu.memory_space<vmem>>, %arg8: memref<8x1xf32, #tpu.memory_space<vmem>>, %arg9: memref<8x128xf32, #tpu.memory_space<vmem>>) attributes {dimension_semantics = [#tpu.dimension_semantics<parallel>, #tpu.dimension_semantics<parallel>, #tpu.dimension_semantics<arbitrary>], iteration_bounds = array<i64: 2, 2, 1>, scalar_prefetch = 0 : i64, scratch_operands = 3 : i64, tpu.core_type = #tpu.core_type<tc>, window_params = [{transform_indices = @transform_0, window_bounds = array<i64: 1, 8, 128>}, {transform_indices = @transform_1, window_bounds = array<i64: 1, 8, 128>}, {transform_indices = @transform_2, window_bounds = array<i64: 1, 8, 128>}, {transform_indices = @transform_3, window_bounds = array<i64: 1, 8, 128>}]} {
    %c0_i32 = arith.constant 0 : i32
    %0 = arith.cmpi eq, %arg2, %c0_i32 : i32
    %1 = arith.extui %0 : i1 to i32
    %c0_i32_0 = arith.constant 0 : i32
    %2 = arith.cmpi ne, %1, %c0_i32_0 : i32
    scf.if %2 {
      %cst_26 = arith.constant 0xFF800000 : f32
      %36 = vector.broadcast %cst_26 : f32 to vector<8x1xf32>
      %c0_27 = arith.constant 0 : index
      %c0_28 = arith.constant 0 : index
      %37 = vector.load %arg7[%c0_27, %c0_28] : memref<8x1xf32, #tpu.memory_space<vmem>>, vector<8x1xf32>
      tpu.vector_store %arg7[%c0_27, %c0_28], %36 {strides = array<i32>} : memref<8x1xf32, #tpu.memory_space<vmem>>, vector<8x1xf32>,
      %cst_29 = arith.constant 0.000000e+00 : f32
      %38 = vector.broadcast %cst_29 : f32 to vector<8x1xf32>
      %c0_30 = arith.constant 0 : index
      %c0_31 = arith.constant 0 : index
      %39 = vector.load %arg8[%c0_30, %c0_31] : memref<8x1xf32, #tpu.memory_space<vmem>>, vector<8x1xf32>
      tpu.vector_store %arg8[%c0_30, %c0_31], %38 {strides = array<i32>} : memref<8x1xf32, #tpu.memory_space<vmem>>, vector<8x1xf32>,
      %cst_32 = arith.constant 0.000000e+00 : f32
      %40 = vector.broadcast %cst_32 : f32 to vector<8x128xf32>
      %c0_33 = arith.constant 0 : index
      %c0_34 = arith.constant 0 : index
      %41 = vector.load %arg9[%c0_33, %c0_34] : memref<8x128xf32, #tpu.memory_space<vmem>>, vector<8x128xf32>
      tpu.vector_store %arg9[%c0_33, %c0_34], %40 {strides = array<i32>} : memref<8x128xf32, #tpu.memory_space<vmem>>, vector<8x128xf32>,
    } else {
    }
    %c0 = arith.constant 0 : index
    %c0_1 = arith.constant 0 : index
    %c0_2 = arith.constant 0 : index
    %3 = vector.load %arg3[%c0, %c0_1, %c0_2] : memref<1x8x128xbf16, #tpu.memory_space<vmem>>, vector<1x8x128xbf16>
    %4 = vector.shape_cast %3 : vector<1x8x128xbf16> to vector<8x128xbf16>
    %c0_3 = arith.constant 0 : index
    %c0_4 = arith.constant 0 : index
    %c0_5 = arith.constant 0 : index
    %5 = vector.load %arg4[%c0_3, %c0_4, %c0_5] : memref<1x8x128xbf16, #tpu.memory_space<vmem>>, vector<1x8x128xbf16>
    %6 = vector.shape_cast %5 : vector<1x8x128xbf16> to vector<8x128xbf16>
    %c0_6 = arith.constant 0 : index
    %c0_7 = arith.constant 0 : index
    %c0_8 = arith.constant 0 : index
    %7 = vector.load %arg5[%c0_6, %c0_7, %c0_8] : memref<1x8x128xbf16, #tpu.memory_space<vmem>>, vector<1x8x128xbf16>
    %8 = vector.shape_cast %7 : vector<1x8x128xbf16> to vector<8x128xbf16>
    %cst = arith.constant dense<0.000000e+00> : vector<8x8xf32>
    %9 = tpu.matmul %4, %6, %cst {dimension_numbers = #tpu.dot_dimension_numbers<[1], [1], [0], [0], [0, 0, 1, 0], [], []>} : vector<8x128xbf16>, vector<8x128xbf16>, vector<8x8xf32> -> vector<8x8xf32>
    %c0_9 = arith.constant 0 : index
    %c0_10 = arith.constant 0 : index
    %10 = vector.load %arg7[%c0_9, %c0_10] : memref<8x1xf32, #tpu.memory_space<vmem>>, vector<8x1xf32>
    %cst_11 = arith.constant dense<0xFF800000> : vector<8xf32>
    %11 = vector.multi_reduction <maximumf>, %9, %cst_11 [1] : vector<8x8xf32> to vector<8xf32>
    %12 = vector.shape_cast %11 : vector<8xf32> to vector<8x1xf32>
    %13 = arith.maximumf %10, %12 : vector<8x1xf32>
    %14 = arith.subf %10, %13 : vector<8x1xf32>
    %15 = math.exp %14 : vector<8x1xf32>
    %16 = vector.broadcast %13 : vector<8x1xf32> to vector<8x8xf32>
    %17 = arith.subf %9, %16 : vector<8x8xf32>
    %18 = math.exp %17 : vector<8x8xf32>
    %c0_12 = arith.constant 0 : index
    %c0_13 = arith.constant 0 : index
    %19 = vector.load %arg8[%c0_12, %c0_13] : memref<8x1xf32, #tpu.memory_space<vmem>>, vector<8x1xf32>
    %20 = arith.mulf %15, %19 : vector<8x1xf32>
    %cst_14 = arith.constant dense<0.000000e+00> : vector<8xf32>
    %21 = vector.multi_reduction <add>, %18, %cst_14 [1] : vector<8x8xf32> to vector<8xf32>
    %22 = vector.shape_cast %21 : vector<8xf32> to vector<8x1xf32>
    %23 = arith.addf %20, %22 : vector<8x1xf32>
    %c0_15 = arith.constant 0 : index
    %c0_16 = arith.constant 0 : index
    %24 = vector.load %arg8[%c0_15, %c0_16] : memref<8x1xf32, #tpu.memory_space<vmem>>, vector<8x1xf32>
    tpu.vector_store %arg8[%c0_15, %c0_16], %23 {strides = array<i32>} : memref<8x1xf32, #tpu.memory_space<vmem>>, vector<8x1xf32>,
    %c0_17 = arith.constant 0 : index
    %c0_18 = arith.constant 0 : index
    %25 = vector.load %arg9[%c0_17, %c0_18] : memref<8x128xf32, #tpu.memory_space<vmem>>, vector<8x128xf32>
    %26 = vector.broadcast %15 : vector<8x1xf32> to vector<8x128xf32>
    %27 = arith.mulf %26, %25 : vector<8x128xf32>
    %28 = arith.truncf %18 : vector<8x8xf32> to vector<8x8xbf16>
    %cst_19 = arith.constant dense<0.000000e+00> : vector<8x128xf32>
    %29 = tpu.matmul %28, %8, %cst_19 {dimension_numbers = #tpu.dot_dimension_numbers<[1], [0], [0], [1], [0, 0, 1, 1], [], []>} : vector<8x8xbf16>, vector<8x128xbf16>, vector<8x128xf32> -> vector<8x128xf32>
    %30 = arith.addf %27, %29 : vector<8x128xf32>
    %c0_20 = arith.constant 0 : index
    %c0_21 = arith.constant 0 : index
    %31 = vector.load %arg9[%c0_20, %c0_21] : memref<8x128xf32, #tpu.memory_space<vmem>>, vector<8x128xf32>
    tpu.vector_store %arg9[%c0_20, %c0_21], %30 {strides = array<i32>} : memref<8x128xf32, #tpu.memory_space<vmem>>, vector<8x128xf32>,
    %c0_22 = arith.constant 0 : index
    %c0_23 = arith.constant 0 : index
    %32 = vector.load %arg7[%c0_22, %c0_23] : memref<8x1xf32, #tpu.memory_space<vmem>>, vector<8x1xf32>
    tpu.vector_store %arg7[%c0_22, %c0_23], %13 {strides = array<i32>} : memref<8x1xf32, #tpu.memory_space<vmem>>, vector<8x1xf32>,
    %c0_i32_24 = arith.constant 0 : i32
    %33 = arith.cmpi eq, %arg2, %c0_i32_24 : i32
    %34 = arith.extui %33 : i1 to i32
    %c0_i32_25 = arith.constant 0 : i32
    %35 = arith.cmpi ne, %34, %c0_i32_25 : i32
    scf.if %35 {
      %c0_26 = arith.constant 0 : index
      %c0_27 = arith.constant 0 : index
      %36 = vector.load %arg9[%c0_26, %c0_27] : memref<8x128xf32, #tpu.memory_space<vmem>>, vector<8x128xf32>
      %c0_28 = arith.constant 0 : index
      %c0_29 = arith.constant 0 : index
      %37 = vector.load %arg8[%c0_28, %c0_29] : memref<8x1xf32, #tpu.memory_space<vmem>>, vector<8x1xf32>
      %38 = tpu.reciprocal %37 {approx = true} : vector<8x1xf32> -> vector<8x1xf32>
      %39 = vector.broadcast %38 : vector<8x1xf32> to vector<8x128xf32>
      %40 = arith.mulf %36, %39 : vector<8x128xf32>
      %41 = arith.truncf %40 : vector<8x128xf32> to vector<8x128xbf16>
      %c0_30 = arith.constant 0 : index
      %c0_31 = arith.constant 0 : index
      %c0_32 = arith.constant 0 : index
      %42 = vector.load %arg6[%c0_30, %c0_31, %c0_32] : memref<1x8x128xbf16, #tpu.memory_space<vmem>>, vector<1x8x128xbf16>
      %43 = vector.shape_cast %42 : vector<1x8x128xbf16> to vector<8x128xbf16>
      %44 = vector.shape_cast %41 : vector<8x128xbf16> to vector<1x8x128xbf16>
      tpu.vector_store %arg6[%c0_30, %c0_31, %c0_32], %44 {strides = array<i32>} : memref<1x8x128xbf16, #tpu.memory_space<vmem>>, vector<1x8x128xbf16>,
    } else {
    }
    return
  }
  func.func @transform_0(%arg0: i32, %arg1: i32, %arg2: i32) -> (i32, i32, i32) {
    %c0_i32 = arith.constant 0 : i32
    %c0_i32_0 = arith.constant 0 : i32
    return %arg0, %c0_i32, %arg1 : i32, i32, i32
  }
  func.func @transform_1(%arg0: i32, %arg1: i32, %arg2: i32) -> (i32, i32, i32) {
    %c2_i32 = arith.constant 2 : i32
    %0 = arith.addi %c2_i32, %arg1 : i32
    %c0_i32 = arith.constant 0 : i32
    return %arg0, %arg2, %0 : i32, i32, i32
  }
  func.func @transform_2(%arg0: i32, %arg1: i32, %arg2: i32) -> (i32, i32, i32) {
    %c4_i32 = arith.constant 4 : i32
    %0 = arith.addi %c4_i32, %arg1 : i32
    %c0_i32 = arith.constant 0 : i32
    return %arg0, %arg2, %0 : i32, i32, i32
  }
  func.func @transform_3(%arg0: i32, %arg1: i32, %arg2: i32) -> (i32, i32, i32) {
    %c0_i32 = arith.constant 0 : i32
    %c0_i32_0 = arith.constant 0 : i32
    return %arg0, %c0_i32, %arg1 : i32, i32, i32
  }
}

module attributes {stable_mosaic.version = 11 : i64} {
  func.func @_ln_matmul_kernel(%arg0: i32, %arg1: i32, %arg2: memref<16x256xf32, #tpu.memory_space<vmem>>, %arg3: memref<1x256xf32, #tpu.memory_space<vmem>>, %arg4: memref<1x256xf32, #tpu.memory_space<vmem>>, %arg5: memref<256x256xbf16, #tpu.memory_space<vmem>>, %arg6: memref<1x256xf32, #tpu.memory_space<vmem>>, %arg7: memref<16x256xbf16, #tpu.memory_space<vmem>>, %arg8: memref<16x256xbf16, #tpu.memory_space<vmem>>) attributes {dimension_semantics = [#tpu.dimension_semantics<parallel>, #tpu.dimension_semantics<arbitrary>], iteration_bounds = array<i64: 1, 3>, scalar_prefetch = 0 : i64, scratch_operands = 1 : i64, tpu.core_type = #tpu.core_type<tc>, window_params = [{transform_indices = @transform_0, window_bounds = array<i64: 16, 256>}, {pipeline_mode = #tpu.pipeline_mode<synchronous>, transform_indices = @transform_1, window_bounds = array<i64: 1, 256>}, {pipeline_mode = #tpu.pipeline_mode<synchronous>, transform_indices = @transform_2, window_bounds = array<i64: 1, 256>}, {transform_indices = @transform_3, window_bounds = array<i64: 256, 256>}, {transform_indices = @transform_4, window_bounds = array<i64: 1, 256>}, {transform_indices = @transform_5, window_bounds = array<i64: 16, 256>}]} {
    %c0_i32 = arith.constant 0 : i32
    %0 = arith.cmpi eq, %arg1, %c0_i32 : i32
    %1 = arith.extui %0 : i1 to i32
    %c0_i32_0 = arith.constant 0 : i32
    %2 = arith.cmpi ne, %1, %c0_i32_0 : i32
    scf.if %2 {
      %c0_8 = arith.constant 0 : index
      %c0_9 = arith.constant 0 : index
      %11 = vector.load %arg2[%c0_8, %c0_9] : memref<16x256xf32, #tpu.memory_space<vmem>>, vector<16x256xf32>
      %c0_10 = arith.constant 0 : index
      %c0_11 = arith.constant 0 : index
      %12 = vector.load %arg3[%c0_10, %c0_11] : memref<1x256xf32, #tpu.memory_space<vmem>>, vector<1x256xf32>
      %c0_12 = arith.constant 0 : index
      %c0_13 = arith.constant 0 : index
      %13 = vector.load %arg4[%c0_12, %c0_13] : memref<1x256xf32, #tpu.memory_space<vmem>>, vector<1x256xf32>
      %cst_14 = arith.constant dense<0.000000e+00> : vector<16xf32>
      %14 = vector.multi_reduction <add>, %11, %cst_14 [1] : vector<16x256xf32> to vector<16xf32>
      %15 = vector.shape_cast %14 : vector<16xf32> to vector<16x1xf32>
      %cst_15 = arith.constant 2.560000e+02 : f32
      %16 = vector.broadcast %cst_15 : f32 to vector<16x1xf32>
      %17 = arith.divf %15, %16 : vector<16x1xf32>
      %18 = vector.broadcast %17 : vector<16x1xf32> to vector<16x256xf32>
      %19 = arith.subf %11, %18 : vector<16x256xf32>
      %20 = arith.mulf %19, %19 : vector<16x256xf32>
      %cst_16 = arith.constant dense<0.000000e+00> : vector<16xf32>
      %21 = vector.multi_reduction <add>, %20, %cst_16 [1] : vector<16x256xf32> to vector<16xf32>
      %22 = vector.shape_cast %21 : vector<16xf32> to vector<16x1xf32>
      %cst_17 = arith.constant 2.560000e+02 : f32
      %23 = vector.broadcast %cst_17 : f32 to vector<16x1xf32>
      %24 = arith.divf %22, %23 : vector<16x1xf32>
      %25 = vector.broadcast %17 : vector<16x1xf32> to vector<16x256xf32>
      %26 = arith.subf %11, %25 : vector<16x256xf32>
      %cst_18 = arith.constant 9.99999974E-6 : f32
      %27 = vector.broadcast %cst_18 : f32 to vector<16x1xf32>
      %28 = arith.addf %24, %27 : vector<16x1xf32>
      %29 = math.rsqrt %28 : vector<16x1xf32>
      %30 = vector.broadcast %29 : vector<16x1xf32> to vector<16x256xf32>
      %31 = arith.mulf %26, %30 : vector<16x256xf32>
      %32 = vector.broadcast %12 : vector<1x256xf32> to vector<16x256xf32>
      %33 = arith.mulf %31, %32 : vector<16x256xf32>
      %34 = vector.broadcast %13 : vector<1x256xf32> to vector<16x256xf32>
      %35 = arith.addf %33, %34 : vector<16x256xf32>
      %36 = arith.truncf %35 : vector<16x256xf32> to vector<16x256xbf16>
      %c0_19 = arith.constant 0 : index
      %c0_20 = arith.constant 0 : index
      %37 = vector.load %arg8[%c0_19, %c0_20] : memref<16x256xbf16, #tpu.memory_space<vmem>>, vector<16x256xbf16>
      tpu.vector_store %arg8[%c0_19, %c0_20], %36 {strides = array<i32>} : memref<16x256xbf16, #tpu.memory_space<vmem>>, vector<16x256xbf16>,
    } else {
    }
    %c0 = arith.constant 0 : index
    %c0_1 = arith.constant 0 : index
    %3 = vector.load %arg8[%c0, %c0_1] : memref<16x256xbf16, #tpu.memory_space<vmem>>, vector<16x256xbf16>
    %c0_2 = arith.constant 0 : index
    %c0_3 = arith.constant 0 : index
    %4 = vector.load %arg5[%c0_2, %c0_3] : memref<256x256xbf16, #tpu.memory_space<vmem>>, vector<256x256xbf16>
    %cst = arith.constant dense<0.000000e+00> : vector<16x256xf32>
    %5 = tpu.matmul %3, %4, %cst {dimension_numbers = #tpu.dot_dimension_numbers<[1], [0], [0], [1], [0, 0, 1, 1], [], []>} : vector<16x256xbf16>, vector<256x256xbf16>, vector<16x256xf32> -> vector<16x256xf32>
    %c0_4 = arith.constant 0 : index
    %c0_5 = arith.constant 0 : index
    %6 = vector.load %arg6[%c0_4, %c0_5] : memref<1x256xf32, #tpu.memory_space<vmem>>, vector<1x256xf32>
    %7 = vector.broadcast %6 : vector<1x256xf32> to vector<16x256xf32>
    %8 = arith.addf %5, %7 : vector<16x256xf32>
    %9 = arith.truncf %8 : vector<16x256xf32> to vector<16x256xbf16>
    %c0_6 = arith.constant 0 : index
    %c0_7 = arith.constant 0 : index
    %10 = vector.load %arg7[%c0_6, %c0_7] : memref<16x256xbf16, #tpu.memory_space<vmem>>, vector<16x256xbf16>
    tpu.vector_store %arg7[%c0_6, %c0_7], %9 {strides = array<i32>} : memref<16x256xbf16, #tpu.memory_space<vmem>>, vector<16x256xbf16>,
    return
  }
  func.func @transform_0(%arg0: i32, %arg1: i32) -> (i32, i32) {
    %c0_i32 = arith.constant 0 : i32
    %c0_i32_0 = arith.constant 0 : i32
    return %arg0, %c0_i32 : i32, i32
  }
  func.func @transform_1(%arg0: i32, %arg1: i32) -> (i32, i32) {
    %c0_i32 = arith.constant 0 : i32
    %c0_i32_0 = arith.constant 0 : i32
    %c0_i32_1 = arith.constant 0 : i32
    return %c0_i32, %c0_i32_0 : i32, i32
  }
  func.func @transform_2(%arg0: i32, %arg1: i32) -> (i32, i32) {
    %c0_i32 = arith.constant 0 : i32
    %c0_i32_0 = arith.constant 0 : i32
    %c0_i32_1 = arith.constant 0 : i32
    return %c0_i32, %c0_i32_0 : i32, i32
  }
  func.func @transform_3(%arg0: i32, %arg1: i32) -> (i32, i32) {
    %c0_i32 = arith.constant 0 : i32
    %c0_i32_0 = arith.constant 0 : i32
    return %c0_i32, %arg1 : i32, i32
  }
  func.func @transform_4(%arg0: i32, %arg1: i32) -> (i32, i32) {
    %c0_i32 = arith.constant 0 : i32
    %c0_i32_0 = arith.constant 0 : i32
    return %c0_i32, %arg1 : i32, i32
  }
  func.func @transform_5(%arg0: i32, %arg1: i32) -> (i32, i32) {
    %c0_i32 = arith.constant 0 : i32
    return %arg0, %arg1 : i32, i32
  }
}

module attributes {stable_mosaic.version = 11 : i64} {
  func.func @_matmul_residual_kernel(%arg0: i32, %arg1: i32, %arg2: memref<16x256xbf16, #tpu.memory_space<vmem>>, %arg3: memref<256x256xbf16, #tpu.memory_space<vmem>>, %arg4: memref<1x256xf32, #tpu.memory_space<vmem>>, %arg5: memref<16x256xf32, #tpu.memory_space<vmem>>, %arg6: memref<16x256xf32, #tpu.memory_space<vmem>>) attributes {dimension_semantics = [#tpu.dimension_semantics<parallel>, #tpu.dimension_semantics<parallel>], iteration_bounds = array<i64: 1, 1>, scalar_prefetch = 0 : i64, scratch_operands = 0 : i64, tpu.core_type = #tpu.core_type<tc>, window_params = [{transform_indices = @transform_0, window_bounds = array<i64: 16, 256>}, {transform_indices = @transform_1, window_bounds = array<i64: 256, 256>}, {transform_indices = @transform_2, window_bounds = array<i64: 1, 256>}, {transform_indices = @transform_3, window_bounds = array<i64: 16, 256>}, {transform_indices = @transform_4, window_bounds = array<i64: 16, 256>}]} {
    %c0 = arith.constant 0 : index
    %c0_0 = arith.constant 0 : index
    %0 = vector.load %arg2[%c0, %c0_0] : memref<16x256xbf16, #tpu.memory_space<vmem>>, vector<16x256xbf16>
    %c0_1 = arith.constant 0 : index
    %c0_2 = arith.constant 0 : index
    %1 = vector.load %arg3[%c0_1, %c0_2] : memref<256x256xbf16, #tpu.memory_space<vmem>>, vector<256x256xbf16>
    %cst = arith.constant dense<0.000000e+00> : vector<16x256xf32>
    %2 = tpu.matmul %0, %1, %cst {dimension_numbers = #tpu.dot_dimension_numbers<[1], [0], [0], [1], [0, 0, 1, 1], [], []>} : vector<16x256xbf16>, vector<256x256xbf16>, vector<16x256xf32> -> vector<16x256xf32>
    %c0_3 = arith.constant 0 : index
    %c0_4 = arith.constant 0 : index
    %3 = vector.load %arg5[%c0_3, %c0_4] : memref<16x256xf32, #tpu.memory_space<vmem>>, vector<16x256xf32>
    %4 = arith.addf %3, %2 : vector<16x256xf32>
    %c0_5 = arith.constant 0 : index
    %c0_6 = arith.constant 0 : index
    %5 = vector.load %arg4[%c0_5, %c0_6] : memref<1x256xf32, #tpu.memory_space<vmem>>, vector<1x256xf32>
    %6 = vector.broadcast %5 : vector<1x256xf32> to vector<16x256xf32>
    %7 = arith.addf %4, %6 : vector<16x256xf32>
    %c0_7 = arith.constant 0 : index
    %c0_8 = arith.constant 0 : index
    %8 = vector.load %arg6[%c0_7, %c0_8] : memref<16x256xf32, #tpu.memory_space<vmem>>, vector<16x256xf32>
    tpu.vector_store %arg6[%c0_7, %c0_8], %7 {strides = array<i32>} : memref<16x256xf32, #tpu.memory_space<vmem>>, vector<16x256xf32>,
    return
  }
  func.func @transform_0(%arg0: i32, %arg1: i32) -> (i32, i32) {
    %c0_i32 = arith.constant 0 : i32
    %c0_i32_0 = arith.constant 0 : i32
    return %arg0, %c0_i32 : i32, i32
  }
  func.func @transform_1(%arg0: i32, %arg1: i32) -> (i32, i32) {
    %c0_i32 = arith.constant 0 : i32
    %c0_i32_0 = arith.constant 0 : i32
    return %c0_i32, %arg1 : i32, i32
  }
  func.func @transform_2(%arg0: i32, %arg1: i32) -> (i32, i32) {
    %c0_i32 = arith.constant 0 : i32
    %c0_i32_0 = arith.constant 0 : i32
    return %c0_i32, %arg1 : i32, i32
  }
  func.func @transform_3(%arg0: i32, %arg1: i32) -> (i32, i32) {
    %c0_i32 = arith.constant 0 : i32
    return %arg0, %arg1 : i32, i32
  }
  func.func @transform_4(%arg0: i32, %arg1: i32) -> (i32, i32) {
    %c0_i32 = arith.constant 0 : i32
    return %arg0, %arg1 : i32, i32
  }
}

module attributes {stable_mosaic.version = 11 : i64} {
  func.func @_ffn_kernel(%arg0: i32, %arg1: i32, %arg2: memref<16x256xf32, #tpu.memory_space<vmem>>, %arg3: memref<1x256xf32, #tpu.memory_space<vmem>>, %arg4: memref<1x256xf32, #tpu.memory_space<vmem>>, %arg5: memref<256x512xbf16, #tpu.memory_space<vmem>>, %arg6: memref<1x512xf32, #tpu.memory_space<vmem>>, %arg7: memref<512x256xbf16, #tpu.memory_space<vmem>>, %arg8: memref<1x256xf32, #tpu.memory_space<vmem>>, %arg9: memref<16x256xf32, #tpu.memory_space<vmem>>, %arg10: memref<16x256xbf16, #tpu.memory_space<vmem>>, %arg11: memref<16x256xf32, #tpu.memory_space<vmem>>) attributes {dimension_semantics = [#tpu.dimension_semantics<parallel>, #tpu.dimension_semantics<arbitrary>], iteration_bounds = array<i64: 1, 1>, scalar_prefetch = 0 : i64, scratch_operands = 2 : i64, tpu.core_type = #tpu.core_type<tc>, window_params = [{transform_indices = @transform_0, window_bounds = array<i64: 16, 256>}, {pipeline_mode = #tpu.pipeline_mode<synchronous>, transform_indices = @transform_1, window_bounds = array<i64: 1, 256>}, {pipeline_mode = #tpu.pipeline_mode<synchronous>, transform_indices = @transform_2, window_bounds = array<i64: 1, 256>}, {transform_indices = @transform_3, window_bounds = array<i64: 256, 512>}, {transform_indices = @transform_4, window_bounds = array<i64: 1, 512>}, {transform_indices = @transform_5, window_bounds = array<i64: 512, 256>}, {pipeline_mode = #tpu.pipeline_mode<synchronous>, transform_indices = @transform_6, window_bounds = array<i64: 1, 256>}, {transform_indices = @transform_7, window_bounds = array<i64: 16, 256>}]} {
    %c0_i32 = arith.constant 0 : i32
    %0 = arith.cmpi eq, %arg1, %c0_i32 : i32
    %1 = arith.extui %0 : i1 to i32
    %c0_i32_0 = arith.constant 0 : i32
    %2 = arith.cmpi ne, %1, %c0_i32_0 : i32
    scf.if %2 {
      %c0_19 = arith.constant 0 : index
      %c0_20 = arith.constant 0 : index
      %31 = vector.load %arg2[%c0_19, %c0_20] : memref<16x256xf32, #tpu.memory_space<vmem>>, vector<16x256xf32>
      %c0_21 = arith.constant 0 : index
      %c0_22 = arith.constant 0 : index
      %32 = vector.load %arg3[%c0_21, %c0_22] : memref<1x256xf32, #tpu.memory_space<vmem>>, vector<1x256xf32>
      %c0_23 = arith.constant 0 : index
      %c0_24 = arith.constant 0 : index
      %33 = vector.load %arg4[%c0_23, %c0_24] : memref<1x256xf32, #tpu.memory_space<vmem>>, vector<1x256xf32>
      %cst_25 = arith.constant dense<0.000000e+00> : vector<16xf32>
      %34 = vector.multi_reduction <add>, %31, %cst_25 [1] : vector<16x256xf32> to vector<16xf32>
      %35 = vector.shape_cast %34 : vector<16xf32> to vector<16x1xf32>
      %cst_26 = arith.constant 2.560000e+02 : f32
      %36 = vector.broadcast %cst_26 : f32 to vector<16x1xf32>
      %37 = arith.divf %35, %36 : vector<16x1xf32>
      %38 = vector.broadcast %37 : vector<16x1xf32> to vector<16x256xf32>
      %39 = arith.subf %31, %38 : vector<16x256xf32>
      %40 = arith.mulf %39, %39 : vector<16x256xf32>
      %cst_27 = arith.constant dense<0.000000e+00> : vector<16xf32>
      %41 = vector.multi_reduction <add>, %40, %cst_27 [1] : vector<16x256xf32> to vector<16xf32>
      %42 = vector.shape_cast %41 : vector<16xf32> to vector<16x1xf32>
      %cst_28 = arith.constant 2.560000e+02 : f32
      %43 = vector.broadcast %cst_28 : f32 to vector<16x1xf32>
      %44 = arith.divf %42, %43 : vector<16x1xf32>
      %45 = vector.broadcast %37 : vector<16x1xf32> to vector<16x256xf32>
      %46 = arith.subf %31, %45 : vector<16x256xf32>
      %cst_29 = arith.constant 9.99999974E-6 : f32
      %47 = vector.broadcast %cst_29 : f32 to vector<16x1xf32>
      %48 = arith.addf %44, %47 : vector<16x1xf32>
      %49 = math.rsqrt %48 : vector<16x1xf32>
      %50 = vector.broadcast %49 : vector<16x1xf32> to vector<16x256xf32>
      %51 = arith.mulf %46, %50 : vector<16x256xf32>
      %52 = vector.broadcast %32 : vector<1x256xf32> to vector<16x256xf32>
      %53 = arith.mulf %51, %52 : vector<16x256xf32>
      %54 = vector.broadcast %33 : vector<1x256xf32> to vector<16x256xf32>
      %55 = arith.addf %53, %54 : vector<16x256xf32>
      %56 = arith.truncf %55 : vector<16x256xf32> to vector<16x256xbf16>
      %c0_30 = arith.constant 0 : index
      %c0_31 = arith.constant 0 : index
      %57 = vector.load %arg10[%c0_30, %c0_31] : memref<16x256xbf16, #tpu.memory_space<vmem>>, vector<16x256xbf16>
      tpu.vector_store %arg10[%c0_30, %c0_31], %56 {strides = array<i32>} : memref<16x256xbf16, #tpu.memory_space<vmem>>, vector<16x256xbf16>,
      %cst_32 = arith.constant 0.000000e+00 : f32
      %58 = vector.broadcast %cst_32 : f32 to vector<16x256xf32>
      %c0_33 = arith.constant 0 : index
      %c0_34 = arith.constant 0 : index
      %59 = vector.load %arg11[%c0_33, %c0_34] : memref<16x256xf32, #tpu.memory_space<vmem>>, vector<16x256xf32>
      tpu.vector_store %arg11[%c0_33, %c0_34], %58 {strides = array<i32>} : memref<16x256xf32, #tpu.memory_space<vmem>>, vector<16x256xf32>,
    } else {
    }
    %c0 = arith.constant 0 : index
    %c0_1 = arith.constant 0 : index
    %3 = vector.load %arg10[%c0, %c0_1] : memref<16x256xbf16, #tpu.memory_space<vmem>>, vector<16x256xbf16>
    %c0_2 = arith.constant 0 : index
    %c0_3 = arith.constant 0 : index
    %4 = vector.load %arg5[%c0_2, %c0_3] : memref<256x512xbf16, #tpu.memory_space<vmem>>, vector<256x512xbf16>
    %cst = arith.constant dense<0.000000e+00> : vector<16x512xf32>
    %5 = tpu.matmul %3, %4, %cst {dimension_numbers = #tpu.dot_dimension_numbers<[1], [0], [0], [1], [0, 0, 1, 1], [], []>} : vector<16x256xbf16>, vector<256x512xbf16>, vector<16x512xf32> -> vector<16x512xf32>
    %c0_4 = arith.constant 0 : index
    %c0_5 = arith.constant 0 : index
    %6 = vector.load %arg6[%c0_4, %c0_5] : memref<1x512xf32, #tpu.memory_space<vmem>>, vector<1x512xf32>
    %7 = vector.broadcast %6 : vector<1x512xf32> to vector<16x512xf32>
    %8 = arith.addf %5, %7 : vector<16x512xf32>
    %cst_6 = arith.constant 5.000000e-01 : f32
    %9 = vector.broadcast %cst_6 : f32 to vector<16x512xf32>
    %10 = arith.mulf %9, %8 : vector<16x512xf32>
    %cst_7 = arith.constant 4.471500e-02 : f32
    %11 = vector.broadcast %cst_7 : f32 to vector<16x512xf32>
    %12 = arith.mulf %11, %8 : vector<16x512xf32>
    %13 = arith.mulf %12, %8 : vector<16x512xf32>
    %14 = arith.mulf %13, %8 : vector<16x512xf32>
    %15 = arith.addf %8, %14 : vector<16x512xf32>
    %cst_8 = arith.constant 0.797884583 : f32
    %16 = vector.broadcast %cst_8 : f32 to vector<16x512xf32>
    %17 = arith.mulf %16, %15 : vector<16x512xf32>
    %18 = math.tanh %17 : vector<16x512xf32>
    %cst_9 = arith.constant 1.000000e+00 : f32
    %19 = vector.broadcast %cst_9 : f32 to vector<16x512xf32>
    %20 = arith.addf %19, %18 : vector<16x512xf32>
    %21 = arith.mulf %10, %20 : vector<16x512xf32>
    %c0_10 = arith.constant 0 : index
    %c0_11 = arith.constant 0 : index
    %22 = vector.load %arg11[%c0_10, %c0_11] : memref<16x256xf32, #tpu.memory_space<vmem>>, vector<16x256xf32>
    %23 = arith.truncf %21 : vector<16x512xf32> to vector<16x512xbf16>
    %c0_12 = arith.constant 0 : index
    %c0_13 = arith.constant 0 : index
    %24 = vector.load %arg7[%c0_12, %c0_13] : memref<512x256xbf16, #tpu.memory_space<vmem>>, vector<512x256xbf16>
    %cst_14 = arith.constant dense<0.000000e+00> : vector<16x256xf32>
    %25 = tpu.matmul %23, %24, %cst_14 {dimension_numbers = #tpu.dot_dimension_numbers<[1], [0], [0], [1], [0, 0, 1, 1], [], []>} : vector<16x512xbf16>, vector<512x256xbf16>, vector<16x256xf32> -> vector<16x256xf32>
    %26 = arith.addf %22, %25 : vector<16x256xf32>
    %c0_15 = arith.constant 0 : index
    %c0_16 = arith.constant 0 : index
    %27 = vector.load %arg11[%c0_15, %c0_16] : memref<16x256xf32, #tpu.memory_space<vmem>>, vector<16x256xf32>
    tpu.vector_store %arg11[%c0_15, %c0_16], %26 {strides = array<i32>} : memref<16x256xf32, #tpu.memory_space<vmem>>, vector<16x256xf32>,
    %c0_i32_17 = arith.constant 0 : i32
    %28 = arith.cmpi eq, %arg1, %c0_i32_17 : i32
    %29 = arith.extui %28 : i1 to i32
    %c0_i32_18 = arith.constant 0 : i32
    %30 = arith.cmpi ne, %29, %c0_i32_18 : i32
    scf.if %30 {
      %c0_19 = arith.constant 0 : index
      %c0_20 = arith.constant 0 : index
      %31 = vector.load %arg2[%c0_19, %c0_20] : memref<16x256xf32, #tpu.memory_space<vmem>>, vector<16x256xf32>
      %c0_21 = arith.constant 0 : index
      %c0_22 = arith.constant 0 : index
      %32 = vector.load %arg11[%c0_21, %c0_22] : memref<16x256xf32, #tpu.memory_space<vmem>>, vector<16x256xf32>
      %33 = arith.addf %31, %32 : vector<16x256xf32>
      %c0_23 = arith.constant 0 : index
      %c0_24 = arith.constant 0 : index
      %34 = vector.load %arg8[%c0_23, %c0_24] : memref<1x256xf32, #tpu.memory_space<vmem>>, vector<1x256xf32>
      %35 = vector.broadcast %34 : vector<1x256xf32> to vector<16x256xf32>
      %36 = arith.addf %33, %35 : vector<16x256xf32>
      %c0_25 = arith.constant 0 : index
      %c0_26 = arith.constant 0 : index
      %37 = vector.load %arg9[%c0_25, %c0_26] : memref<16x256xf32, #tpu.memory_space<vmem>>, vector<16x256xf32>
      tpu.vector_store %arg9[%c0_25, %c0_26], %36 {strides = array<i32>} : memref<16x256xf32, #tpu.memory_space<vmem>>, vector<16x256xf32>,
    } else {
    }
    return
  }
  func.func @transform_0(%arg0: i32, %arg1: i32) -> (i32, i32) {
    %c0_i32 = arith.constant 0 : i32
    %c0_i32_0 = arith.constant 0 : i32
    return %arg0, %c0_i32 : i32, i32
  }
  func.func @transform_1(%arg0: i32, %arg1: i32) -> (i32, i32) {
    %c0_i32 = arith.constant 0 : i32
    %c0_i32_0 = arith.constant 0 : i32
    %c0_i32_1 = arith.constant 0 : i32
    return %c0_i32, %c0_i32_0 : i32, i32
  }
  func.func @transform_2(%arg0: i32, %arg1: i32) -> (i32, i32) {
    %c0_i32 = arith.constant 0 : i32
    %c0_i32_0 = arith.constant 0 : i32
    %c0_i32_1 = arith.constant 0 : i32
    return %c0_i32, %c0_i32_0 : i32, i32
  }
  func.func @transform_3(%arg0: i32, %arg1: i32) -> (i32, i32) {
    %c0_i32 = arith.constant 0 : i32
    %c0_i32_0 = arith.constant 0 : i32
    return %c0_i32, %arg1 : i32, i32
  }
  func.func @transform_4(%arg0: i32, %arg1: i32) -> (i32, i32) {
    %c0_i32 = arith.constant 0 : i32
    %c0_i32_0 = arith.constant 0 : i32
    return %c0_i32, %arg1 : i32, i32
  }
  func.func @transform_5(%arg0: i32, %arg1: i32) -> (i32, i32) {
    %c0_i32 = arith.constant 0 : i32
    %c0_i32_0 = arith.constant 0 : i32
    return %arg1, %c0_i32 : i32, i32
  }
  func.func @transform_6(%arg0: i32, %arg1: i32) -> (i32, i32) {
    %c0_i32 = arith.constant 0 : i32
    %c0_i32_0 = arith.constant 0 : i32
    %c0_i32_1 = arith.constant 0 : i32
    return %c0_i32, %c0_i32_0 : i32, i32
  }
  func.func @transform_7(%arg0: i32, %arg1: i32) -> (i32, i32) {
    %c0_i32 = arith.constant 0 : i32
    %c0_i32_0 = arith.constant 0 : i32
    return %arg0, %c0_i32 : i32, i32
  }
}

module attributes {stable_mosaic.version = 11 : i64} {
  func.func @_ln_pool_kernel(%arg0: i32, %arg1: memref<1x8x256xf32, #tpu.memory_space<vmem>>, %arg2: memref<1x256xf32, #tpu.memory_space<vmem>>, %arg3: memref<1x256xf32, #tpu.memory_space<vmem>>, %arg4: memref<1x1x8xf32, #tpu.memory_space<vmem>>, %arg5: memref<1x1x256xf32, #tpu.memory_space<vmem>>) attributes {dimension_semantics = [#tpu.dimension_semantics<parallel>], iteration_bounds = array<i64: 2>, scalar_prefetch = 0 : i64, scratch_operands = 0 : i64, tpu.core_type = #tpu.core_type<tc>, window_params = [{transform_indices = @transform_0, window_bounds = array<i64: 1, 8, 256>}, {pipeline_mode = #tpu.pipeline_mode<synchronous>, transform_indices = @transform_1, window_bounds = array<i64: 1, 256>}, {pipeline_mode = #tpu.pipeline_mode<synchronous>, transform_indices = @transform_2, window_bounds = array<i64: 1, 256>}, {transform_indices = @transform_3, window_bounds = array<i64: 1, 1, 8>}, {transform_indices = @transform_4, window_bounds = array<i64: 1, 1, 256>}]} {
    %c0 = arith.constant 0 : index
    %c0_0 = arith.constant 0 : index
    %c0_1 = arith.constant 0 : index
    %0 = vector.load %arg1[%c0, %c0_0, %c0_1] : memref<1x8x256xf32, #tpu.memory_space<vmem>>, vector<1x8x256xf32>
    %1 = vector.shape_cast %0 : vector<1x8x256xf32> to vector<8x256xf32>
    %c0_2 = arith.constant 0 : index
    %c0_3 = arith.constant 0 : index
    %2 = vector.load %arg2[%c0_2, %c0_3] : memref<1x256xf32, #tpu.memory_space<vmem>>, vector<1x256xf32>
    %c0_4 = arith.constant 0 : index
    %c0_5 = arith.constant 0 : index
    %3 = vector.load %arg3[%c0_4, %c0_5] : memref<1x256xf32, #tpu.memory_space<vmem>>, vector<1x256xf32>
    %cst = arith.constant dense<0.000000e+00> : vector<8xf32>
    %4 = vector.multi_reduction <add>, %1, %cst [1] : vector<8x256xf32> to vector<8xf32>
    %5 = vector.shape_cast %4 : vector<8xf32> to vector<8x1xf32>
    %cst_6 = arith.constant 2.560000e+02 : f32
    %6 = vector.broadcast %cst_6 : f32 to vector<8x1xf32>
    %7 = arith.divf %5, %6 : vector<8x1xf32>
    %8 = vector.broadcast %7 : vector<8x1xf32> to vector<8x256xf32>
    %9 = arith.subf %1, %8 : vector<8x256xf32>
    %10 = arith.mulf %9, %9 : vector<8x256xf32>
    %cst_7 = arith.constant dense<0.000000e+00> : vector<8xf32>
    %11 = vector.multi_reduction <add>, %10, %cst_7 [1] : vector<8x256xf32> to vector<8xf32>
    %12 = vector.shape_cast %11 : vector<8xf32> to vector<8x1xf32>
    %cst_8 = arith.constant 2.560000e+02 : f32
    %13 = vector.broadcast %cst_8 : f32 to vector<8x1xf32>
    %14 = arith.divf %12, %13 : vector<8x1xf32>
    %15 = vector.broadcast %7 : vector<8x1xf32> to vector<8x256xf32>
    %16 = arith.subf %1, %15 : vector<8x256xf32>
    %cst_9 = arith.constant 9.99999974E-6 : f32
    %17 = vector.broadcast %cst_9 : f32 to vector<8x1xf32>
    %18 = arith.addf %14, %17 : vector<8x1xf32>
    %19 = math.rsqrt %18 : vector<8x1xf32>
    %20 = vector.broadcast %19 : vector<8x1xf32> to vector<8x256xf32>
    %21 = arith.mulf %16, %20 : vector<8x256xf32>
    %22 = vector.broadcast %2 : vector<1x256xf32> to vector<8x256xf32>
    %23 = arith.mulf %21, %22 : vector<8x256xf32>
    %24 = vector.broadcast %3 : vector<1x256xf32> to vector<8x256xf32>
    %25 = arith.addf %23, %24 : vector<8x256xf32>
    %c0_10 = arith.constant 0 : index
    %c0_11 = arith.constant 0 : index
    %c0_12 = arith.constant 0 : index
    %26 = vector.load %arg4[%c0_10, %c0_11, %c0_12] : memref<1x1x8xf32, #tpu.memory_space<vmem>>, vector<1x1x8xf32>
    %27 = vector.shape_cast %26 : vector<1x1x8xf32> to vector<1x8xf32>
    %cst_13 = arith.constant dense<0.000000e+00> : vector<1x256xf32>
    %28 = tpu.matmul %27, %25, %cst_13 {dimension_numbers = #tpu.dot_dimension_numbers<[1], [0], [0], [1], [0, 0, 1, 1], [], []>} : vector<1x8xf32>, vector<8x256xf32>, vector<1x256xf32> -> vector<1x256xf32>
    %cst_14 = arith.constant dense<0.000000e+00> : vector<1xf32>
    %29 = vector.multi_reduction <add>, %27, %cst_14 [1] : vector<1x8xf32> to vector<1xf32>
    %30 = vector.shape_cast %29 : vector<1xf32> to vector<1x1xf32>
    %cst_15 = arith.constant 1.000000e+00 : f32
    %31 = vector.broadcast %cst_15 : f32 to vector<1x1xf32>
    %32 = arith.maximumf %30, %31 : vector<1x1xf32>
    %33 = vector.broadcast %32 : vector<1x1xf32> to vector<1x256xf32>
    %34 = arith.divf %28, %33 : vector<1x256xf32>
    %c0_16 = arith.constant 0 : index
    %c0_17 = arith.constant 0 : index
    %c0_18 = arith.constant 0 : index
    %35 = vector.load %arg5[%c0_16, %c0_17, %c0_18] : memref<1x1x256xf32, #tpu.memory_space<vmem>>, vector<1x1x256xf32>
    %36 = vector.shape_cast %35 : vector<1x1x256xf32> to vector<1x256xf32>
    %37 = vector.shape_cast %34 : vector<1x256xf32> to vector<1x1x256xf32>
    tpu.vector_store %arg5[%c0_16, %c0_17, %c0_18], %37 {strides = array<i32>} : memref<1x1x256xf32, #tpu.memory_space<vmem>>, vector<1x1x256xf32>,
    return
  }
  func.func @transform_0(%arg0: i32) -> (i32, i32, i32) {
    %c0_i32 = arith.constant 0 : i32
    %c0_i32_0 = arith.constant 0 : i32
    %c0_i32_1 = arith.constant 0 : i32
    return %arg0, %c0_i32, %c0_i32_0 : i32, i32, i32
  }
  func.func @transform_1(%arg0: i32) -> (i32, i32) {
    %c0_i32 = arith.constant 0 : i32
    %c0_i32_0 = arith.constant 0 : i32
    %c0_i32_1 = arith.constant 0 : i32
    return %c0_i32, %c0_i32_0 : i32, i32
  }
  func.func @transform_2(%arg0: i32) -> (i32, i32) {
    %c0_i32 = arith.constant 0 : i32
    %c0_i32_0 = arith.constant 0 : i32
    %c0_i32_1 = arith.constant 0 : i32
    return %c0_i32, %c0_i32_0 : i32, i32
  }
  func.func @transform_3(%arg0: i32) -> (i32, i32, i32) {
    %c0_i32 = arith.constant 0 : i32
    %c0_i32_0 = arith.constant 0 : i32
    %c0_i32_1 = arith.constant 0 : i32
    return %arg0, %c0_i32, %c0_i32_0 : i32, i32, i32
  }
  func.func @transform_4(%arg0: i32) -> (i32, i32, i32) {
    %c0_i32 = arith.constant 0 : i32
    %c0_i32_0 = arith.constant 0 : i32
    %c0_i32_1 = arith.constant 0 : i32
    return %arg0, %c0_i32, %c0_i32_0 : i32, i32, i32
  }
}

</mosaic_0001>

<bundles_post_ra>
// kernel: whisper_backbone_forward.11
= control target key start
LH: loop header
LB: loop body
LE: loop exit
PB: predicated region body
PF: predicated region fallthrough
CT: control target
= control target key end

     0   :  { %s882_s18 = smov 0   ;;  %s884_s19 = smov 0   ;;  %s943_s0 = inlined_call_operand.vmem [shape: bf16[2,16,8], index: 0, kind: input, shape index: {}]   ;;  %s944_s1 = inlined_call_operand.vmem [shape: bf16[2,16,8], index: 1, kind: input, shape index: {}]   ;;  %s945_s2 = inlined_call_operand.vmem [shape: bf16[2,16,8], index: 2, kind: input, shape index: {}]   ;;  %s946_s3 = inlined_call_operand.vmem [shape: bf16[3,8,256], index: 3, kind: input, shape index: {}]   ;;  %s947_s4 = inlined_call_operand.vmem [shape: f32[1,256], index: 4, kind: input, shape index: {}]   ;;  %s948_s5 = inlined_call_operand.vmem [shape: bf16[2,16,256], index: 5, kind: output, shape index: {}]  }
   0x1   :  { %s886_s20 = smov 0  }
   0x2 LB: > { %s27_s21 = sadd.s32 1, %s845_s19  ;;  %p741_p0 = scmp.ge.s32.totalorder %s849_s20, 1  ;;  %s849_s20 = sphi %s886_s20, %s15_s20   ;;  %s845_s19 = sphi %s884_s19, %s950_s19   ;;  %s841_s18 = sphi %s882_s18, %s949_s18  }
   0x3   : > { %p29_p1 = scmp.ge.s32.totalorder %s27_s21, 2  ;;  %p242_p2 = scmp.lt.s32.totalorder %s849_s20, 3 }
   0x5   : > { %s952_s21 = smov (%p29_p1, %s27_s21), 0  ;;  %p243_p3 = pnand %p741_p0, %p242_p2 }
   0x6   : > { %v341_v0 = vld [vmem:[%s946_s3] sm:$0xff] (!%p243_p3)  ;;  %vm360_vm0 = vcmask (!%p243_p3), 1043456   ;;  %v761_v1 = vld [vmem:[%s946_s3 + $0x10] sm:$0xff] (!%p243_p3)  ;;  %p298_p4 = scmp.lt.s32.totalorder (!%p243_p3), %s841_s18, 1  ;;  %v851_v4 = vmov (!%p243_p3), 0   ;;  %v750_v6 = vld [vmem:[%s946_s3 + $0x8] sm:$0xff] (!%p243_p3)  ;;  %v544_v16 = vlaneseq (!%p243_p3) }
   0x7   : > { %246 = sbr.rel (%p243_p3) target bundleno = 277 (0x115), region = 40  ;;  %v758_v2 = vcombine.high (!%p243_p3), %v341_v0, %v341_v0  ;;  %v757_v3 = vcombine.low (!%p243_p3), %v341_v0, %v341_v0  ;;  %461 = vmatprep.mubr.bf16.mxu0 (!%p243_p3), %v851_v4  ;;  %v764_v5 = vcombine.high (!%p243_p3), %v761_v1, %v761_v1  ;;  %v763_v7 = vcombine.low (!%p243_p3), %v761_v1, %v761_v1  ;;  %v542_v23 = vld [vmem:[%s947_s4] sm:$0x3] (!%p243_p3) }
   0x8   : > { %v753_v8 = vcombine.high (!%p243_p3), %v750_v6, %v750_v6  ;;  %v752_v9 = vcombine.low (!%p243_p3), %v750_v6, %v750_v6  ;;  %399 = vmatprep.mubr.bf16.mxu1 (!%p243_p3), %v851_v4  ;;  %vm356_vm1 = vcmask (!%p243_p3), 64512   ;;  %v545_v20 = vshrl.u32 (!%p243_p3), %v544_v16, 7 }
   0x9   : > { %759 = vmatprep.subr.msk.bf16.mxu0 (!%p243_p3), %vm360_vm0, %v758_v2  ;;  %v424_v10 = vsel (!%p243_p3), %vm360_vm0, %v757_v3, 0  ;;  %v490_v13 = vsel (!%p243_p3), %vm360_vm0, %v763_v7, 0 }
   0xa   : > { %430 = vmatpush1.bf16.msra.mxu0 (!%p243_p3), %v424_v10  ;;  %754 = vmatprep.subr.msk.bf16.mxu1 (!%p243_p3), %vm360_vm0, %v753_v8  ;;  %v362_v11 = vsel (!%p243_p3), %vm360_vm0, %v752_v9, 0  ;;  %v546_v22 = vsub.s32 (!%p243_p3), 0, %v545_v20  ;;  %v550_v24 = vsub.s32 (!%p243_p3), 1, %v545_v20 }
   0xb   : > { %765 = vmatprep.subr.msk.bf16.mxu0 (!%p243_p3), %vm360_vm0, %v764_v5  ;;  %368 = vmatpush1.bf16.msra.mxu1 (!%p243_p3), %v362_v11 }
   0xc   : > { %v547_v25 = vrot.slane (!%p243_p3), %v542_v23, %v546_v22  ;;  %v551_v27 = vrot.slane (!%p243_p3), %v542_v23, %v550_v24 }
   0xe   : > { %s954_s18 = smov (!%p298_p4, %s841_s18), 1 }
   0xf   : > { %s771_s28 = sshll.u32 %s954_s18, 3  ;;  %s774_s15 = sshll.u32 %s954_s18, 4 }
  0x10   : > { %s305_s6 = scalar_lea.vmem %s943_s0, %s771_s28  ;;  %s315_s9 = scalar_lea.vmem %s944_s1, %s771_s28 }
  0x11   : > { %v813_v12 = vld [vmem:[%s305_s6] sm:$0xff]   ;;  %s325_s12 = scalar_lea.vmem %s945_s2, %s771_s28  ;;  %s336_s22 = scalar_lea.vmem %s948_s5, %s774_s15 }
  0x12   : > { %v817_v14 = vld [vmem:[%s315_s9] sm:$0xff]   ;;  %760 = vmatmul.mubr.msk.bf16.vlgmr.msra.gmra.mrb[0].mxu0 %vm356_vm1, %v813_v12 }
  0x13   : > { %496 = vmatpush1.bf16.msra.mxu0 %v490_v13  ;;  %755 = vmatmul.mubr.msk.bf16.vlgmr.msra.gmra.mrb[0].mxu1 %vm356_vm1, %v817_v14  ;;  %v818_v15 = vld [vmem:[%s325_s12] sm:$0xff]  }
  0x14   : > { %527 = vmatprep.mubr.bf16.mxu0 %v851_v4 }
  0x1e   : > { %766 = vmatmul.mubr.msk.bf16.vlgmr.msra.gmra.mrb[0].mxu0 %vm356_vm1, %v818_v15 }
  0xe6   : > { %v401_v17 = vpop.f32.mrb[0].mxu1 }
  0xe7   : > { %v403_v18 = vpop.f32.mrb[1].mxu1 }
  0xe8   : > { %v405_v19 = vpop.f32.mrb[2].mxu1 }
  0xe9   : > { %v407_v21 = vpop.f32.mrb[3].mxu1 }
  0xf1   : > { %v529_v26 = vpop.f32.mrb[0].mxu0 }
  0xf2   : > { %v777_v28 = vadd.f32 %v529_v26, %v401_v17  ;;  %v531_v29 = vpop.f32.mrb[1].mxu0 }
  0xf3   : > { %v778_v30 = vadd.f32 %v531_v29, %v403_v18  ;;  %v533_v31 = vpop.f32.mrb[2].mxu0 }
  0xf4   : > { %v554_v32 = vadd.f32 %v777_v28, %v547_v25  ;;  %v779_v33 = vadd.f32 %v533_v31, %v405_v19  ;;  %v535_v34 = vpop.f32.mrb[3].mxu0 }
  0xf5   : > { %v555_v35 = vadd.f32 %v778_v30, %v551_v27  ;;  %v780_v36 = vadd.f32 %v535_v34, %v407_v21 }
  0xf6   : > { %v562_v37 = vmul.f32 0.044715, %v554_v32  ;;  %v556_v38 = vadd.f32 %v779_v33, %v547_v25  ;;  %v558_v61 = vmul.f32 0.5, %v554_v32 }
  0xf7   : > { %v563_v39 = vmul.f32 0.044715, %v555_v35  ;;  %v557_v40 = vadd.f32 %v780_v36, %v551_v27  ;;  %v559_v0 = vmul.f32 0.5, %v555_v35 }
  0xf8   : > { %v566_v41 = vmul.f32 %v562_v37, %v554_v32  ;;  %v564_v42 = vmul.f32 0.044715, %v556_v38  ;;  %v560_v4 = vmul.f32 0.5, %v556_v38 }
  0xf9   : > { %v567_v43 = vmul.f32 %v563_v39, %v555_v35  ;;  %v565_v44 = vmul.f32 0.044715, %v557_v40  ;;  %v561_v7 = vmul.f32 0.5, %v557_v40 }
  0xfa   : > { %v570_v45 = vmul.f32 %v566_v41, %v554_v32  ;;  %v568_v46 = vmul.f32 %v564_v42, %v556_v38 }
  0xfb   : > { %v571_v47 = vmul.f32 %v567_v43, %v555_v35  ;;  %v569_v48 = vmul.f32 %v565_v44, %v557_v40 }
  0xfc   : > { %v574_v49 = vadd.f32 %v570_v45, %v554_v32  ;;  %v572_v50 = vmul.f32 %v568_v46, %v556_v38 }
  0xfd   : > { %v575_v51 = vadd.f32 %v571_v47, %v555_v35  ;;  %v573_v52 = vmul.f32 %v569_v48, %v557_v40 }
  0xfe   : > { %v578_v53 = vmul.f32 0.7978846, %v574_v49  ;;  %v576_v54 = vadd.f32 %v572_v50, %v556_v38 }
  0xff   : > { %v579_v55 = vmul.f32 0.7978846, %v575_v51  ;;  %v577_v56 = vadd.f32 %v573_v52, %v557_v40 }
 0x100   : > { %819 = vtanh.f32 %v578_v53  ;;  %v580_v57 = vmul.f32 0.7978846, %v576_v54 }
 0x101   : > { %821 = vtanh.f32 %v579_v55  ;;  %v581_v58 = vmul.f32 0.7978846, %v577_v56 }
 0x102   : > { %823 = vtanh.f32 %v580_v57 }
 0x103   : > { %825 = vtanh.f32 %v581_v58 }
 0x10a   : > { %v820_v59 = vpop.eup %819 }
 0x10b   : > { %v822_v60 = vpop.eup %821  ;;  %v586_v62 = vadd.f32 1.0, %v820_v59 }
 0x10c   : > { %v824_v63 = vpop.eup %823  ;;  %v587_v1 = vadd.f32 1.0, %v822_v60 }
 0x10d   : > { %v826_v2 = vpop.eup %825  ;;  %v590_v3 = vmul.f32 %v586_v62, %v558_v61  ;;  %v588_v5 = vadd.f32 1.0, %v824_v63 }
 0x10e   : > { %v591_v6 = vmul.f32 %v587_v1, %v559_v0  ;;  %v589_v8 = vadd.f32 1.0, %v826_v2 }
 0x10f   : > { %v592_v9 = vmul.f32 %v588_v5, %v560_v4 }
 0x110   : > { %v775_v10 = vpack.c.bf16 %v591_v6, %v590_v3  ;;  %v593_v11 = vmul.f32 %v589_v8, %v561_v7 }
 0x112   : > { %606 = vst [vmem:[%s336_s22] sm:$0xff] %v775_v10  ;;  %v776_v12 = vpack.c.bf16 %v593_v11, %v592_v9 }
 0x114   : > { %607 = vst [vmem:[%s336_s22 + $0x8] sm:$0xff] %v776_v12 }
 0x115 PF: > { %s15_s20 = sadd.s32 1, %s849_s20   ;;  %s949_s18 = smov %s845_s19 }
 0x116   : > { %p12_p5 = scmp.ge.s32.totalorder %s15_s20, 4   ;;  %s950_s19 = smov %s952_s21 }
 0x118   :  { %14 = sbr.rel (!%p12_p5) target bundleno = 2 (0x2), region = 78 }

// kernel: whisper_backbone_forward.12
= control target key start
LH: loop header
LB: loop body
LE: loop exit
PB: predicated region body
PF: predicated region fallthrough
CT: control target
= control target key end

     0   :  { %s1714_s21 = smov 0   ;;  %s1716_s22 = smov 0   ;;  %s2069_s0 = inlined_call_operand.vmem [shape: bf16[2,8,256], index: 0, kind: input, shape index: {}]   ;;  %s2070_s1 = inlined_call_operand.vmem [shape: bf16[2,8,256], index: 1, kind: input, shape index: {}]   ;;  %s2071_s2 = inlined_call_operand.vmem [shape: bf16[2,8,256], index: 2, kind: input, shape index: {}]   ;;  %s2072_s3 = inlined_call_operand.vmem [shape: bf16[3,256,256], index: 3, kind: input, shape index: {}]   ;;  %s2073_s4 = inlined_call_operand.vmem [shape: f32[1,256], index: 4, kind: input, shape index: {}]   ;;  %s2074_s5 = inlined_call_operand.vmem [shape: f32[8,256], index: 5, kind: input, shape index: {}]   ;;  %s2075_s6 = inlined_call_operand.vmem [shape: f32[2,8,256], index: 6, kind: output, shape index: {}]  }
   0x1   :  { %s1718_s23 = smov 0  }
   0x2 LB: > { %s28_s24 = sadd.s32 1, %s1673_s22  ;;  %p1296_p0 = scmp.ge.s32.totalorder %s1677_s23, 1  ;;  %s1677_s23 = sphi %s1718_s23, %s16_s23   ;;  %s1673_s22 = sphi %s1716_s22, %s2077_s22   ;;  %s1669_s21 = sphi %s1714_s21, %s2076_s21  }
   0x3   : > { %p30_p1 = scmp.ge.s32.totalorder %s28_s24, 2  ;;  %p274_p2 = scmp.lt.s32.totalorder %s1677_s23, 3 }
   0x5   : > { %s2079_s24 = smov (%p30_p1, %s28_s24), 0  ;;  %p275_p3 = pnand %p1296_p0, %p274_p2 }
   0x6   : > { %v1501_v0 = vld [vmem:[%s2072_s3 + $0x104] ss:$8 sps:$4 sm:$0xff] (!%p275_p3)   ;;  %v1505_v2 = vld [vmem:[%s2072_s3 + $0x100] ss:$8 sps:$4 sm:$0xff] (!%p275_p3)   ;;  %v1507_v4 = vld [vmem:[%s2072_s3 + $0x114] ss:$8 sps:$4 sm:$0xff] (!%p275_p3)  }
   0x7   : > { %278 = sbr.rel (%p275_p3) target bundleno = 380 (0x17c), region = 44  ;;  %v1503_v1 = vld [vmem:[%s2072_s3 + $0x4] ss:$8 sps:$4 sm:$0xff] (!%p275_p3)   ;;  %610 = vmatprep.subr.bf16.mxu0 (!%p275_p3), %v1501_v0  ;;  %v1506_v3 = vld [vmem:[%s2072_s3] ss:$8 sps:$4 sm:$0xff] (!%p275_p3)   ;;  %p335_p4 = scmp.lt.s32.totalorder (!%p275_p3), %s1669_s21, 1 }
   0x8   : > { %818 = vmatprep.subr.bf16.mxu1 (!%p275_p3), %v1503_v1  ;;  %611 = vmatpush1.bf16.msra.mxu0 (!%p275_p3), %v1505_v2  ;;  %v1509_v5 = vld [vmem:[%s2072_s3 + $0x14] ss:$8 sps:$4 sm:$0xff] (!%p275_p3)   ;;  %v1511_v6 = vld [vmem:[%s2072_s3 + $0x110] ss:$8 sps:$4 sm:$0xff] (!%p275_p3)   ;;  %v1513_v8 = vld [vmem:[%s2072_s3 + $0x124] ss:$8 sps:$4 sm:$0xff] (!%p275_p3)  }
   0x9   : > { %819 = vmatpush1.bf16.msra.mxu1 (!%p275_p3), %v1506_v3  ;;  %612 = vmatprep.subr.bf16.mxu0 (!%p275_p3), %v1507_v4  ;;  %v1512_v7 = vld [vmem:[%s2072_s3 + $0x10] ss:$8 sps:$4 sm:$0xff] (!%p275_p3)   ;;  %v1515_v9 = vld [vmem:[%s2072_s3 + $0x24] ss:$8 sps:$4 sm:$0xff] (!%p275_p3)   ;;  %v1517_v10 = vld [vmem:[%s2072_s3 + $0x120] ss:$8 sps:$4 sm:$0xff] (!%p275_p3)  }
   0xa   : > { %820 = vmatprep.subr.bf16.mxu1 (!%p275_p3), %v1509_v5  ;;  %v1518_v11 = vld [vmem:[%s2072_s3 + $0x20] ss:$8 sps:$4 sm:$0xff] (!%p275_p3)   ;;  %v1519_v12 = vld [vmem:[%s2072_s3 + $0x134] ss:$8 sps:$4 sm:$0xff] (!%p275_p3)   ;;  %v1523_v14 = vld [vmem:[%s2072_s3 + $0x130] ss:$8 sps:$4 sm:$0xff] (!%p275_p3)  }
   0xb   : > { %v1521_v13 = vld [vmem:[%s2072_s3 + $0x34] ss:$8 sps:$4 sm:$0xff] (!%p275_p3)   ;;  %v1524_v15 = vld [vmem:[%s2072_s3 + $0x30] ss:$8 sps:$4 sm:$0xff] (!%p275_p3)   ;;  %v1525_v16 = vld [vmem:[%s2072_s3 + $0x144] ss:$8 sps:$4 sm:$0xff] (!%p275_p3)  }
   0xc   : > { %613 = vmatpush1.bf16.msra.mxu0 (!%p275_p3), %v1511_v6  ;;  %v1527_v17 = vld [vmem:[%s2072_s3 + $0x44] ss:$8 sps:$4 sm:$0xff] (!%p275_p3)   ;;  %v1529_v18 = vld [vmem:[%s2072_s3 + $0x140] ss:$8 sps:$4 sm:$0xff] (!%p275_p3)   ;;  %v1531_v20 = vld [vmem:[%s2072_s3 + $0x154] ss:$8 sps:$4 sm:$0xff] (!%p275_p3)  }
   0xd   : > { %821 = vmatpush1.bf16.msra.mxu1 (!%p275_p3), %v1512_v7  ;;  %614 = vmatprep.subr.bf16.mxu0 (!%p275_p3), %v1513_v8  ;;  %v1530_v19 = vld [vmem:[%s2072_s3 + $0x40] ss:$8 sps:$4 sm:$0xff] (!%p275_p3)   ;;  %v1533_v21 = vld [vmem:[%s2072_s3 + $0x54] ss:$8 sps:$4 sm:$0xff] (!%p275_p3)   ;;  %v1535_v22 = vld [vmem:[%s2072_s3 + $0x150] ss:$8 sps:$4 sm:$0xff] (!%p275_p3)  }
   0xe   : > { %822 = vmatprep.subr.bf16.mxu1 %v1515_v9  ;;  %v1536_v23 = vld [vmem:[%s2072_s3 + $0x50] ss:$8 sps:$4 sm:$0xff]   ;;  %v1537_v24 = vld [vmem:[%s2072_s3 + $0x164] ss:$8 sps:$4 sm:$0xff]   ;;  %v1541_v26 = vld [vmem:[%s2072_s3 + $0x160] ss:$8 sps:$4 sm:$0xff]  }
   0xf   : > { %v1539_v25 = vld [vmem:[%s2072_s3 + $0x64] ss:$8 sps:$4 sm:$0xff]   ;;  %v1542_v27 = vld [vmem:[%s2072_s3 + $0x60] ss:$8 sps:$4 sm:$0xff]   ;;  %v1543_v28 = vld [vmem:[%s2072_s3 + $0x174] ss:$8 sps:$4 sm:$0xff]  }
  0x10   : > { %615 = vmatpush1.bf16.msra.mxu0 %v1517_v10  ;;  %v1545_v29 = vld [vmem:[%s2072_s3 + $0x74] ss:$8 sps:$4 sm:$0xff]   ;;  %v1547_v30 = vld [vmem:[%s2072_s3 + $0x170] ss:$8 sps:$4 sm:$0xff]   ;;  %v1549_v32 = vld [vmem:[%s2072_s3 + $0x184] ss:$8 sps:$4 sm:$0xff]  }
  0x11   : > { %823 = vmatpush1.bf16.msra.mxu1 %v1518_v11  ;;  %616 = vmatprep.subr.bf16.mxu0 %v1519_v12  ;;  %v1548_v31 = vld [vmem:[%s2072_s3 + $0x70] ss:$8 sps:$4 sm:$0xff]   ;;  %v1551_v33 = vld [vmem:[%s2072_s3 + $0x84] ss:$8 sps:$4 sm:$0xff]   ;;  %v1553_v34 = vld [vmem:[%s2072_s3 + $0x180] ss:$8 sps:$4 sm:$0xff]  }
  0x12   : > { %824 = vmatprep.subr.bf16.mxu1 %v1521_v13  ;;  %v1554_v35 = vld [vmem:[%s2072_s3 + $0x80] ss:$8 sps:$4 sm:$0xff]   ;;  %v1555_v36 = vld [vmem:[%s2072_s3 + $0x194] ss:$8 sps:$4 sm:$0xff]   ;;  %s2081_s21 = smov (!%p335_p4, %s1669_s21), 1 }
  0x13   : > { %v1557_v37 = vld [vmem:[%s2072_s3 + $0x94] ss:$8 sps:$4 sm:$0xff]   ;;  %v1559_v38 = vld [vmem:[%s2072_s3 + $0x190] ss:$8 sps:$4 sm:$0xff]   ;;  %v1561_v40 = vld [vmem:[%s2072_s3 + $0x1a4] ss:$8 sps:$4 sm:$0xff]  }
  0x14   : > { %617 = vmatpush1.bf16.msra.mxu0 %v1523_v14  ;;  %v1560_v39 = vld [vmem:[%s2072_s3 + $0x90] ss:$8 sps:$4 sm:$0xff]   ;;  %s1862_s27 = sshll.u32 %s2081_s21, 3  ;;  %v1563_v41 = vld [vmem:[%s2072_s3 + $0xa4] ss:$8 sps:$4 sm:$0xff]  }
  0x15   : > { %825 = vmatpush1.bf16.msra.mxu1 %v1524_v15  ;;  %618 = vmatprep.subr.bf16.mxu0 %v1525_v16  ;;  %v1565_v42 = vld [vmem:[%s2072_s3 + $0x1a0] ss:$8 sps:$4 sm:$0xff]   ;;  %s352_s12 = scalar_lea.vmem %s2070_s1, %s1862_s27  ;;  %v1567_v44 = vld [vmem:[%s2072_s3 + $0x1b4] ss:$8 sps:$4 sm:$0xff]   ;;  %s343_s17 = scalar_lea.vmem %s2069_s0, %s1862_s27  ;;  %v1571_v49 = vld [vmem:[%s2072_s3 + $0x1b0] ss:$8 sps:$4 sm:$0xff]  }
  0x16   : > { %826 = vmatprep.subr.bf16.mxu1 %v1527_v17  ;;  %v1566_v43 = vld [vmem:[%s2072_s3 + $0xa0] ss:$8 sps:$4 sm:$0xff]   ;;  %v1569_v45 = vld [vmem:[%s2072_s3 + $0xb4] ss:$8 sps:$4 sm:$0xff]   ;;  %v1572_v50 = vld [vmem:[%s2072_s3 + $0xb0] ss:$8 sps:$4 sm:$0xff]   ;;  %s361_s26 = scalar_lea.vmem %s2071_s2, %s1862_s27 }
  0x17   : > { %v409_v46 = vld [vmem:[%s352_s12] sm:$0xff]  ;;  %v1579_v56 = vld [vmem:[%s2072_s3 + $0x1d4] ss:$8 sps:$4 sm:$0xff]   ;;  %v1583_v58 = vld [vmem:[%s2072_s3 + $0x1d0] ss:$8 sps:$4 sm:$0xff]   ;;  %s1476_s27 = sshll.u32 %s2081_s21, 4 }
  0x18   : > { %619 = vmatpush1.bf16.msra.mxu0 %v1529_v18  ;;  %v1338_v47 = vcombine.high %v409_v46, %v409_v46  ;;  %v376_v48 = vld [vmem:[%s343_s17] sm:$0xff]  ;;  %v1581_v57 = vld [vmem:[%s2072_s3 + $0xd4] ss:$8 sps:$4 sm:$0xff]   ;;  %v1584_v59 = vld [vmem:[%s2072_s3 + $0xd0] ss:$8 sps:$4 sm:$0xff]   ;;  %v1337_v5 = vcombine.low %v409_v46, %v409_v46  ;;  %s375_s14 = scalar_lea.vmem %s2075_s6, %s1476_s27 }
  0x19   : > { %827 = vmatpush1.bf16.msra.mxu1 %v1530_v19  ;;  %620 = vmatprep.subr.bf16.mxu0 %v1531_v20  ;;  %v1372_v51 = vcombine.high %v376_v48, %v376_v48  ;;  %v1573_v52 = vld [vmem:[%s2072_s3 + $0x1c4] ss:$8 sps:$4 sm:$0xff]   ;;  %v1577_v54 = vld [vmem:[%s2072_s3 + $0x1c0] ss:$8 sps:$4 sm:$0xff]   ;;  %v1591_v0 = vld [vmem:[%s2072_s3 + $0x1f4] ss:$8 sps:$4 sm:$0xff]   ;;  %v1371_v6 = vcombine.low %v376_v48, %v376_v48 }
  0x1a   : > { %828 = vmatprep.subr.bf16.mxu1 %v1533_v21  ;;  %v1575_v53 = vld [vmem:[%s2072_s3 + $0xc4] ss:$8 sps:$4 sm:$0xff]   ;;  %642 = vmatprep.mubr.bf16.mxu0 %v1338_v47  ;;  %v1578_v55 = vld [vmem:[%s2072_s3 + $0xc0] ss:$8 sps:$4 sm:$0xff]   ;;  %v1593_v1 = vld [vmem:[%s2072_s3 + $0xf4] ss:$8 sps:$4 sm:$0xff]  }
  0x1b   : > { %850 = vmatprep.mubr.bf16.mxu1 %v1372_v51  ;;  %v1585_v60 = vld [vmem:[%s2072_s3 + $0x1e4] ss:$8 sps:$4 sm:$0xff]   ;;  %v1589_v62 = vld [vmem:[%s2072_s3 + $0x1e0] ss:$8 sps:$4 sm:$0xff]   ;;  %v1595_v2 = vld [vmem:[%s2072_s3 + $0x1f0] ss:$8 sps:$4 sm:$0xff]   ;;  %v1105_v51 = vlaneseq }
  0x1c   : > { %621 = vmatpush1.bf16.msra.mxu0 %v1535_v22  ;;  %v1587_v61 = vld [vmem:[%s2072_s3 + $0xe4] ss:$8 sps:$4 sm:$0xff]   ;;  %v1590_v63 = vld [vmem:[%s2072_s3 + $0xe0] ss:$8 sps:$4 sm:$0xff]   ;;  %v1596_v3 = vld [vmem:[%s2072_s3 + $0xf0] ss:$8 sps:$4 sm:$0xff]  }
  0x1d   : > { %829 = vmatpush1.bf16.msra.mxu1 %v1536_v23  ;;  %622 = vmatprep.subr.bf16.mxu0 %v1537_v24  ;;  %v1603_v4 = vld [vmem:[%s2072_s3 + $0x204] ss:$8 sps:$4 sm:$0xff]   ;;  %v1601_v7 = vld [vmem:[%s2072_s3 + $0x200] ss:$8 sps:$4 sm:$0xff]   ;;  %v1606_v9 = vld [vmem:[%s2072_s3 + $0x214] ss:$8 sps:$4 sm:$0xff]  }
  0x1e   : > { %830 = vmatprep.subr.bf16.mxu1 %v1539_v25  ;;  %v1951_v8 = vld [vmem:[%s361_s26] sm:$0xff]  ;;  %v1604_v11 = vld [vmem:[%s2072_s3 + $0x210] ss:$8 sps:$4 sm:$0xff]   ;;  %v1612_v14 = vld [vmem:[%s2072_s3 + $0x234] ss:$8 sps:$4 sm:$0xff]  }
  0x1f   : > { %v1438_v10 = vcombine.high %v1951_v8, %v1951_v8  ;;  %v1609_v12 = vld [vmem:[%s2072_s3 + $0x224] ss:$8 sps:$4 sm:$0xff]   ;;  %v1607_v13 = vld [vmem:[%s2072_s3 + $0x220] ss:$8 sps:$4 sm:$0xff]   ;;  %v1610_v15 = vld [vmem:[%s2072_s3 + $0x230] ss:$8 sps:$4 sm:$0xff]  }
  0x20   : > { %623 = vmatpush1.bf16.msra.mxu0 %v1541_v26  ;;  %v1615_v16 = vld [vmem:[%s2072_s3 + $0x244] ss:$8 sps:$4 sm:$0xff]   ;;  %v1613_v17 = vld [vmem:[%s2072_s3 + $0x240] ss:$8 sps:$4 sm:$0xff]   ;;  %v1618_v18 = vld [vmem:[%s2072_s3 + $0x254] ss:$8 sps:$4 sm:$0xff]  }
  0x21   : > { %831 = vmatpush1.bf16.msra.mxu1 %v1542_v27  ;;  %624 = vmatprep.subr.bf16.mxu0 %v1543_v28  ;;  %v1616_v19 = vld [vmem:[%s2072_s3 + $0x250] ss:$8 sps:$4 sm:$0xff]   ;;  %v1621_v20 = vld [vmem:[%s2072_s3 + $0x264] ss:$8 sps:$4 sm:$0xff]   ;;  %v1619_v21 = vld [vmem:[%s2072_s3 + $0x260] ss:$8 sps:$4 sm:$0xff]  }
  0x22   : > { %832 = vmatprep.subr.bf16.mxu1 %v1545_v29  ;;  %v1624_v22 = vld [vmem:[%s2072_s3 + $0x274] ss:$8 sps:$4 sm:$0xff]   ;;  %v1622_v23 = vld [vmem:[%s2072_s3 + $0x270] ss:$8 sps:$4 sm:$0xff]   ;;  %v1627_v24 = vld [vmem:[%s2072_s3 + $0x284] ss:$8 sps:$4 sm:$0xff]  }
  0x23   : > { %v1625_v25 = vld [vmem:[%s2072_s3 + $0x280] ss:$8 sps:$4 sm:$0xff]   ;;  %v1630_v26 = vld [vmem:[%s2072_s3 + $0x294] ss:$8 sps:$4 sm:$0xff]   ;;  %v1628_v27 = vld [vmem:[%s2072_s3 + $0x290] ss:$8 sps:$4 sm:$0xff]  }
  0x24   : > { %625 = vmatpush1.bf16.msra.mxu0 %v1547_v30  ;;  %v1633_v28 = vld [vmem:[%s2072_s3 + $0x2a4] ss:$8 sps:$4 sm:$0xff]   ;;  %v1631_v29 = vld [vmem:[%s2072_s3 + $0x2a0] ss:$8 sps:$4 sm:$0xff]   ;;  %v1636_v30 = vld [vmem:[%s2072_s3 + $0x2b4] ss:$8 sps:$4 sm:$0xff]  }
  0x25   : > { %833 = vmatpush1.bf16.msra.mxu1 %v1548_v31  ;;  %626 = vmatprep.subr.bf16.mxu0 %v1549_v32  ;;  %v1634_v31 = vld [vmem:[%s2072_s3 + $0x2b0] ss:$8 sps:$4 sm:$0xff]   ;;  %v1639_v32 = vld [vmem:[%s2072_s3 + $0x2c4] ss:$8 sps:$4 sm:$0xff]  }
  0x26   : > { %834 = vmatprep.subr.bf16.mxu1 %v1551_v33  ;;  %v1637_v33 = vld [vmem:[%s2072_s3 + $0x2c0] ss:$8 sps:$4 sm:$0xff]  }
  0x28   : > { %627 = vmatpush1.bf16.msra.mxu0 %v1553_v34  ;;  %v1642_v34 = vld [vmem:[%s2072_s3 + $0x2d4] ss:$8 sps:$4 sm:$0xff]  }
  0x29   : > { %835 = vmatpush1.bf16.msra.mxu1 %v1554_v35  ;;  %628 = vmatprep.subr.bf16.mxu0 %v1555_v36  ;;  %v1640_v35 = vld [vmem:[%s2072_s3 + $0x2d0] ss:$8 sps:$4 sm:$0xff]   ;;  %v1645_v36 = vld [vmem:[%s2072_s3 + $0x2e4] ss:$8 sps:$4 sm:$0xff]  }
  0x2a   : > { %836 = vmatprep.subr.bf16.mxu1 %v1557_v37  ;;  %v1643_v37 = vld [vmem:[%s2072_s3 + $0x2e0] ss:$8 sps:$4 sm:$0xff]  }
  0x2c   : > { %629 = vmatpush1.bf16.msra.mxu0 %v1559_v38  ;;  %v1648_v38 = vld [vmem:[%s2072_s3 + $0x2f4] ss:$8 sps:$4 sm:$0xff]  }
  0x2d   : > { %837 = vmatpush1.bf16.msra.mxu1 %v1560_v39  ;;  %630 = vmatprep.subr.bf16.mxu0 %v1561_v40  ;;  %v1646_v39 = vld [vmem:[%s2072_s3 + $0x2f0] ss:$8 sps:$4 sm:$0xff]   ;;  %v1437_v40 = vcombine.low %v1951_v8, %v1951_v8 }
  0x2e   : > { %838 = vmatprep.subr.bf16.mxu1 %v1563_v41 }
  0x30   : > { %631 = vmatpush1.bf16.msra.mxu0 %v1565_v42 }
  0x31   : > { %839 = vmatpush1.bf16.msra.mxu1 %v1566_v43  ;;  %632 = vmatprep.subr.bf16.mxu0 %v1567_v44 }
  0x32   : > { %840 = vmatprep.subr.bf16.mxu1 %v1569_v45 }
  0x34   : > { %633 = vmatpush1.bf16.msra.mxu0 %v1571_v49 }
  0x35   : > { %841 = vmatpush1.bf16.msra.mxu1 %v1572_v50  ;;  %634 = vmatprep.subr.bf16.mxu0 %v1573_v52  ;;  %v1106_v52 = vshrl.u32 %v1105_v51, 7 }
  0x36   : > { %842 = vmatprep.subr.bf16.mxu1 %v1575_v53 }
  0x37   : > { %v1107_v53 = vsub.s32 0, %v1106_v52 }
  0x38   : > { %635 = vmatpush1.bf16.msra.mxu0 %v1577_v54  ;;  %v1103_v54 = vld [vmem:[%s2073_s4] sm:$0x3] }
  0x39   : > { %843 = vmatpush1.bf16.msra.mxu1 %v1578_v55  ;;  %636 = vmatprep.subr.bf16.mxu0 %v1579_v56  ;;  %v1111_v55 = vsub.s32 1, %v1106_v52  ;;  %v1108_v56 = vrot.slane %v1103_v54, %v1107_v53 }
  0x3a   : > { %844 = vmatprep.subr.bf16.mxu1 %v1581_v57 }
  0x3c   : > { %637 = vmatpush1.bf16.msra.mxu0 %v1583_v58  ;;  %v1112_v58 = vrot.slane %v1103_v54, %v1111_v55 }
  0x3d   : > { %845 = vmatpush1.bf16.msra.mxu1 %v1584_v59  ;;  %638 = vmatprep.subr.bf16.mxu0 %v1585_v60 }
  0x3e   : > { %846 = vmatprep.subr.bf16.mxu1 %v1587_v61 }
  0x40   : > { %639 = vmatpush1.bf16.msra.mxu0 %v1589_v62 }
  0x41   : > { %847 = vmatpush1.bf16.msra.mxu1 %v1590_v63  ;;  %640 = vmatprep.subr.bf16.mxu0 %v1591_v0 }
  0x42   : > { %848 = vmatprep.subr.bf16.mxu1 %v1593_v1 }
  0x44   : > { %641 = vmatpush1.bf16.msra.mxu0 %v1595_v2 }
  0x45   : > { %849 = vmatpush1.bf16.msra.mxu1 %v1596_v3  ;;  %1060 = vmatprep.subr.bf16.mxu0 %v1603_v4 }
  0x47   : > { %643 = vmatmul.mubr.bf16.vlgmr.msra.gmra.mrb[0].mxu0 %v1337_v5 }
  0x48   : > { %851 = vmatmul.mubr.bf16.vlgmr.msra.gmra.mrb[0].mxu1 %v1371_v6  ;;  %1061 = vmatpush1.bf16.msra.mxu0 %v1601_v7 }
  0x49   : > { %1092 = vmatprep.mubr.bf16.mxu0 %v1438_v10  ;;  %1062 = vmatprep.subr.bf16.mxu0 %v1606_v9 }
  0x4c   : > { %1063 = vmatpush1.bf16.msra.mxu0 %v1604_v11 }
  0x4d   : > { %1064 = vmatprep.subr.bf16.mxu0 %v1609_v12 }
  0x50   : > { %1065 = vmatpush1.bf16.msra.mxu0 %v1607_v13 }
  0x51   : > { %1066 = vmatprep.subr.bf16.mxu0 %v1612_v14 }
  0x54   : > { %1067 = vmatpush1.bf16.msra.mxu0 %v1610_v15 }
  0x55   : > { %1068 = vmatprep.subr.bf16.mxu0 %v1615_v16  ;;  %v1135_v16 = vld [vmem:[%s2074_s5] sm:$0xff] }
  0x58   : > { %1069 = vmatpush1.bf16.msra.mxu0 %v1613_v17 }
  0x59   : > { %1070 = vmatprep.subr.bf16.mxu0 %v1618_v18 }
  0x5c   : > { %1071 = vmatpush1.bf16.msra.mxu0 %v1616_v19 }
  0x5d   : > { %1072 = vmatprep.subr.bf16.mxu0 %v1621_v20  ;;  %v1136_v20 = vld [vmem:[%s2074_s5 + $0x8] sm:$0xff] }
  0x60   : > { %1073 = vmatpush1.bf16.msra.mxu0 %v1619_v21 }
  0x61   : > { %1074 = vmatprep.subr.bf16.mxu0 %v1624_v22 }
  0x64   : > { %1075 = vmatpush1.bf16.msra.mxu0 %v1622_v23 }
  0x65   : > { %1076 = vmatprep.subr.bf16.mxu0 %v1627_v24 }
  0x68   : > { %1077 = vmatpush1.bf16.msra.mxu0 %v1625_v25 }
  0x69   : > { %1078 = vmatprep.subr.bf16.mxu0 %v1630_v26 }
  0x6c   : > { %1079 = vmatpush1.bf16.msra.mxu0 %v1628_v27 }
  0x6d   : > { %1080 = vmatprep.subr.bf16.mxu0 %v1633_v28 }
  0x70   : > { %1081 = vmatpush1.bf16.msra.mxu0 %v1631_v29 }
  0x71   : > { %1082 = vmatprep.subr.bf16.mxu0 %v1636_v30 }
  0x74   : > { %1083 = vmatpush1.bf16.msra.mxu0 %v1634_v31 }
  0x75   : > { %1084 = vmatprep.subr.bf16.mxu0 %v1639_v32 }
  0x78   : > { %1085 = vmatpush1.bf16.msra.mxu0 %v1637_v33 }
  0x79   : > { %1086 = vmatprep.subr.bf16.mxu0 %v1642_v34 }
  0x7c   : > { %1087 = vmatpush1.bf16.msra.mxu0 %v1640_v35 }
  0x7d   : > { %1088 = vmatprep.subr.bf16.mxu0 %v1645_v36 }
  0x80   : > { %1089 = vmatpush1.bf16.msra.mxu0 %v1643_v37 }
  0x81   : > { %1090 = vmatprep.subr.bf16.mxu0 %v1648_v38 }
  0x84   : > { %1091 = vmatpush1.bf16.msra.mxu0 %v1646_v39 }
  0x87   : > { %1093 = vmatmul.mubr.bf16.vlgmr.msra.gmra.mrb[4].mxu0 %v1437_v40 }
 0x11a   : > { %v644_v41 = vpop.f32.mrb[0].mxu0 }
 0x11b   : > { %v852_v42 = vpop.f32.mrb[0].mxu1  ;;  %v646_v44 = vpop.f32.mrb[1].mxu0 }
 0x11c   : > { %v853_v43 = vadd.f32 %v852_v42, %v644_v41  ;;  %v854_v45 = vpop.f32.mrb[1].mxu1  ;;  %v648_v47 = vpop.f32.mrb[2].mxu0 }
 0x11d   : > { %v855_v46 = vadd.f32 %v854_v45, %v646_v44  ;;  %v856_v48 = vpop.f32.mrb[2].mxu1  ;;  %v649_v49 = vpop.f32.mrb[3].mxu0 }
 0x11e   : > { %v857_v50 = vpop.f32.mrb[3].mxu1 }
 0x15a   : > { %v1094_v57 = vpop.f32.mrb[4].mxu0 }
 0x15b   : > { %v1101_v59 = vadd.f32 %v1094_v57, %v853_v43  ;;  %v1096_v60 = vpop.f32.mrb[5].mxu0 }
 0x15c   : > { %v1102_v61 = vadd.f32 %v1096_v60, %v855_v46  ;;  %v1098_v62 = vpop.f32.mrb[6].mxu0 }
 0x15d   : > { %v1115_v63 = vadd.f32 %v1108_v56, %v1101_v59  ;;  %v1099_v0 = vpop.f32.mrb[7].mxu0 }
 0x15e   : > { %v1116_v1 = vadd.f32 %v1112_v58, %v1102_v61 }
 0x15f   : > { %v1119_v2 = vmul.f32 0.044715, %v1115_v63  ;;  %v1117_v14 = vmul.f32 0.5, %v1115_v63 }
 0x160   : > { %v1120_v3 = vmul.f32 0.044715, %v1116_v1  ;;  %v1118_v17 = vmul.f32 0.5, %v1116_v1 }
 0x161   : > { %v1121_v4 = vmul.f32 %v1119_v2, %v1115_v63 }
 0x162   : > { %v1122_v5 = vmul.f32 %v1120_v3, %v1116_v1 }
 0x163   : > { %v1123_v6 = vmul.f32 %v1121_v4, %v1115_v63 }
 0x164   : > { %v1124_v7 = vmul.f32 %v1122_v5, %v1116_v1 }
 0x165   : > { %v1125_v8 = vadd.f32 %v1123_v6, %v1115_v63 }
 0x166   : > { %v1126_v9 = vadd.f32 %v1124_v7, %v1116_v1 }
 0x167   : > { %v1127_v10 = vmul.f32 0.7978846, %v1125_v8 }
 0x168   : > { %v1128_v11 = vmul.f32 0.7978846, %v1126_v9 }
 0x169   : > { %1651 = vtanh.f32 %v1127_v10 }
 0x16a   : > { %1653 = vtanh.f32 %v1128_v11 }
 0x173   : > { %v1652_v12 = vpop.eup %1651 }
 0x174   : > { %v1654_v13 = vpop.eup %1653  ;;  %v1131_v15 = vadd.f32 1.0, %v1652_v12 }
 0x175   : > { %v1132_v18 = vadd.f32 1.0, %v1654_v13 }
 0x176   : > { %v1133_v19 = vmul.f32 %v1131_v15, %v1117_v14 }
 0x177   : > { %v1134_v21 = vmul.f32 %v1132_v18, %v1118_v17 }
 0x178   : > { %v1137_v22 = vadd.f32 %v1135_v16, %v1133_v19 }
 0x179   : > { %v1138_v23 = vadd.f32 %v1136_v20, %v1134_v21 }
 0x17a   : > { %1139 = vst [vmem:[%s375_s14] sm:$0xff] %v1137_v22 }
 0x17b   : > { %1140 = vst [vmem:[%s375_s14 + $0x8] sm:$0xff] %v1138_v23 }
 0x17c PF: > { %s16_s23 = sadd.s32 1, %s1677_s23   ;;  %s2076_s21 = smov %s1673_s22 }
 0x17d   : > { %p13_p5 = scmp.ge.s32.totalorder %s16_s23, 4   ;;  %s2077_s22 = smov %s2079_s24 }
 0x17f   :  { %15 = sbr.rel (!%p13_p5) target bundleno = 2 (0x2), region = 85 }

// kernel: whisper_backbone_forward.14
= control target key start
LH: loop header
LB: loop body
LE: loop exit
PB: predicated region body
PF: predicated region fallthrough
CT: control target
= control target key end

     0   :  { %s745_s12 = smov 0   ;;  %s747_s13 = smov 0   ;;  %s826_s0 = inlined_call_operand.vmem [shape: bf16[2,8,768], index: 0, kind: input, shape index: {}, may-alias: {0,1,2}]   ;;  %s827_s1 = inlined_call_operand.vmem [shape: bf16[2,8,768], index: 1, kind: input, shape index: {}, may-alias: {0,1,2}]   ;;  %s828_s2 = inlined_call_operand.vmem [shape: bf16[2,8,768], index: 2, kind: input, shape index: {}, may-alias: {0,1,2}]   ;;  %s829_s3 = inlined_call_operand.vmem [shape: bf16[2,8,256], index: 3, kind: output, shape index: {}]  }
   0x1   :  { %s749_s14 = smov 0   ;;  %s751_s15 = smov 0  }
   0x2   :  { %s753_s16 = smov 0  }
   0x3 LB: > { %s28_s17 = sadd.s32 1, %s711_s14  ;;  %s32_s18 = sadd.s32 1, %s715_s15  ;;  %s719_s16 = sphi %s753_s16, %s13_s16   ;;  %s715_s15 = sphi %s751_s15, %s833_s15   ;;  %s711_s14 = sphi %s749_s14, %s832_s14   ;;  %s707_s13 = sphi %s747_s13, %s831_s13   ;;  %s703_s12 = sphi %s745_s12, %s830_s12  }
   0x4   : > { %p30_p0 = scmp.ge.s32.totalorder %s28_s17, 2  ;;  %p603_p1 = scmp.ge.s32.totalorder %s719_s16, 1 }
   0x5   : > { %p213_p2 = scmp.lt.s32.totalorder %s719_s16, 5 }
   0x6   : > { %s835_s17 = smov (%p30_p0, %s28_s17), 0  ;;  %s837_s18 = smov (!%p30_p0, %s32_s18), %s715_s15 }
   0x7   : > { %p214_p3 = pnand %p603_p1, %p213_p2  ;;  %p34_p4 = scmp.ge.s32.totalorder %s837_s18, 2 }
   0x8   : > { %p269_p5 = scmp.lt.s32.totalorder (!%p214_p3), %s707_s13, 1  ;;  %s277_s19 = sadd.s32 (!%p214_p3), 2, %s703_s12  ;;  %v721_v0 = vmov (!%p214_p3), 0.0   ;;  %vm722_vm0 = vmmov (!%p214_p3), 0   ;;  %vm318_vm1 = vcmask (!%p214_p3), 7168   ;;  %v723_v3 = vmov (!%p214_p3), -inf  }
   0x9   : > { %s839_s18 = smov (%p34_p4, %s837_s18), 0  ;;  %217 = sbr.rel (%p214_p3) target bundleno = 827 (0x33b), region = 32 }
   0xa   : > { %616 = vmatprep.subr.bf16.mxu0 (!%p214_p3), %v721_v0  ;;  %p282_p6 = scmp.lt.s32.totalorder (!%p214_p3), %s277_s19, 5  ;;  %618 = vmatprep.mubr.msk.bf16.mxu0 (!%p214_p3), %vm722_vm0, %v721_v0  ;;  %p271_p7 = scmp.lt.s32.totalorder (!%p214_p3), %s703_s12, 5  ;;  %319 = vst.msk [vmem:[#allocation2] sm:$0xff] (!%p214_p3), %vm318_vm1, %v723_v3  ;;  %320 = vst.msk [vmem:[#allocation3] sm:$0xff] (!%p214_p3), %vm318_vm1, %v721_v0  ;;  %vm366_vm2 = vcmask (!%p214_p3), 64512   ;;  %v724_v9 = vmov (!%p214_p3), 0  }
   0xb   : > { %622 = vmatprep.subr.bf16.mxu1 (!%p214_p3), %v721_v0  ;;  %624 = vmatprep.mubr.msk.bf16.mxu1 (!%p214_p3), %vm722_vm0, %v721_v0  ;;  %s291_s5 = sadd.s32 (!%p214_p3), 4, %s703_s12  ;;  %vm401_vm3 = vcmask (!%p214_p3), 1043456   ;;  %p307_p9 = scmp.lt.s32.totalorder (!%p214_p3), %s703_s12, 1 }
   0xc   : > { %673 = vset.pattern.permute.xlu0 (!%p214_p3), %v724_v9  ;;  %674 = vset.pattern.permute.xlu1 (!%p214_p3), %v724_v9  ;;  %p296_p8 = scmp.lt.s32.totalorder (!%p214_p3), %s291_s5, 5 }
  0x10   : > { %s841_s13 = smov (!%p269_p5, %s707_s13), 1  ;;  %s843_s19 = smov (!%p282_p6, %s277_s19), 5 }
  0x11   : > { %s782_s20 = smul.u32 6, %s841_s13  ;;  %v365_v10 = vld [vmem:[#allocation2] sm:$0xff]  ;;  %s845_s5 = smov (!%p296_p8, %s291_s5), 5  ;;  %v382_v24 = vld [vmem:[#allocation3] sm:$0xff] }
  0x12   : > { %s272_s21 = scalar_select %p271_p7, %s703_s12, 5 }
  0x13   : > { %s287_s22 = sadd.s32 %s782_s20, %s843_s19  ;;  %s301_s6 = sadd.s32 %s782_s20, %s845_s5 }
  0x14   : > { %s605_s23 = sshll.u32 %s287_s22, 2  ;;  %s274_s24 = sadd.s32 %s782_s20, %s272_s21 }
  0x15   : > { %s289_s27 = scalar_lea.vmem %s827_s1, %s605_s23  ;;  %s604_s28 = sshll.u32 %s274_s24, 2 }
  0x16   : > { %v323_v1 = vld [vmem:[%s289_s27] sm:$0xf]  ;;  %s276_s4 = scalar_lea.vmem %s826_s0, %s604_s28  ;;  %s606_s7 = sshll.u32 %s301_s6, 2 }
  0x17   : > { %617 = vmatpush3.bf16.xpose.msra.mxu0 %v323_v1  ;;  %v322_v2 = vld [vmem:[%s276_s4] sm:$0xf]  ;;  %s303_s10 = scalar_lea.vmem %s828_s2, %s606_s7  ;;  %s847_s12 = smov (!%p307_p9, %s703_s12), 1 }
  0x18   : > { %v324_v14 = vld [vmem:[%s303_s10] sm:$0xf]  ;;  %s607_s11 = sshll.u32 %s841_s13, 1 }
  0x19   : > { %v403_v15 = vsel %vm401_vm3, %v324_v14, 0  ;;  %s310_s19 = sadd.s32 %s607_s11, %s847_s12 }
  0x1a   : > { %623 = vmatpush3.bf16.msra.mxu1 %v403_v15  ;;  %s608_s20 = sshll.u32 %s310_s19, 2 }
  0x1b   : > { %s312_s23 = scalar_lea.vmem %s829_s3, %s608_s20 }
  0x1e   : > { %619 = vmatmul.mubr.bf16.vlgmr.msra.gmra.mrb[0].mxu0 %v322_v2 }
  0xf1   : > { %v359_v4 = vpop.f32.mrb[0].mxu0 }
  0xf2   : > { %v620_v5 = vpop.f32.mrb[1].mxu0  ;;  %v367_v6 = vsel %vm366_vm2, %v359_v4, -inf }
  0xf3   : > { %368 = vmax.xlane.f32.xlu0 %v367_v6  ;;  %v362_v7 = vpop.f32.mrb[2].mxu0 }
  0xf4   : > { %v621_v8 = vpop.f32.mrb[3].mxu0 }
 0x180   : > { %v369_v11 = vpop.xlane.xlu0 %368 }
 0x181   : > { %v370_v12 = vmax.f32 %v365_v10, %v369_v11 }
 0x183   : > { %v371_v13 = vsub.f32 %v365_v10, %v370_v12  ;;  %447 = vst.msk [vmem:[#allocation2] sm:$0xff] %vm318_vm1, %v370_v12  ;;  %376 = vperm.xlu0 %673, %v370_v12  }
 0x185   : > { %v372_v22 = vmul.f32 1.442695, %v371_v13 }
 0x202   : > { %v377_v16 = vpop.permute.xlu0 %376 }
 0x203   : > { %v379_v17 = vsub.f32 %v359_v4, %v377_v16 }
 0x205   : > { %v380_v18 = vmul.f32 1.442695, %v379_v17 }
 0x207   : > { %675 = vpow2.f32 %v380_v18 }
 0x208   : > { %677 = vpow2.f32 %v372_v22 }
 0x211   : > { %v676_v19 = vpop.eup %675 }
 0x212   : > { %v384_v20 = vsel %vm366_vm2, %v676_v19, 0.0  ;;  %v397_v21 = vpack.c.bf16 %v676_v19, %v676_v19  ;;  %v678_v23 = vpop.eup %677 }
 0x213   : > { %385 = vadd.xlane.f32.xlu1 %v384_v20  ;;  %v383_v25 = vmul.f32 %v678_v23, %v382_v24 }
 0x214   : > { %625 = vmatmul.mubr.msk.bf16.vlgmr.msra.gmra.mrb[0].mxu1 %vm366_vm2, %v397_v21 }
 0x224   : > { %393 = vperm.xlu1 %674, %v678_v23  }
 0x2a0   : > { %v386_v26 = vpop.xlane.xlu1 %385 }
 0x2a1   : > { %v387_v27 = vadd.f32 %v386_v26, %v383_v25 }
 0x2a3   : > { %389 = vst.msk [vmem:[#allocation3] sm:$0xff] %vm318_vm1, %v387_v27 }
 0x2a4   : > { %v394_v34 = vpop.permute.xlu1 %393 }
 0x2a5   : > { %v396_v35 = vmul.f32 0.0, %v394_v34 }
 0x2aa   : > { %v452_v28 = vld [vmem:[#allocation3] sm:$0xff] }
 0x2ab   : > { %679 = vrcp.f32 %v452_v28 }
 0x2b5   : > { %v680_v29 = vpop.eup %679 }
 0x2b6   : > { %456 = vperm.xlu1 %674, %v680_v29  }
 0x2e7   : > { %v439_v30 = vpop.f32.mrb[0].mxu1 }
 0x2e8   : > { %v626_v31 = vpop.f32.mrb[1].mxu1  ;;  %v445_v36 = vadd.f32 %v439_v30, %v396_v35 }
 0x2e9   : > { %v442_v32 = vpop.f32.mrb[2].mxu1 }
 0x2ea   : > { %v627_v33 = vpop.f32.mrb[3].mxu1 }
 0x335   : > { %v457_v37 = vpop.permute.xlu1 %456 }
 0x336   : > { %v459_v38 = vmul.f32 %v457_v37, %v445_v36 }
 0x338   : > { %v460_v39 = vpack.c.bf16 %v459_v38, %v459_v38 }
 0x33a   : > { %461 = vst [vmem:[%s312_s23] sm:$0xf] %v460_v39 }
 0x33b PF: > { %s13_s16 = sadd.s32 1, %s719_s16   ;;  %s830_s12 = smov %s711_s14 }
 0x33c   : > { %p10_p10 = scmp.ge.s32.totalorder %s13_s16, 6   ;;  %s831_s13 = smov %s715_s15 }
 0x33d   : > { %s832_s14 = smov %s835_s17  ;;  %s833_s15 = smov %s839_s18 }
 0x33e   :  { %12 = sbr.rel (!%p10_p10) target bundleno = 3 (0x3), region = 76 }

// kernel: whisper_backbone_forward.15
= control target key start
LH: loop header
LB: loop body
LE: loop exit
PB: predicated region body
PF: predicated region fallthrough
CT: control target
= control target key end

     0   :  { %v274_v34 = vlaneseq  ;;  %s535_s1 = inlined_call_operand.vmem [shape: bf16[256,256], index: 1, kind: input, shape index: {}]   ;;  %s536_s0 = inlined_call_operand.vmem [shape: bf16[16,256], index: 0, kind: input, shape index: {}]   ;;  %s537_s2 = inlined_call_operand.vmem [shape: f32[1,256], index: 2, kind: input, shape index: {}]   ;;  %s538_s3 = inlined_call_operand.vmem [shape: f32[16,256], index: 3, kind: input, shape index: {}]   ;;  %s539_s4 = inlined_call_operand.vmem [shape: f32[16,256], index: 4, kind: output, shape index: {}]  }
   0x1   :  { %v330_v0 = vld [vmem:[%s535_s1 + $0x4] ss:$8 sps:$4 sm:$0xff]   ;;  %v332_v1 = vld [vmem:[%s535_s1] ss:$8 sps:$4 sm:$0xff]   ;;  %v333_v2 = vld [vmem:[%s535_s1 + $0x14] ss:$8 sps:$4 sm:$0xff]  }
   0x2   :  { %221 = vmatprep.subr.bf16.mxu0 %v330_v0  ;;  %v335_v3 = vld [vmem:[%s535_s1 + $0x10] ss:$8 sps:$4 sm:$0xff]   ;;  %v336_v4 = vld [vmem:[%s535_s1 + $0x24] ss:$8 sps:$4 sm:$0xff]   ;;  %v338_v5 = vld [vmem:[%s535_s1 + $0x20] ss:$8 sps:$4 sm:$0xff]  }
   0x3   :  { %222 = vmatpush1.bf16.msra.mxu0 %v332_v1  ;;  %v339_v6 = vld [vmem:[%s535_s1 + $0x34] ss:$8 sps:$4 sm:$0xff]   ;;  %v341_v7 = vld [vmem:[%s535_s1 + $0x30] ss:$8 sps:$4 sm:$0xff]   ;;  %v342_v8 = vld [vmem:[%s535_s1 + $0x44] ss:$8 sps:$4 sm:$0xff]  }
   0x4   :  { %223 = vmatprep.subr.bf16.mxu0 %v333_v2  ;;  %v344_v9 = vld [vmem:[%s535_s1 + $0x40] ss:$8 sps:$4 sm:$0xff]   ;;  %v345_v10 = vld [vmem:[%s535_s1 + $0x54] ss:$8 sps:$4 sm:$0xff]   ;;  %v347_v11 = vld [vmem:[%s535_s1 + $0x50] ss:$8 sps:$4 sm:$0xff]  }
   0x5   :  { %v348_v12 = vld [vmem:[%s535_s1 + $0x64] ss:$8 sps:$4 sm:$0xff]   ;;  %v350_v14 = vld [vmem:[%s535_s1 + $0x60] ss:$8 sps:$4 sm:$0xff]   ;;  %v351_v15 = vld [vmem:[%s535_s1 + $0x74] ss:$8 sps:$4 sm:$0xff]  }
   0x6   :  { %v380_v13 = vld [vmem:[%s536_s0 + $0x4] ss:$8 sps:$4 sm:$0xff]   ;;  %v353_v16 = vld [vmem:[%s535_s1 + $0x70] ss:$8 sps:$4 sm:$0xff]   ;;  %v356_v18 = vld [vmem:[%s535_s1 + $0x80] ss:$8 sps:$4 sm:$0xff]  }
   0x7   :  { %224 = vmatpush1.bf16.msra.mxu0 %v335_v3  ;;  %253 = vmatprep.mubr.bf16.mxu0 %v380_v13  ;;  %v354_v17 = vld [vmem:[%s535_s1 + $0x84] ss:$8 sps:$4 sm:$0xff]   ;;  %v357_v19 = vld [vmem:[%s535_s1 + $0x94] ss:$8 sps:$4 sm:$0xff]   ;;  %v359_v20 = vld [vmem:[%s535_s1 + $0x90] ss:$8 sps:$4 sm:$0xff]  }
   0x8   :  { %225 = vmatprep.subr.bf16.mxu0 %v336_v4  ;;  %v360_v21 = vld [vmem:[%s535_s1 + $0xa4] ss:$8 sps:$4 sm:$0xff]   ;;  %v362_v22 = vld [vmem:[%s535_s1 + $0xa0] ss:$8 sps:$4 sm:$0xff]   ;;  %v363_v23 = vld [vmem:[%s535_s1 + $0xb4] ss:$8 sps:$4 sm:$0xff]  }
   0x9   :  { %v365_v24 = vld [vmem:[%s535_s1 + $0xb0] ss:$8 sps:$4 sm:$0xff]   ;;  %v366_v25 = vld [vmem:[%s535_s1 + $0xc4] ss:$8 sps:$4 sm:$0xff]   ;;  %v368_v26 = vld [vmem:[%s535_s1 + $0xc0] ss:$8 sps:$4 sm:$0xff]  }
   0xa   :  { %v369_v27 = vld [vmem:[%s535_s1 + $0xd4] ss:$8 sps:$4 sm:$0xff]   ;;  %v371_v28 = vld [vmem:[%s535_s1 + $0xd0] ss:$8 sps:$4 sm:$0xff]   ;;  %v372_v29 = vld [vmem:[%s535_s1 + $0xe4] ss:$8 sps:$4 sm:$0xff]  }
   0xb   :  { %226 = vmatpush1.bf16.msra.mxu0 %v338_v5  ;;  %v374_v30 = vld [vmem:[%s535_s1 + $0xe0] ss:$8 sps:$4 sm:$0xff]   ;;  %v375_v31 = vld [vmem:[%s535_s1 + $0xf4] ss:$8 sps:$4 sm:$0xff]   ;;  %v377_v32 = vld [vmem:[%s535_s1 + $0xf0] ss:$8 sps:$4 sm:$0xff]  }
   0xc   :  { %227 = vmatprep.subr.bf16.mxu0 %v339_v6  ;;  %v378_v33 = vld [vmem:[%s536_s0] ss:$8 sps:$4 sm:$0xff]   ;;  %v275_v35 = vshrl.u32 %v274_v34, 7  ;;  %v266_v44 = vld [vmem:[%s538_s3 + $0x10] sm:$0xff]  ;;  %v267_v47 = vld [vmem:[%s538_s3 + $0x18] sm:$0xff] }
   0xd   :  { %v272_v37 = vld [vmem:[%s537_s2] sm:$0x3]  ;;  %v265_v41 = vld [vmem:[%s538_s3 + $0x8] sm:$0xff] }
   0xe   :  { %v276_v36 = vsub.s32 0, %v275_v35  ;;  %v280_v38 = vsub.s32 1, %v275_v35  ;;  %v264_v39 = vld [vmem:[%s538_s3] sm:$0xff] }
   0xf   :  { %228 = vmatpush1.bf16.msra.mxu0 %v341_v7 }
  0x10   :  { %229 = vmatprep.subr.bf16.mxu0 %v342_v8  ;;  %v277_v40 = vrot.slane %v272_v37, %v276_v36  ;;  %v281_v43 = vrot.slane %v272_v37, %v280_v38 }
  0x13   :  { %230 = vmatpush1.bf16.msra.mxu0 %v344_v9 }
  0x14   :  { %231 = vmatprep.subr.bf16.mxu0 %v345_v10 }
  0x17   :  { %232 = vmatpush1.bf16.msra.mxu0 %v347_v11 }
  0x18   :  { %233 = vmatprep.subr.bf16.mxu0 %v348_v12 }
  0x1b   :  { %234 = vmatpush1.bf16.msra.mxu0 %v350_v14 }
  0x1c   :  { %235 = vmatprep.subr.bf16.mxu0 %v351_v15 }
  0x1f   :  { %236 = vmatpush1.bf16.msra.mxu0 %v353_v16 }
  0x20   :  { %237 = vmatprep.subr.bf16.mxu0 %v354_v17 }
  0x23   :  { %238 = vmatpush1.bf16.msra.mxu0 %v356_v18 }
  0x24   :  { %239 = vmatprep.subr.bf16.mxu0 %v357_v19 }
  0x27   :  { %240 = vmatpush1.bf16.msra.mxu0 %v359_v20 }
  0x28   :  { %241 = vmatprep.subr.bf16.mxu0 %v360_v21 }
  0x2b   :  { %242 = vmatpush1.bf16.msra.mxu0 %v362_v22 }
  0x2c   :  { %243 = vmatprep.subr.bf16.mxu0 %v363_v23 }
  0x2f   :  { %244 = vmatpush1.bf16.msra.mxu0 %v365_v24 }
  0x30   :  { %245 = vmatprep.subr.bf16.mxu0 %v366_v25 }
  0x33   :  { %246 = vmatpush1.bf16.msra.mxu0 %v368_v26 }
  0x34   :  { %247 = vmatprep.subr.bf16.mxu0 %v369_v27 }
  0x37   :  { %248 = vmatpush1.bf16.msra.mxu0 %v371_v28 }
  0x38   :  { %249 = vmatprep.subr.bf16.mxu0 %v372_v29 }
  0x3b   :  { %250 = vmatpush1.bf16.msra.mxu0 %v374_v30 }
  0x3c   :  { %251 = vmatprep.subr.bf16.mxu0 %v375_v31 }
  0x3f   :  { %252 = vmatpush1.bf16.msra.mxu0 %v377_v32 }
  0x42   :  { %254 = vmatmul.mubr.bf16.vlgmr.msra.gmra.mrb[0].mxu0 %v378_v33 }
 0x115   :  { %v255_v42 = vpop.f32.mrb[0].mxu0 }
 0x116   :  { %v268_v45 = vadd.f32 %v264_v39, %v255_v42  ;;  %v257_v46 = vpop.f32.mrb[1].mxu0 }
 0x117   :  { %v269_v48 = vadd.f32 %v265_v41, %v257_v46  ;;  %v259_v49 = vpop.f32.mrb[2].mxu0 }
 0x118   :  { %v284_v50 = vadd.f32 %v277_v40, %v268_v45  ;;  %v270_v51 = vadd.f32 %v266_v44, %v259_v49  ;;  %v261_v52 = vpop.f32.mrb[3].mxu0 }
 0x119   :  { %v285_v53 = vadd.f32 %v281_v43, %v269_v48  ;;  %v271_v54 = vadd.f32 %v267_v47, %v261_v52 }
 0x11a   :  { %288 = vst [vmem:[%s539_s4] sm:$0xff] %v284_v50  ;;  %v286_v55 = vadd.f32 %v277_v40, %v270_v51 }
 0x11b   :  { %289 = vst [vmem:[%s539_s4 + $0x8] sm:$0xff] %v285_v53  ;;  %v287_v56 = vadd.f32 %v281_v43, %v271_v54 }
 0x11c   :  { %290 = vst [vmem:[%s539_s4 + $0x10] sm:$0xff] %v286_v55 }
 0x11d   :  { %291 = vst [vmem:[%s539_s4 + $0x18] sm:$0xff] %v287_v56 }

// kernel: whisper_backbone_forward.13
= control target key start
LH: loop header
LB: loop body
LE: loop exit
PB: predicated region body
PF: predicated region fallthrough
CT: control target
= control target key end

     0   :  { %s1138_s18 = smov 0   ;;  %s1140_s19 = smov 0   ;;  %s1349_s0 = inlined_call_operand.vmem [shape: f32[16,256], index: 0, kind: input, shape index: {}]   ;;  %s1350_s1 = inlined_call_operand.vmem [shape: f32[1,256], index: 1, kind: input, shape index: {}]   ;;  %s1351_s2 = inlined_call_operand.vmem [shape: f32[1,256], index: 2, kind: input, shape index: {}]   ;;  %s1352_s3 = inlined_call_operand.vmem [shape: bf16[256,768], index: 3, kind: input, shape index: {}]   ;;  %s1353_s4 = inlined_call_operand.vmem [shape: f32[1,768], index: 4, kind: input, shape index: {}]   ;;  %s1354_s5 = inlined_call_operand.vmem [shape: bf16[16,768], index: 5, kind: output, shape index: {}]  }
   0x1   :  { %s1142_s20 = smov 0   ;;  %s1144_s21 = smov 0  }
   0x2   :  { %s1146_s22 = smov 0  }
   0x3 LB: > { %s24_s23 = sadd.s32 1, %s1102_s21  ;;  %s920_s24 = sadd.s32 4294967295, %s1106_s22   ;;  %s1106_s22 = sphi %s1146_s22, %s15_s22   ;;  %s1102_s21 = sphi %s1144_s21, %s1359_s21   ;;  %s1098_s20 = sphi %s1142_s20, %s1358_s20   ;;  %s1094_s19 = sphi %s1140_s19, %s1357_s19   ;;  %s1090_s18 = sphi %s1138_s18, %s1356_s18  }
   0x4   : > { %p25_p0 = scmp.ge.s32.totalorder %s24_s23, 3  ;;  %p109_p1 = scmp.ne.s32.totalorder %s1094_s19, %s1090_s18 }
   0x5   : > { %p110_p2 = scmp.eq.s32.totalorder %s1106_s22, 0  ;;  %p167_p4 = scmp.eq.s32.totalorder %s920_s24, 2 }
   0x6   : > { %s1361_s23 = smov (%p25_p0, %s24_s23), 0  ;;  %s102_s26 = sadd.s32 1, %s1094_s19 }
   0x7   : > { %p111_p3 = por %p110_p2, %p109_p1  ;;  %s99_s25 = ssub.s32 %s1102_s21, %s1361_s23 }
   0x8   : > { %p100_p5 = scmp.eq.s32.totalorder %s99_s25, 0  ;;  %p1173_p6 = por %p167_p4, %p109_p1 }
   0x9   : > { %p924_p7 = scmp.ge.s32.totalorder %s1106_s22, 3 }
   0xa   : > { %s1178_s28 = scalar_select %p100_p5, %s1094_s19, %s102_s26  }
   0xb   : > { %205 = sbr.rel (%p924_p7) target bundleno = 38 (0x26), region = 28 }
  0x12   : > { %208 = sbr.rel (!%p111_p3) target bundleno = 38 (0x26), region = 32  ;;  %s210_s29 = sand.u32 (%p111_p3), 1, %s1094_s19  }
  0x13   : > { %s972_s30 = sshll.u32 (%p111_p3), %s1102_s21, 3  ;;  %s925_s6 = sshll.u32 (%p111_p3), %s210_s29, 8 }
  0x14   : > { %s1186_s9 = scalar_lea.vmem (%p111_p3), %s1352_s3, %s972_s30  ;;  %s1191_s10 = scalar_lea.vmem (%p111_p3), [#allocation3], %s925_s6 }
  0x15   : > { %v305_v0 = vld [vmem:[%s1186_s9] sm:$0xff] (%p111_p3)  ;;  %v307_v1 = vld [vmem:[%s1186_s9 + $0x18] sm:$0xff] (%p111_p3)  ;;  %v309_v2 = vld [vmem:[%s1186_s9 + $0x30] sm:$0xff] (%p111_p3) }
  0x16   : > { %306 = vst [vmem:[%s1191_s10] sm:$0xff] (%p111_p3), %v305_v0  ;;  %308 = vst [vmem:[%s1191_s10 + $0x8] sm:$0xff] (%p111_p3), %v307_v1  ;;  %v311_v3 = vld [vmem:[%s1186_s9 + $0x48] sm:$0xff] (%p111_p3)  ;;  %v313_v4 = vld [vmem:[%s1186_s9 + $0x60] sm:$0xff] (%p111_p3) }
  0x17   : > { %310 = vst [vmem:[%s1191_s10 + $0x10] sm:$0xff] (%p111_p3), %v309_v2  ;;  %v315_v5 = vld [vmem:[%s1186_s9 + $0x78] sm:$0xff] (%p111_p3)  ;;  %312 = vst [vmem:[%s1191_s10 + $0x18] sm:$0xff] (%p111_p3), %v311_v3  ;;  %v317_v6 = vld [vmem:[%s1186_s9 + $0x90] sm:$0xff] (%p111_p3) }
  0x18   : > { %314 = vst [vmem:[%s1191_s10 + $0x20] sm:$0xff] (%p111_p3), %v313_v4  ;;  %316 = vst [vmem:[%s1191_s10 + $0x28] sm:$0xff] (%p111_p3), %v315_v5  ;;  %v319_v7 = vld [vmem:[%s1186_s9 + $0xa8] sm:$0xff] (%p111_p3)  ;;  %v321_v8 = vld [vmem:[%s1186_s9 + $0xc0] sm:$0xff] (%p111_p3) }
  0x19   : > { %318 = vst [vmem:[%s1191_s10 + $0x30] sm:$0xff] %v317_v6  ;;  %320 = vst [vmem:[%s1191_s10 + $0x38] sm:$0xff] %v319_v7  ;;  %v323_v9 = vld [vmem:[%s1186_s9 + $0xd8] sm:$0xff]  ;;  %v325_v10 = vld [vmem:[%s1186_s9 + $0xf0] sm:$0xff] }
  0x1a   : > { %322 = vst [vmem:[%s1191_s10 + $0x40] sm:$0xff] %v321_v8  ;;  %v327_v11 = vld [vmem:[%s1186_s9 + $0x108] sm:$0xff]  ;;  %324 = vst [vmem:[%s1191_s10 + $0x48] sm:$0xff] %v323_v9  ;;  %v329_v12 = vld [vmem:[%s1186_s9 + $0x120] sm:$0xff] }
  0x1b   : > { %326 = vst [vmem:[%s1191_s10 + $0x50] sm:$0xff] %v325_v10  ;;  %328 = vst [vmem:[%s1191_s10 + $0x58] sm:$0xff] %v327_v11  ;;  %v331_v13 = vld [vmem:[%s1186_s9 + $0x138] sm:$0xff]  ;;  %v333_v14 = vld [vmem:[%s1186_s9 + $0x150] sm:$0xff] }
  0x1c   : > { %330 = vst [vmem:[%s1191_s10 + $0x60] sm:$0xff] %v329_v12  ;;  %332 = vst [vmem:[%s1191_s10 + $0x68] sm:$0xff] %v331_v13  ;;  %v335_v15 = vld [vmem:[%s1186_s9 + $0x168] sm:$0xff]  ;;  %v337_v16 = vld [vmem:[%s1186_s9 + $0x180] sm:$0xff] }
  0x1d   : > { %334 = vst [vmem:[%s1191_s10 + $0x70] sm:$0xff] %v333_v14  ;;  %v339_v17 = vld [vmem:[%s1186_s9 + $0x198] sm:$0xff]  ;;  %336 = vst [vmem:[%s1191_s10 + $0x78] sm:$0xff] %v335_v15  ;;  %v341_v18 = vld [vmem:[%s1186_s9 + $0x1b0] sm:$0xff] }
  0x1e   : > { %338 = vst [vmem:[%s1191_s10 + $0x80] sm:$0xff] %v337_v16  ;;  %340 = vst [vmem:[%s1191_s10 + $0x88] sm:$0xff] %v339_v17  ;;  %v343_v19 = vld [vmem:[%s1186_s9 + $0x1c8] sm:$0xff]  ;;  %v345_v20 = vld [vmem:[%s1186_s9 + $0x1e0] sm:$0xff] }
  0x1f   : > { %342 = vst [vmem:[%s1191_s10 + $0x90] sm:$0xff] %v341_v18  ;;  %344 = vst [vmem:[%s1191_s10 + $0x98] sm:$0xff] %v343_v19  ;;  %v347_v21 = vld [vmem:[%s1186_s9 + $0x1f8] sm:$0xff]  ;;  %v349_v22 = vld [vmem:[%s1186_s9 + $0x210] sm:$0xff] }
  0x20   : > { %346 = vst [vmem:[%s1191_s10 + $0xa0] sm:$0xff] %v345_v20  ;;  %v351_v23 = vld [vmem:[%s1186_s9 + $0x228] sm:$0xff]  ;;  %348 = vst [vmem:[%s1191_s10 + $0xa8] sm:$0xff] %v347_v21  ;;  %v353_v24 = vld [vmem:[%s1186_s9 + $0x240] sm:$0xff] }
  0x21   : > { %350 = vst [vmem:[%s1191_s10 + $0xb0] sm:$0xff] %v349_v22  ;;  %352 = vst [vmem:[%s1191_s10 + $0xb8] sm:$0xff] %v351_v23  ;;  %v355_v25 = vld [vmem:[%s1186_s9 + $0x258] sm:$0xff]  ;;  %v357_v26 = vld [vmem:[%s1186_s9 + $0x270] sm:$0xff] }
  0x22   : > { %354 = vst [vmem:[%s1191_s10 + $0xc0] sm:$0xff] %v353_v24  ;;  %356 = vst [vmem:[%s1191_s10 + $0xc8] sm:$0xff] %v355_v25  ;;  %v359_v27 = vld [vmem:[%s1186_s9 + $0x288] sm:$0xff]  ;;  %v361_v28 = vld [vmem:[%s1186_s9 + $0x2a0] sm:$0xff] }
  0x23   : > { %358 = vst [vmem:[%s1191_s10 + $0xd0] sm:$0xff] %v357_v26  ;;  %v363_v29 = vld [vmem:[%s1186_s9 + $0x2b8] sm:$0xff]  ;;  %360 = vst [vmem:[%s1191_s10 + $0xd8] sm:$0xff] %v359_v27  ;;  %v365_v30 = vld [vmem:[%s1186_s9 + $0x2d0] sm:$0xff] }
  0x24   : > { %362 = vst [vmem:[%s1191_s10 + $0xe0] sm:$0xff] %v361_v28  ;;  %364 = vst [vmem:[%s1191_s10 + $0xe8] sm:$0xff] %v363_v29  ;;  %v367_v31 = vld [vmem:[%s1186_s9 + $0x2e8] sm:$0xff] }
  0x25   : > { %366 = vst [vmem:[%s1191_s10 + $0xf0] sm:$0xff] %v365_v30  ;;  %368 = vst [vmem:[%s1191_s10 + $0xf8] sm:$0xff] %v367_v31 }
  0x26 PF: > { %p928_p8 = scmp.ge.s32.totalorder %s1106_s22, 1  ;;  %p381_p9 = scmp.lt.s32.totalorder %s1106_s22, 4 }
  0x28   : > { %p382_p10 = pnand %p928_p8, %p381_p9 }
  0x29   : > { %s388_s11 = sand.u32 (!%p382_p10), 1, %s1090_s18   ;;  %s931_s12 = sshll.u32 (!%p382_p10), %s1098_s20, 1 }
  0x2a   : > { %385 = sbr.rel (%p382_p10) target bundleno = 666 (0x29a), region = 74  ;;  %s929_s13 = sshll.u32 (!%p382_p10), %s388_s11, 8 }
  0x2b   : > { %s930_s14 = sshll.u32 (!%p382_p10), %s388_s11, 4  ;;  %p433_p11 = scmp.lt.s32.totalorder (!%p382_p10), %s931_s12, 5 }
  0x2c   : > { %s1264_s24 = scalar_lea.vmem (!%p382_p10), [#allocation3], %s929_s13  ;;  %s1266_s25 = scalar_lea.vmem (!%p382_p10), [#allocation4], %s930_s14 }
  0x2d   : > { %p932_p12 = scmp.ne.s32.totalorder (!%p382_p10), %s1098_s20, 0 }
  0x31   : > { %s1363_s12 = smov (!%p433_p11, %s931_s12), 5  ;;  %442 = sbr.rel (%p932_p12) target bundleno = 373 (0x175), region = 82 }
  0x32   : > { %s435_s17 = scalar_lea.vmem %s1353_s4, %s1363_s12  ;;  %v443_v32 = vld [vmem:[%s1349_s0] sm:$0xff] (!%p932_p12)  ;;  %v444_v33 = vld [vmem:[%s1349_s0 + $0x8] sm:$0xff] (!%p932_p12)  ;;  %v445_v34 = vld [vmem:[%s1349_s0 + $0x10] sm:$0xff] (!%p932_p12)  ;;  %v483_v55 = vlaneseq (!%p932_p12) }
  0x33   : > { %v449_v35 = vadd.f32 (!%p932_p12), %v444_v33, %v443_v32  ;;  %v446_v36 = vld [vmem:[%s1349_s0 + $0x18] sm:$0xff] (!%p932_p12)  ;;  %v447_v62 = vld [vmem:[%s1350_s1] sm:$0x3] (!%p932_p12) }
  0x34   : > { %v452_v37 = vadd.f32 (!%p932_p12), %v446_v36, %v445_v34  ;;  %v484_v59 = vshrl.u32 (!%p932_p12), %v483_v55, 7  ;;  %v448_v0 = vld [vmem:[%s1351_s2] sm:$0x3] (!%p932_p12) }
  0x35   : > { %450 = vadd.xlane.f32.xlu0 (!%p932_p12), %v449_v35 }
  0x36   : > { %v485_v60 = vsub.s32 (!%p932_p12), 0, %v484_v59  ;;  %v489_v61 = vsub.s32 (!%p932_p12), 1, %v484_v59 }
  0x38   : > { %v486_v1 = vrot.slane %v447_v62, %v485_v60  ;;  %v490_v2 = vrot.slane %v447_v62, %v489_v61  ;;  %v501_v6 = vrot.slane %v448_v0, %v485_v60  ;;  %v505_v7 = vrot.slane %v448_v0, %v489_v61 }
  0x39   : > { %453 = vadd.xlane.f32.xlu0 %v452_v37 }
  0xc2   : > { %v451_v38 = vpop.xlane.xlu0 %450 }
  0xc3   : > { %v456_v39 = vmul.f32 0.00390625, %v451_v38 }
  0xc5   : > { %v458_v40 = vsub.f32 %v443_v32, %v456_v39  ;;  %v459_v41 = vsub.f32 %v444_v33, %v456_v39 }
  0xc6   : > { %v454_v42 = vpop.xlane.xlu0 %453 }
  0xc7   : > { %v457_v43 = vmul.f32 0.00390625, %v454_v42  ;;  %v462_v44 = vmul.f32 %v458_v40, %v458_v40  ;;  %v463_v45 = vmul.f32 %v459_v41, %v459_v41 }
  0xc9   : > { %v460_v46 = vsub.f32 %v445_v34, %v457_v43  ;;  %v461_v47 = vsub.f32 %v446_v36, %v457_v43  ;;  %v466_v48 = vadd.f32 %v463_v45, %v462_v44 }
  0xcb   : > { %467 = vadd.xlane.f32.xlu1 %v466_v48  ;;  %v464_v49 = vmul.f32 %v460_v46, %v460_v46  ;;  %v465_v50 = vmul.f32 %v461_v47, %v461_v47 }
  0xcd   : > { %v469_v51 = vadd.f32 %v465_v50, %v464_v49 }
  0xcf   : > { %470 = vadd.xlane.f32.xlu1 %v469_v51 }
 0x158   : > { %v468_v52 = vpop.xlane.xlu1 %467 }
 0x159   : > { %v472_v53 = vmul.f32 0.00390625, %v468_v52 }
 0x15b   : > { %v474_v54 = vadd.f32 1e-05, %v472_v53 }
 0x15c   : > { %v471_v56 = vpop.xlane.xlu1 %470 }
 0x15d   : > { %1016 = vrsqrt.f32 %v474_v54  ;;  %v473_v57 = vmul.f32 0.00390625, %v471_v56 }
 0x15f   : > { %v475_v58 = vadd.f32 1e-05, %v473_v57 }
 0x161   : > { %1018 = vrsqrt.f32 %v475_v58 }
 0x167   : > { %v1017_v63 = vpop.eup %1016 }
 0x168   : > { %v478_v3 = vmul.f32 %v1017_v63, %v458_v40  ;;  %v479_v4 = vmul.f32 %v1017_v63, %v459_v41 }
 0x16a   : > { %v493_v8 = vmul.f32 %v486_v1, %v478_v3  ;;  %v494_v9 = vmul.f32 %v490_v2, %v479_v4 }
 0x16b   : > { %v1019_v5 = vpop.eup %1018 }
 0x16c   : > { %v480_v10 = vmul.f32 %v1019_v5, %v460_v46  ;;  %v481_v11 = vmul.f32 %v1019_v5, %v461_v47  ;;  %v508_v14 = vadd.f32 %v501_v6, %v493_v8  ;;  %v509_v15 = vadd.f32 %v505_v7, %v494_v9 }
 0x16e   : > { %v495_v12 = vmul.f32 %v486_v1, %v480_v10  ;;  %v496_v13 = vmul.f32 %v490_v2, %v481_v11 }
 0x170   : > { %v510_v16 = vadd.f32 %v501_v6, %v495_v12  ;;  %v511_v17 = vadd.f32 %v505_v7, %v496_v13 }
 0x172   : > { %v512_v18 = vpack.c.bf16 %v510_v16, %v508_v14  ;;  %v513_v19 = vpack.c.bf16 %v511_v17, %v509_v15 }
 0x174   : > { %514 = vst [vmem:[#allocation2] sm:$0xff] %v512_v18  ;;  %515 = vst [vmem:[#allocation2 + $0x8] sm:$0xff] %v513_v19 }
 0x175 PF: > { %v1020_v20 = vld [vmem:[%s1264_s24 + $0x4] ss:$8 sps:$4 sm:$0xff]   ;;  %v1022_v21 = vld [vmem:[%s1264_s24] ss:$8 sps:$4 sm:$0xff]   ;;  %v1023_v22 = vld [vmem:[%s1264_s24 + $0x14] ss:$8 sps:$4 sm:$0xff]   ;;  %v552_v54 = vlaneseq }
 0x176   : > { %722 = vmatprep.subr.bf16.mxu0 %v1020_v20  ;;  %v1025_v23 = vld [vmem:[%s1264_s24 + $0x10] ss:$8 sps:$4 sm:$0xff]   ;;  %v1026_v24 = vld [vmem:[%s1264_s24 + $0x24] ss:$8 sps:$4 sm:$0xff]   ;;  %v1028_v25 = vld [vmem:[%s1264_s24 + $0x20] ss:$8 sps:$4 sm:$0xff]  }
 0x177   : > { %723 = vmatpush1.bf16.msra.mxu0 %v1022_v21  ;;  %v1029_v26 = vld [vmem:[%s1264_s24 + $0x34] ss:$8 sps:$4 sm:$0xff]   ;;  %v1031_v27 = vld [vmem:[%s1264_s24 + $0x30] ss:$8 sps:$4 sm:$0xff]   ;;  %v1032_v28 = vld [vmem:[%s1264_s24 + $0x44] ss:$8 sps:$4 sm:$0xff]  }
 0x178   : > { %724 = vmatprep.subr.bf16.mxu0 %v1023_v22  ;;  %v1034_v29 = vld [vmem:[%s1264_s24 + $0x40] ss:$8 sps:$4 sm:$0xff]   ;;  %v1035_v30 = vld [vmem:[%s1264_s24 + $0x54] ss:$8 sps:$4 sm:$0xff]   ;;  %v1037_v31 = vld [vmem:[%s1264_s24 + $0x50] ss:$8 sps:$4 sm:$0xff]  }
 0x179   : > { %v1038_v32 = vld [vmem:[%s1264_s24 + $0x64] ss:$8 sps:$4 sm:$0xff]   ;;  %v1040_v34 = vld [vmem:[%s1264_s24 + $0x60] ss:$8 sps:$4 sm:$0xff]   ;;  %v1041_v35 = vld [vmem:[%s1264_s24 + $0x74] ss:$8 sps:$4 sm:$0xff]  }
 0x17a   : > { %v1043_v36 = vld [vmem:[%s1264_s24 + $0x70] ss:$8 sps:$4 sm:$0xff]   ;;  %v1044_v37 = vld [vmem:[%s1264_s24 + $0x84] ss:$8 sps:$4 sm:$0xff]   ;;  %v1046_v38 = vld [vmem:[%s1264_s24 + $0x80] ss:$8 sps:$4 sm:$0xff]  }
 0x17b   : > { %725 = vmatpush1.bf16.msra.mxu0 %v1025_v23  ;;  %v517_v33 = vld [vmem:[#allocation2 + $0x8] sm:$0xff]  ;;  %v1050_v41 = vld [vmem:[%s1264_s24 + $0xa4] ss:$8 sps:$4 sm:$0xff]   ;;  %v1052_v42 = vld [vmem:[%s1264_s24 + $0xa0] ss:$8 sps:$4 sm:$0xff]   ;;  %v553_v55 = vshrl.u32 %v552_v54, 7 }
 0x17c   : > { %726 = vmatprep.subr.bf16.mxu0 %v1026_v24  ;;  %754 = vmatprep.mubr.bf16.mxu0 %v517_v33  ;;  %v1047_v39 = vld [vmem:[%s1264_s24 + $0x94] ss:$8 sps:$4 sm:$0xff]   ;;  %v1049_v40 = vld [vmem:[%s1264_s24 + $0x90] ss:$8 sps:$4 sm:$0xff]   ;;  %v1056_v45 = vld [vmem:[%s1264_s24 + $0xc4] ss:$8 sps:$4 sm:$0xff]  }
 0x17d   : > { %v1053_v43 = vld [vmem:[%s1264_s24 + $0xb4] ss:$8 sps:$4 sm:$0xff]   ;;  %v1055_v44 = vld [vmem:[%s1264_s24 + $0xb0] ss:$8 sps:$4 sm:$0xff]   ;;  %v1058_v46 = vld [vmem:[%s1264_s24 + $0xc0] ss:$8 sps:$4 sm:$0xff]  }
 0x17e   : > { %v1059_v47 = vld [vmem:[%s1264_s24 + $0xd4] ss:$8 sps:$4 sm:$0xff]   ;;  %v1061_v48 = vld [vmem:[%s1264_s24 + $0xd0] ss:$8 sps:$4 sm:$0xff]   ;;  %v1062_v49 = vld [vmem:[%s1264_s24 + $0xe4] ss:$8 sps:$4 sm:$0xff]  }
 0x17f   : > { %727 = vmatpush1.bf16.msra.mxu0 %v1028_v25  ;;  %v1064_v50 = vld [vmem:[%s1264_s24 + $0xe0] ss:$8 sps:$4 sm:$0xff]   ;;  %v1065_v51 = vld [vmem:[%s1264_s24 + $0xf4] ss:$8 sps:$4 sm:$0xff]   ;;  %v1067_v52 = vld [vmem:[%s1264_s24 + $0xf0] ss:$8 sps:$4 sm:$0xff]  }
 0x180   : > { %728 = vmatprep.subr.bf16.mxu0 %v1029_v26  ;;  %v516_v53 = vld [vmem:[#allocation2] sm:$0xff]  ;;  %v554_v56 = vsub.s32 0, %v553_v55  ;;  %v558_v58 = vsub.s32 1, %v553_v55  ;;  %s975_s12 = sshll.u32 (%p1173_p6), %s1098_s20, 3 }
 0x181   : > { %v550_v57 = vld [vmem:[%s435_s17] sm:$0x3]  ;;  %s791_s26 = scalar_lea.vmem (%p1173_p6), %s1354_s5, %s975_s12 }
 0x182   : > { %v555_v59 = vrot.slane %v550_v57, %v554_v56  ;;  %v559_v60 = vrot.slane %v550_v57, %v558_v58 }
 0x183   : > { %729 = vmatpush1.bf16.msra.mxu0 %v1031_v27 }
 0x184   : > { %730 = vmatprep.subr.bf16.mxu0 %v1032_v28 }
 0x187   : > { %731 = vmatpush1.bf16.msra.mxu0 %v1034_v29 }
 0x188   : > { %732 = vmatprep.subr.bf16.mxu0 %v1035_v30 }
 0x18b   : > { %733 = vmatpush1.bf16.msra.mxu0 %v1037_v31 }
 0x18c   : > { %734 = vmatprep.subr.bf16.mxu0 %v1038_v32 }
 0x18f   : > { %735 = vmatpush1.bf16.msra.mxu0 %v1040_v34 }
 0x190   : > { %736 = vmatprep.subr.bf16.mxu0 %v1041_v35 }
 0x193   : > { %737 = vmatpush1.bf16.msra.mxu0 %v1043_v36 }
 0x194   : > { %738 = vmatprep.subr.bf16.mxu0 %v1044_v37 }
 0x197   : > { %739 = vmatpush1.bf16.msra.mxu0 %v1046_v38 }
 0x198   : > { %740 = vmatprep.subr.bf16.mxu0 %v1047_v39 }
 0x19b   : > { %741 = vmatpush1.bf16.msra.mxu0 %v1049_v40 }
 0x19c   : > { %742 = vmatprep.subr.bf16.mxu0 %v1050_v41 }
 0x19f   : > { %743 = vmatpush1.bf16.msra.mxu0 %v1052_v42 }
 0x1a0   : > { %744 = vmatprep.subr.bf16.mxu0 %v1053_v43 }
 0x1a3   : > { %745 = vmatpush1.bf16.msra.mxu0 %v1055_v44 }
 0x1a4   : > { %746 = vmatprep.subr.bf16.mxu0 %v1056_v45 }
 0x1a7   : > { %747 = vmatpush1.bf16.msra.mxu0 %v1058_v46 }
 0x1a8   : > { %748 = vmatprep.subr.bf16.mxu0 %v1059_v47 }
 0x1ab   : > { %749 = vmatpush1.bf16.msra.mxu0 %v1061_v48 }
 0x1ac   : > { %750 = vmatprep.subr.bf16.mxu0 %v1062_v49 }
 0x1af   : > { %751 = vmatpush1.bf16.msra.mxu0 %v1064_v50 }
 0x1b0   : > { %752 = vmatprep.subr.bf16.mxu0 %v1065_v51 }
 0x1b3   : > { %753 = vmatpush1.bf16.msra.mxu0 %v1067_v52 }
 0x1b6   : > { %755 = vmatmul.mubr.bf16.vlgmr.msra.gmra.mrb[0].mxu0 %v516_v53 }
 0x289   : > { %v756_v61 = vpop.f32.mrb[0].mxu0 }
 0x28a   : > { %v757_v62 = vadd.f32 %v756_v61, %v555_v59  ;;  %v758_v63 = vpop.f32.mrb[1].mxu0 }
 0x28b   : > { %v759_v0 = vadd.f32 %v758_v63, %v559_v60  ;;  %v760_v1 = vpop.f32.mrb[2].mxu0  ;;  %785 = sbr.rel (!%p1173_p6) target bundleno = 666 (0x29a), region = 86 }
 0x28c   : > { %v761_v2 = vadd.f32 %v760_v1, %v555_v59  ;;  %v762_v3 = vpop.f32.mrb[3].mxu0 }
 0x28d   : > { %v973_v4 = vpack.c.bf16 %v759_v0, %v757_v62  ;;  %v763_v5 = vadd.f32 %v762_v3, %v559_v60 }
 0x28f   : > { %777 = vst [vmem:[%s1266_s25] sm:$0xff] %v973_v4  ;;  %v974_v6 = vpack.c.bf16 %v763_v5, %v761_v2 }
 0x291   : > { %778 = vst [vmem:[%s1266_s25 + $0x8] sm:$0xff] %v974_v6 }
 0x296   : > { %v821_v7 = vld [vmem:[%s1266_s25] sm:$0xff] }
 0x297   : > { %822 = vst [vmem:[%s791_s26] sm:$0xff] %v821_v7 }
 0x298   : > { %v823_v8 = vld [vmem:[%s1266_s25 + $0x8] sm:$0xff] }
 0x299   : > { %824 = vst [vmem:[%s791_s26 + $0x18] sm:$0xff] %v823_v8 }
 0x29a PF: > { %s15_s22 = sadd.s32 1, %s1106_s22   ;;  %s1356_s18 = smov %s1094_s19 }
 0x29b   : > { %p12_p13 = scmp.ge.s32.totalorder %s15_s22, 5   ;;  %s1357_s19 = smov %s1178_s28 }
 0x29c   : > { %s1358_s20 = smov %s1102_s21  ;;  %s1359_s21 = smov %s1361_s23 }
 0x29d   :  { %14 = sbr.rel (!%p12_p13) target bundleno = 3 (0x3), region = 161 }

// kernel: whisper_backbone_forward.21
= control target key start
LH: loop header
LB: loop body
LE: loop exit
PB: predicated region body
PF: predicated region fallthrough
CT: control target
= control target key end

     0   :  { %s487_s15 = smov 0   ;;  %s518_s0 = inlined_call_operand.vmem [shape: f32[2,8,256], index: 0, kind: input, shape index: {}]   ;;  %s519_s1 = inlined_call_operand.vmem [shape: f32[1,256], index: 1, kind: input, shape index: {}]   ;;  %s520_s2 = inlined_call_operand.vmem [shape: f32[1,256], index: 2, kind: input, shape index: {}]   ;;  %s521_s3 = inlined_call_operand.vmem [shape: f32[2,1,8], index: 3, kind: input, shape index: {}]   ;;  %s522_s4 = inlined_call_operand.vmem [shape: f32[2,1,256], index: 4, kind: output, shape index: {}]  }
   0x1 LB: > { %s426_s16 = sadd.s32 4294967295, %s458_s15   ;;  %p430_p0 = scmp.ge.s32.totalorder %s458_s15, 1  ;;  %s458_s15 = sphi %s487_s15, %s14_s15  }
   0x2   : > { %p170_p1 = scmp.lt.s32.totalorder %s458_s15, 3 }
   0x4   : > { %p171_p2 = pnand %p430_p0, %p170_p1 }
   0x5   : > { %p198_p3 = scmp.lt.s32.totalorder (!%p171_p2), %s426_s16, 1  ;;  %v460_v10 = vmov (!%p171_p2), 0.0   ;;  %vm333_vm0 = vcmask (!%p171_p2), 57344   ;;  %v232_v15 = vlaneseq (!%p171_p2)  ;;  %v212_v20 = vld [vmem:[%s519_s1] sm:$0x3] (!%p171_p2)  ;;  %vm258_vm1 = vcmask (!%p171_p2), 64512  }
   0x6   : > { %174 = sbr.rel (%p171_p2) target bundleno = 556 (0x22c), region = 36  ;;  %326 = vmatprep.mubr.f32.mxu0 (!%p171_p2), %v460_v10  ;;  %v213_v21 = vld [vmem:[%s520_s2] sm:$0x3] (!%p171_p2)  ;;  %v461_v35 = vmov (!%p171_p2), 1966171168  }
   0x7   : > { %v233_v17 = vshrl.u32 (!%p171_p2), %v232_v15, 7  ;;  %v345_v36 = vunpack.c.l.s4 (!%p171_p2), %v461_v35  ;;  %vm361_vm2 = vcmp.lt.s32.totalorder (!%p171_p2), %v232_v15, 256 }
   0x9   : > { %v238_v18 = vsub.s32 (!%p171_p2), 1, %v233_v17  ;;  %v234_v19 = vsub.s32 (!%p171_p2), 0, %v233_v17  ;;  %v346_v38 = vunpack.c.0.s8 (!%p171_p2), %v345_v36 }
   0xb   : > { %v239_v22 = vrot.slane (!%p171_p2), %v212_v20, %v238_v18  ;;  %v235_v23 = vrot.slane (!%p171_p2), %v212_v20, %v234_v19  ;;  %v252_v26 = vrot.slane (!%p171_p2), %v213_v21, %v238_v18  ;;  %v248_v28 = vrot.slane (!%p171_p2), %v213_v21, %v234_v19 }
   0xc   : > { %v349_v43 = vsub.s32 (!%p171_p2), %v346_v38, %v233_v17 }
   0xd   : > { %s524_s16 = smov (!%p198_p3, %s426_s16), 1 }
   0xe   : > { %s437_s17 = sshll.u32 %s524_s16, 4  ;;  %s205_s23 = scalar_lea.vmem %s521_s3, %s524_s16 }
   0xf   : > { %s202_s20 = scalar_lea.vmem %s518_s0, %s437_s17  ;;  %v257_v11 = vld [vmem:[%s205_s23] sm:$0x1]  ;;  %s433_s28 = sshll.u32 %s524_s16, 1 }
  0x10   : > { %v210_v0 = vld [vmem:[%s202_s20] sm:$0xff]  ;;  %v211_v1 = vld [vmem:[%s202_s20 + $0x8] sm:$0xff]  ;;  %v334_v12 = vsel %vm333_vm0, %v257_v11, 0.0  ;;  %s209_s5 = scalar_lea.vmem %s522_s4, %s433_s28 }
  0x11   : > { %v214_v2 = vadd.f32 %v211_v1, %v210_v0  ;;  %335 = vadd.xlane.f32.xlu1 %v334_v12 }
  0x13   : > { %215 = vadd.xlane.f32.xlu0 %v214_v2 }
  0x9e   : > { %v336_v33 = vpop.xlane.xlu1 %335 }
  0x9f   : > { %v337_v34 = vmax.f32 %v336_v33, 1.0 }
  0xa0   : > { %v216_v3 = vpop.xlane.xlu0 %215 }
  0xa1   : > { %v218_v4 = vmul.f32 0.00390625, %v216_v3 }
  0xa3   : > { %v219_v5 = vsub.f32 %v210_v0, %v218_v4  ;;  %v220_v6 = vsub.f32 %v211_v1, %v218_v4 }
  0xa5   : > { %v221_v7 = vmul.f32 %v219_v5, %v219_v5  ;;  %v222_v8 = vmul.f32 %v220_v6, %v220_v6 }
  0xa7   : > { %v223_v9 = vadd.f32 %v222_v8, %v221_v7 }
  0xa9   : > { %224 = vadd.xlane.f32.xlu0 %v223_v9 }
 0x136   : > { %v225_v13 = vpop.xlane.xlu0 %224 }
 0x137   : > { %v226_v14 = vmul.f32 0.00390625, %v225_v13 }
 0x139   : > { %v227_v16 = vadd.f32 1e-05, %v226_v14 }
 0x13b   : > { %448 = vrsqrt.f32 %v227_v16 }
 0x13c   : > { %450 = vrcp.f32 %v337_v34 }
 0x145   : > { %v449_v24 = vpop.eup %448 }
 0x146   : > { %v230_v25 = vmul.f32 %v449_v24, %v220_v6  ;;  %v229_v27 = vmul.f32 %v449_v24, %v219_v5  ;;  %v451_v37 = vpop.eup %450 }
 0x148   : > { %v243_v29 = vmul.f32 %v239_v22, %v230_v25  ;;  %v242_v30 = vmul.f32 %v235_v23, %v229_v27 }
 0x14a   : > { %v256_v31 = vadd.f32 %v252_v26, %v243_v29  ;;  %v255_v32 = vadd.f32 %v248_v28, %v242_v30 }
 0x14c   : > { %262 = vmatprep.subr.mxu0 %v256_v31 }
 0x14d   : > { %263 = vmatpush1.msra.mxu0 %v255_v32 }
 0x14e   : > { %434 = vmatmul.mubr.msk.f32.vlgmr.msra.gmra.mrb[0].mxu0 %vm258_vm1, %v257_v11 }
 0x221   : > { %v328_v39 = vpop.f32.mrb[0].mxu0 }
 0x222   : > { %v339_v40 = vmul.f32 %v451_v37, %v328_v39  ;;  %v330_v41 = vpop.f32.mrb[1].mxu0 }
 0x223   : > { %v340_v42 = vmul.f32 %v451_v37, %v330_v41 }
 0x225   : > { %v343_v44 = vcombine.low %v339_v40, %v340_v42 }
 0x227   : > { %v350_v45 = vrot.slane %v343_v44, %v349_v43 }
 0x229   : > { %v357_v46 = vrot.slane %v350_v45, %v349_v43 }
 0x22b   : > { %363 = vst.msk [vmem:[%s209_s5] sm:$0x3] %vm361_vm2, %v357_v46 }
 0x22c PF: > { %s14_s15 = sadd.s32 1, %s458_s15  }
 0x22d   : > { %p11_p4 = scmp.ge.s32.totalorder %s14_s15, 4  }
 0x22f   :  { %13 = sbr.rel (!%p11_p4) target bundleno = 1 (0x1), region = 69 }

// kernel: whisper_backbone_forward.16
= control target key start
LH: loop header
LB: loop body
LE: loop exit
PB: predicated region body
PF: predicated region fallthrough
CT: control target
= control target key end

     0   :  { %s2069_s0 = inlined_call_operand.vmem [shape: f32[16,256], index: 0, kind: input, shape index: {}]   ;;  %s2070_s3 = inlined_call_operand.vmem [shape: bf16[256,512], index: 3, kind: input, shape index: {}]   ;;  %s2071_s5 = inlined_call_operand.vmem [shape: bf16[512,256], index: 5, kind: input, shape index: {}]   ;;  %s2072_s1 = inlined_call_operand.vmem [shape: f32[1,256], index: 1, kind: input, shape index: {}]   ;;  %s2073_s2 = inlined_call_operand.vmem [shape: f32[1,256], index: 2, kind: input, shape index: {}]   ;;  %s2074_s4 = inlined_call_operand.vmem [shape: f32[1,512], index: 4, kind: input, shape index: {}]   ;;  %s2075_s6 = inlined_call_operand.vmem [shape: f32[1,256], index: 6, kind: input, shape index: {}]   ;;  %s2076_s7 = inlined_call_operand.vmem [shape: f32[16,256], index: 7, kind: output, shape index: {}]  }
   0x1   :  { %v30_v0 = vld [vmem:[%s2069_s0] sm:$0xff]  ;;  %v31_v1 = vld [vmem:[%s2069_s0 + $0x8] sm:$0xff]  ;;  %v32_v2 = vld [vmem:[%s2069_s0 + $0x10] sm:$0xff] }
   0x2   :  { %v36_v3 = vadd.f32 %v31_v1, %v30_v0  ;;  %v33_v4 = vld [vmem:[%s2069_s0 + $0x18] sm:$0xff]  ;;  %v1330_v6 = vld [vmem:[%s2070_s3 + $0x4] ss:$16 sps:$4 sm:$0xff]   ;;  %v1332_v7 = vld [vmem:[%s2070_s3] ss:$16 sps:$4 sm:$0xff]  }
   0x3   :  { %v39_v5 = vadd.f32 %v33_v4, %v32_v2  ;;  %515 = vmatprep.subr.bf16.mxu1 %v1330_v6  ;;  %v1333_v8 = vld [vmem:[%s2070_s3 + $0x24] ss:$16 sps:$4 sm:$0xff]   ;;  %v1335_v9 = vld [vmem:[%s2070_s3 + $0x20] ss:$16 sps:$4 sm:$0xff]   ;;  %v1380_v52 = vld [vmem:[%s2070_s3 + $0xc] ss:$16 sps:$4 sm:$0xff]  }
   0x4   :  { %37 = vadd.xlane.f32.xlu0 %v36_v3  ;;  %516 = vmatpush1.bf16.msra.mxu1 %v1332_v7  ;;  %v1336_v10 = vld [vmem:[%s2070_s3 + $0x44] ss:$16 sps:$4 sm:$0xff]   ;;  %v1338_v11 = vld [vmem:[%s2070_s3 + $0x40] ss:$16 sps:$4 sm:$0xff]  }
   0x5   :  { %517 = vmatprep.subr.bf16.mxu1 %v1333_v8  ;;  %v1339_v12 = vld [vmem:[%s2070_s3 + $0x64] ss:$16 sps:$4 sm:$0xff]   ;;  %v1341_v13 = vld [vmem:[%s2070_s3 + $0x60] ss:$16 sps:$4 sm:$0xff]  }
   0x6   :  { %v1342_v14 = vld [vmem:[%s2070_s3 + $0x84] ss:$16 sps:$4 sm:$0xff]   ;;  %v1344_v15 = vld [vmem:[%s2070_s3 + $0x80] ss:$16 sps:$4 sm:$0xff]  }
   0x7   :  { %v1345_v16 = vld [vmem:[%s2070_s3 + $0xa4] ss:$16 sps:$4 sm:$0xff]   ;;  %v1347_v17 = vld [vmem:[%s2070_s3 + $0xa0] ss:$16 sps:$4 sm:$0xff]  }
   0x8   :  { %40 = vadd.xlane.f32.xlu0 %v39_v5  ;;  %518 = vmatpush1.bf16.msra.mxu1 %v1335_v9  ;;  %v1348_v18 = vld [vmem:[%s2070_s3 + $0xc4] ss:$16 sps:$4 sm:$0xff]   ;;  %v1350_v19 = vld [vmem:[%s2070_s3 + $0xc0] ss:$16 sps:$4 sm:$0xff]   ;;  %v70_v9 = vlaneseq }
   0x9   :  { %519 = vmatprep.subr.bf16.mxu1 %v1336_v10  ;;  %v1351_v20 = vld [vmem:[%s2070_s3 + $0xe4] ss:$16 sps:$4 sm:$0xff]   ;;  %v1353_v21 = vld [vmem:[%s2070_s3 + $0xe0] ss:$16 sps:$4 sm:$0xff]  }
   0xa   :  { %v1354_v22 = vld [vmem:[%s2070_s3 + $0x104] ss:$16 sps:$4 sm:$0xff]   ;;  %v1356_v23 = vld [vmem:[%s2070_s3 + $0x100] ss:$16 sps:$4 sm:$0xff]  }
   0xb   :  { %v1357_v24 = vld [vmem:[%s2070_s3 + $0x124] ss:$16 sps:$4 sm:$0xff]   ;;  %v1359_v39 = vld [vmem:[%s2070_s3 + $0x120] ss:$16 sps:$4 sm:$0xff]  }
   0xc   :  { %520 = vmatpush1.bf16.msra.mxu1 %v1338_v11  ;;  %v1360_v40 = vld [vmem:[%s2070_s3 + $0x144] ss:$16 sps:$4 sm:$0xff]   ;;  %v1362_v41 = vld [vmem:[%s2070_s3 + $0x140] ss:$16 sps:$4 sm:$0xff]  }
   0xd   :  { %521 = vmatprep.subr.bf16.mxu1 %v1339_v12  ;;  %v1363_v42 = vld [vmem:[%s2070_s3 + $0x164] ss:$16 sps:$4 sm:$0xff]   ;;  %v1365_v43 = vld [vmem:[%s2070_s3 + $0x160] ss:$16 sps:$4 sm:$0xff]   ;;  %v1757_v12 = vshrl.u32 %v70_v9, 7 }
   0xe   :  { %v1366_v44 = vld [vmem:[%s2070_s3 + $0x184] ss:$16 sps:$4 sm:$0xff]   ;;  %v1368_v45 = vld [vmem:[%s2070_s3 + $0x180] ss:$16 sps:$4 sm:$0xff]  }
   0xf   :  { %v1369_v46 = vld [vmem:[%s2070_s3 + $0x1a4] ss:$16 sps:$4 sm:$0xff]   ;;  %v1371_v47 = vld [vmem:[%s2070_s3 + $0x1a0] ss:$16 sps:$4 sm:$0xff]  }
  0x10   :  { %522 = vmatpush1.bf16.msra.mxu1 %v1341_v13  ;;  %v1372_v48 = vld [vmem:[%s2070_s3 + $0x1c4] ss:$16 sps:$4 sm:$0xff]   ;;  %v1374_v49 = vld [vmem:[%s2070_s3 + $0x1c0] ss:$16 sps:$4 sm:$0xff]   ;;  %v1760_v13 = vsub.s32 0, %v1757_v12 }
  0x11   :  { %523 = vmatprep.subr.bf16.mxu1 %v1342_v14  ;;  %v1375_v50 = vld [vmem:[%s2070_s3 + $0x1e4] ss:$16 sps:$4 sm:$0xff]   ;;  %v1377_v51 = vld [vmem:[%s2070_s3 + $0x1e0] ss:$16 sps:$4 sm:$0xff]   ;;  %v1763_v14 = vsub.s32 1, %v1757_v12 }
  0x12   :  { %v1426_v53 = vld [vmem:[%s2071_s5 + $0x4] ss:$8 sps:$4 sm:$0xff]   ;;  %v1428_v54 = vld [vmem:[%s2071_s5] ss:$8 sps:$4 sm:$0xff]   ;;  %v1429_v55 = vld [vmem:[%s2071_s5 + $0x14] ss:$8 sps:$4 sm:$0xff]  }
  0x13   :  { %1065 = vmatprep.subr.bf16.mxu0 %v1426_v53  ;;  %v1431_v56 = vld [vmem:[%s2071_s5 + $0x10] ss:$8 sps:$4 sm:$0xff]   ;;  %v1432_v57 = vld [vmem:[%s2071_s5 + $0x24] ss:$8 sps:$4 sm:$0xff]   ;;  %v1434_v58 = vld [vmem:[%s2071_s5 + $0x20] ss:$8 sps:$4 sm:$0xff]  }
  0x14   :  { %524 = vmatpush1.bf16.msra.mxu1 %v1344_v15  ;;  %1066 = vmatpush1.bf16.msra.mxu0 %v1428_v54  ;;  %v1435_v59 = vld [vmem:[%s2071_s5 + $0x34] ss:$8 sps:$4 sm:$0xff]   ;;  %v1437_v60 = vld [vmem:[%s2071_s5 + $0x30] ss:$8 sps:$4 sm:$0xff]   ;;  %v1438_v61 = vld [vmem:[%s2071_s5 + $0x44] ss:$8 sps:$4 sm:$0xff]  }
  0x15   :  { %525 = vmatprep.subr.bf16.mxu1 %v1345_v16  ;;  %1067 = vmatprep.subr.bf16.mxu0 %v1429_v55  ;;  %v1440_v62 = vld [vmem:[%s2071_s5 + $0x40] ss:$8 sps:$4 sm:$0xff]   ;;  %v1441_v63 = vld [vmem:[%s2071_s5 + $0x54] ss:$8 sps:$4 sm:$0xff]  }
  0x16   :  { %v1447_v3 = vld [vmem:[%s2071_s5 + $0x74] ss:$8 sps:$4 sm:$0xff]   ;;  %v34_v15 = vld [vmem:[%s2072_s1] sm:$0x3]  ;;  %v1402_v53 = vld [vmem:[%s2070_s3 + $0x108] ss:$16 sps:$4 sm:$0xff]  }
  0x17   :  { %v1407_v54 = vld [vmem:[%s2070_s3 + $0x12c] ss:$16 sps:$4 sm:$0xff]   ;;  %v1405_v55 = vld [vmem:[%s2070_s3 + $0x128] ss:$16 sps:$4 sm:$0xff]  }
  0x18   :  { %526 = vmatpush1.bf16.msra.mxu1 %v1347_v17  ;;  %1068 = vmatpush1.bf16.msra.mxu0 %v1431_v56  ;;  %v35_v17 = vld [vmem:[%s2073_s2] sm:$0x3]  ;;  %v1410_v56 = vld [vmem:[%s2070_s3 + $0x14c] ss:$16 sps:$4 sm:$0xff]  }
  0x19   :  { %527 = vmatprep.subr.bf16.mxu1 %v1348_v18  ;;  %1069 = vmatprep.subr.bf16.mxu0 %v1432_v57  ;;  %v1408_v57 = vld [vmem:[%s2070_s3 + $0x148] ss:$16 sps:$4 sm:$0xff]  }
  0x1a   :  { %v1458_v9 = vld [vmem:[%s2071_s5 + $0xa0] ss:$8 sps:$4 sm:$0xff]  }
  0x1c   :  { %528 = vmatpush1.bf16.msra.mxu1 %v1350_v19  ;;  %1070 = vmatpush1.bf16.msra.mxu0 %v1434_v58  ;;  %v73_v19 = vrot.slane %v34_v15, %v1760_v13  ;;  %v1413_v58 = vld [vmem:[%s2070_s3 + $0x16c] ss:$16 sps:$4 sm:$0xff]  }
  0x1d   :  { %529 = vmatprep.subr.bf16.mxu1 %v1351_v20  ;;  %1071 = vmatprep.subr.bf16.mxu0 %v1435_v59  ;;  %v77_v20 = vrot.slane %v34_v15, %v1763_v14  ;;  %v1411_v59 = vld [vmem:[%s2070_s3 + $0x168] ss:$16 sps:$4 sm:$0xff]   ;;  %v1462_v15 = vld [vmem:[%s2071_s5 + $0xc4] ss:$8 sps:$4 sm:$0xff]  }
  0x20   :  { %530 = vmatpush1.bf16.msra.mxu1 %v1353_v21  ;;  %1072 = vmatpush1.bf16.msra.mxu0 %v1437_v60  ;;  %v1416_v60 = vld [vmem:[%s2070_s3 + $0x18c] ss:$16 sps:$4 sm:$0xff]  }
  0x21   :  { %531 = vmatprep.subr.bf16.mxu1 %v1354_v22  ;;  %1073 = vmatprep.subr.bf16.mxu0 %v1438_v61  ;;  %v1414_v61 = vld [vmem:[%s2070_s3 + $0x188] ss:$16 sps:$4 sm:$0xff]  }
  0x24   :  { %532 = vmatpush1.bf16.msra.mxu1 %v1356_v23  ;;  %1074 = vmatpush1.bf16.msra.mxu0 %v1440_v62  ;;  %v88_v23 = vrot.slane %v35_v17, %v1760_v13  ;;  %v1419_v62 = vld [vmem:[%s2070_s3 + $0x1ac] ss:$16 sps:$4 sm:$0xff]  }
  0x25   :  { %533 = vmatprep.subr.bf16.mxu1 %v1357_v24  ;;  %1075 = vmatprep.subr.bf16.mxu0 %v1441_v63  ;;  %v92_v24 = vrot.slane %v35_v17, %v1763_v14  ;;  %v1417_v63 = vld [vmem:[%s2070_s3 + $0x1a8] ss:$16 sps:$4 sm:$0xff]   ;;  %v1465_v17 = vld [vmem:[%s2071_s5 + $0xd4] ss:$8 sps:$4 sm:$0xff]  }
  0x28   :  { %534 = vmatpush1.bf16.msra.mxu1 %v1359_v39 }
  0x29   :  { %535 = vmatprep.subr.bf16.mxu1 %v1360_v40  ;;  %v1386_v40 = vld [vmem:[%s2070_s3 + $0x4c] ss:$16 sps:$4 sm:$0xff]  }
  0x2c   :  { %536 = vmatpush1.bf16.msra.mxu1 %v1362_v41  ;;  %v1384_v41 = vld [vmem:[%s2070_s3 + $0x48] ss:$16 sps:$4 sm:$0xff]  }
  0x2d   :  { %537 = vmatprep.subr.bf16.mxu1 %v1363_v42  ;;  %v1389_v42 = vld [vmem:[%s2070_s3 + $0x6c] ss:$16 sps:$4 sm:$0xff]  }
  0x30   :  { %538 = vmatpush1.bf16.msra.mxu1 %v1365_v43  ;;  %v1387_v43 = vld [vmem:[%s2070_s3 + $0x68] ss:$16 sps:$4 sm:$0xff]  }
  0x31   :  { %539 = vmatprep.subr.bf16.mxu1 %v1366_v44  ;;  %v1392_v44 = vld [vmem:[%s2070_s3 + $0x8c] ss:$16 sps:$4 sm:$0xff]  }
  0x34   :  { %540 = vmatpush1.bf16.msra.mxu1 %v1368_v45  ;;  %v1390_v45 = vld [vmem:[%s2070_s3 + $0x88] ss:$16 sps:$4 sm:$0xff]  }
  0x35   :  { %541 = vmatprep.subr.bf16.mxu1 %v1369_v46  ;;  %v1395_v46 = vld [vmem:[%s2070_s3 + $0xac] ss:$16 sps:$4 sm:$0xff]  }
  0x38   :  { %542 = vmatpush1.bf16.msra.mxu1 %v1371_v47  ;;  %v1393_v47 = vld [vmem:[%s2070_s3 + $0xa8] ss:$16 sps:$4 sm:$0xff]  }
  0x39   :  { %543 = vmatprep.subr.bf16.mxu1 %v1372_v48  ;;  %v1398_v48 = vld [vmem:[%s2070_s3 + $0xcc] ss:$16 sps:$4 sm:$0xff]  }
  0x3c   :  { %544 = vmatpush1.bf16.msra.mxu1 %v1374_v49  ;;  %v1396_v49 = vld [vmem:[%s2070_s3 + $0xc8] ss:$16 sps:$4 sm:$0xff]  }
  0x3d   :  { %545 = vmatprep.subr.bf16.mxu1 %v1375_v50  ;;  %v1401_v50 = vld [vmem:[%s2070_s3 + $0xec] ss:$16 sps:$4 sm:$0xff]  }
  0x40   :  { %546 = vmatpush1.bf16.msra.mxu1 %v1377_v51  ;;  %v1399_v51 = vld [vmem:[%s2070_s3 + $0xe8] ss:$16 sps:$4 sm:$0xff]  }
  0x41   :  { %558 = vmatprep.subr.bf16.mxu1 %v1380_v52  ;;  %v1404_v52 = vld [vmem:[%s2070_s3 + $0x10c] ss:$16 sps:$4 sm:$0xff]  }
  0x91   :  { %v38_v25 = vpop.xlane.xlu0 %37 }
  0x92   :  { %v43_v26 = vmul.f32 0.00390625, %v38_v25 }
  0x94   :  { %v1651_v27 = vsub.f32 %v30_v0, %v43_v26  ;;  %v1653_v28 = vsub.f32 %v31_v1, %v43_v26  ;;  %v1443_v0 = vld [vmem:[%s2071_s5 + $0x50] ss:$8 sps:$4 sm:$0xff]   ;;  %v1444_v1 = vld [vmem:[%s2071_s5 + $0x64] ss:$8 sps:$4 sm:$0xff]  }
  0x95   :  { %v41_v29 = vpop.xlane.xlu0 %40  ;;  %1076 = vmatpush1.bf16.msra.mxu0 %v1443_v0  ;;  %v1422_v0 = vld [vmem:[%s2070_s3 + $0x1cc] ss:$16 sps:$4 sm:$0xff]  }
  0x96   :  { %v44_v30 = vmul.f32 0.00390625, %v41_v29  ;;  %v49_v31 = vmul.f32 %v1651_v27, %v1651_v27  ;;  %v50_v32 = vmul.f32 %v1653_v28, %v1653_v28  ;;  %1077 = vmatprep.subr.bf16.mxu0 %v1444_v1  ;;  %v1420_v1 = vld [vmem:[%s2070_s3 + $0x1c8] ss:$16 sps:$4 sm:$0xff]  }
  0x98   :  { %v1659_v33 = vsub.f32 %v32_v2, %v44_v30  ;;  %v1661_v34 = vsub.f32 %v33_v4, %v44_v30  ;;  %v53_v35 = vadd.f32 %v50_v32, %v49_v31  ;;  %v1446_v2 = vld [vmem:[%s2071_s5 + $0x60] ss:$8 sps:$4 sm:$0xff]   ;;  %v1449_v4 = vld [vmem:[%s2071_s5 + $0x70] ss:$8 sps:$4 sm:$0xff]  }
  0x99   :  { %1078 = vmatpush1.bf16.msra.mxu0 %v1446_v2  ;;  %v1425_v2 = vld [vmem:[%s2070_s3 + $0x1ec] ss:$16 sps:$4 sm:$0xff]  }
  0x9a   :  { %54 = vadd.xlane.f32.xlu1 %v53_v35  ;;  %v51_v36 = vmul.f32 %v1659_v33, %v1659_v33  ;;  %v52_v37 = vmul.f32 %v1661_v34, %v1661_v34  ;;  %1079 = vmatprep.subr.bf16.mxu0 %v1447_v3  ;;  %v1423_v3 = vld [vmem:[%s2070_s3 + $0x1e8] ss:$16 sps:$4 sm:$0xff]  }
  0x9c   :  { %v56_v38 = vadd.f32 %v52_v37, %v51_v36 }
  0x9d   :  { %1080 = vmatpush1.bf16.msra.mxu0 %v1449_v4  ;;  %v1450_v4 = vld [vmem:[%s2071_s5 + $0x84] ss:$8 sps:$4 sm:$0xff]  }
  0x9e   :  { %57 = vadd.xlane.f32.xlu1 %v56_v38  ;;  %1081 = vmatprep.subr.bf16.mxu0 %v1450_v4 }
 0x127   :  { %v55_v5 = vpop.xlane.xlu1 %54 }
 0x128   :  { %v59_v6 = vmul.f32 0.00390625, %v55_v5  ;;  %v1452_v5 = vld [vmem:[%s2071_s5 + $0x80] ss:$8 sps:$4 sm:$0xff]  }
 0x129   :  { %1082 = vmatpush1.bf16.msra.mxu0 %v1452_v5 }
 0x12a   :  { %v61_v7 = vadd.f32 1e-05, %v59_v6  ;;  %v1453_v6 = vld [vmem:[%s2071_s5 + $0x94] ss:$8 sps:$4 sm:$0xff]  }
 0x12b   :  { %v58_v8 = vpop.xlane.xlu1 %57  ;;  %1083 = vmatprep.subr.bf16.mxu0 %v1453_v6 }
 0x12c   :  { %1522 = vrsqrt.f32 %v61_v7  ;;  %v60_v10 = vmul.f32 0.00390625, %v58_v8  ;;  %v1455_v7 = vld [vmem:[%s2071_s5 + $0x90] ss:$8 sps:$4 sm:$0xff]   ;;  %v1456_v8 = vld [vmem:[%s2071_s5 + $0xa4] ss:$8 sps:$4 sm:$0xff]  }
 0x12d   :  { %1084 = vmatpush1.bf16.msra.mxu0 %v1455_v7 }
 0x12e   :  { %v62_v11 = vadd.f32 1e-05, %v60_v10  ;;  %v1459_v10 = vld [vmem:[%s2071_s5 + $0xb4] ss:$8 sps:$4 sm:$0xff]   ;;  %1085 = vmatprep.subr.bf16.mxu0 %v1456_v8 }
 0x130   :  { %1524 = vrsqrt.f32 %v62_v11  ;;  %v1461_v11 = vld [vmem:[%s2071_s5 + $0xb0] ss:$8 sps:$4 sm:$0xff]  }
 0x131   :  { %1086 = vmatpush1.bf16.msra.mxu0 %v1458_v9  ;;  %v1474_v9 = vld [vmem:[%s2071_s5 + $0x100] ss:$8 sps:$4 sm:$0xff]  }
 0x132   :  { %1087 = vmatprep.subr.bf16.mxu0 %v1459_v10  ;;  %v1479_v10 = vld [vmem:[%s2071_s5 + $0x114] ss:$8 sps:$4 sm:$0xff]  }
 0x135   :  { %1088 = vmatpush1.bf16.msra.mxu0 %v1461_v11  ;;  %v1477_v11 = vld [vmem:[%s2071_s5 + $0x110] ss:$8 sps:$4 sm:$0xff]  }
 0x136   :  { %v1523_v16 = vpop.eup %1522  ;;  %1089 = vmatprep.subr.bf16.mxu0 %v1462_v15  ;;  %v1482_v15 = vld [vmem:[%s2071_s5 + $0x124] ss:$8 sps:$4 sm:$0xff]  }
 0x137   :  { %v66_v18 = vmul.f32 %v1523_v16, %v1653_v28  ;;  %v65_v21 = vmul.f32 %v1523_v16, %v1651_v27  ;;  %v1378_v27 = vld [vmem:[%s2070_s3 + $0x8] ss:$16 sps:$4 sm:$0xff]  }
 0x138   :  { %v1464_v16 = vld [vmem:[%s2071_s5 + $0xc0] ss:$8 sps:$4 sm:$0xff]  }
 0x139   :  { %v81_v26 = vmul.f32 %v77_v20, %v66_v18  ;;  %v80_v30 = vmul.f32 %v73_v19, %v65_v21  ;;  %1090 = vmatpush1.bf16.msra.mxu0 %v1464_v16  ;;  %v1467_v18 = vld [vmem:[%s2071_s5 + $0xd0] ss:$8 sps:$4 sm:$0xff]   ;;  %v1471_v21 = vld [vmem:[%s2071_s5 + $0xf4] ss:$8 sps:$4 sm:$0xff]   ;;  %v1480_v16 = vld [vmem:[%s2071_s5 + $0x120] ss:$8 sps:$4 sm:$0xff]  }
 0x13a   :  { %v1525_v22 = vpop.eup %1524  ;;  %1091 = vmatprep.subr.bf16.mxu0 %v1465_v17  ;;  %v1485_v17 = vld [vmem:[%s2071_s5 + $0x134] ss:$8 sps:$4 sm:$0xff]  }
 0x13b   :  { %v68_v25 = vmul.f32 %v1525_v22, %v1661_v34  ;;  %v67_v29 = vmul.f32 %v1525_v22, %v1659_v33  ;;  %v96_v28 = vadd.f32 %v92_v24, %v81_v26  ;;  %v95_v36 = vadd.f32 %v88_v23, %v80_v30  ;;  %v1383_v34 = vld [vmem:[%s2070_s3 + $0x2c] ss:$16 sps:$4 sm:$0xff]   ;;  %v1381_v33 = vld [vmem:[%s2070_s3 + $0x28] ss:$16 sps:$4 sm:$0xff]  }
 0x13c   :  { %v1473_v22 = vld [vmem:[%s2071_s5 + $0xf0] ss:$8 sps:$4 sm:$0xff]  }
 0x13d   :  { %v83_v31 = vmul.f32 %v77_v20, %v68_v25  ;;  %v82_v32 = vmul.f32 %v73_v19, %v67_v29  ;;  %v1468_v19 = vld [vmem:[%s2071_s5 + $0xe4] ss:$8 sps:$4 sm:$0xff]   ;;  %1092 = vmatpush1.bf16.msra.mxu0 %v1467_v18  ;;  %v1470_v20 = vld [vmem:[%s2071_s5 + $0xe0] ss:$8 sps:$4 sm:$0xff]   ;;  %v1483_v18 = vld [vmem:[%s2071_s5 + $0x130] ss:$8 sps:$4 sm:$0xff]  }
 0x13e   :  { %1093 = vmatprep.subr.bf16.mxu0 %v1468_v19  ;;  %v1488_v19 = vld [vmem:[%s2071_s5 + $0x144] ss:$8 sps:$4 sm:$0xff]  }
 0x13f   :  { %v98_v35 = vadd.f32 %v92_v24, %v83_v31  ;;  %v97_v37 = vadd.f32 %v88_v23, %v82_v32  ;;  %v1476_v23 = vld [vmem:[%s2071_s5 + $0x104] ss:$8 sps:$4 sm:$0xff]   ;;  %v1930_v24 = vld [vmem:[%s2074_s4] sm:$0xf] }
 0x140   :  { %v178_v25 = vrot.slane %v1930_v24, %v1760_v13  ;;  %v182_v26 = vrot.slane %v1930_v24, %v1763_v14 }
 0x141   :  { %v100_v38 = vpack.c.bf16 %v98_v35, %v96_v28  ;;  %v1782_v39 = vpack.c.bf16 %v97_v37, %v95_v36  ;;  %1094 = vmatpush1.bf16.msra.mxu0 %v1470_v20  ;;  %v1486_v20 = vld [vmem:[%s2071_s5 + $0x140] ss:$8 sps:$4 sm:$0xff]  }
 0x142   :  { %1095 = vmatprep.subr.bf16.mxu0 %v1471_v21  ;;  %v1491_v21 = vld [vmem:[%s2071_s5 + $0x154] ss:$8 sps:$4 sm:$0xff]  }
 0x143   :  { %547 = vmatprep.mubr.bf16.mxu1 %v100_v38 }
 0x144   :  { %548 = vmatmul.mubr.bf16.vlgmr.msra.gmra.mrb[0].mxu1 %v1782_v39 }
 0x145   :  { %559 = vmatpush1.bf16.msra.mxu1 %v1378_v27  ;;  %590 = vmatprep.mubr.bf16.mxu1 %v100_v38 }
 0x146   :  { %560 = vmatprep.subr.bf16.mxu1 %v1383_v34  ;;  %1096 = vmatpush1.bf16.msra.mxu0 %v1473_v22  ;;  %v1489_v22 = vld [vmem:[%s2071_s5 + $0x150] ss:$8 sps:$4 sm:$0xff]  }
 0x147   :  { %1108 = vmatprep.subr.bf16.mxu0 %v1476_v23  ;;  %v1494_v23 = vld [vmem:[%s2071_s5 + $0x164] ss:$8 sps:$4 sm:$0xff]  }
 0x149   :  { %561 = vmatpush1.bf16.msra.mxu1 %v1381_v33 }
 0x14a   :  { %562 = vmatprep.subr.bf16.mxu1 %v1386_v40 }
 0x14d   :  { %563 = vmatpush1.bf16.msra.mxu1 %v1384_v41 }
 0x14e   :  { %564 = vmatprep.subr.bf16.mxu1 %v1389_v42 }
 0x151   :  { %565 = vmatpush1.bf16.msra.mxu1 %v1387_v43 }
 0x152   :  { %566 = vmatprep.subr.bf16.mxu1 %v1392_v44 }
 0x155   :  { %567 = vmatpush1.bf16.msra.mxu1 %v1390_v45 }
 0x156   :  { %568 = vmatprep.subr.bf16.mxu1 %v1395_v46 }
 0x159   :  { %569 = vmatpush1.bf16.msra.mxu1 %v1393_v47 }
 0x15a   :  { %570 = vmatprep.subr.bf16.mxu1 %v1398_v48 }
 0x15d   :  { %571 = vmatpush1.bf16.msra.mxu1 %v1396_v49 }
 0x15e   :  { %572 = vmatprep.subr.bf16.mxu1 %v1401_v50 }
 0x161   :  { %573 = vmatpush1.bf16.msra.mxu1 %v1399_v51 }
 0x162   :  { %574 = vmatprep.subr.bf16.mxu1 %v1404_v52 }
 0x165   :  { %575 = vmatpush1.bf16.msra.mxu1 %v1402_v53 }
 0x166   :  { %576 = vmatprep.subr.bf16.mxu1 %v1407_v54 }
 0x169   :  { %577 = vmatpush1.bf16.msra.mxu1 %v1405_v55 }
 0x16a   :  { %578 = vmatprep.subr.bf16.mxu1 %v1410_v56 }
 0x16d   :  { %579 = vmatpush1.bf16.msra.mxu1 %v1408_v57 }
 0x16e   :  { %580 = vmatprep.subr.bf16.mxu1 %v1413_v58 }
 0x171   :  { %581 = vmatpush1.bf16.msra.mxu1 %v1411_v59 }
 0x172   :  { %582 = vmatprep.subr.bf16.mxu1 %v1416_v60 }
 0x175   :  { %583 = vmatpush1.bf16.msra.mxu1 %v1414_v61 }
 0x176   :  { %584 = vmatprep.subr.bf16.mxu1 %v1419_v62 }
 0x179   :  { %585 = vmatpush1.bf16.msra.mxu1 %v1417_v63 }
 0x17a   :  { %586 = vmatprep.subr.bf16.mxu1 %v1422_v0 }
 0x17d   :  { %587 = vmatpush1.bf16.msra.mxu1 %v1420_v1 }
 0x17e   :  { %588 = vmatprep.subr.bf16.mxu1 %v1425_v2 }
 0x181   :  { %589 = vmatpush1.bf16.msra.mxu1 %v1423_v3 }
 0x184   :  { %591 = vmatmul.mubr.bf16.vlgmr.msra.gmra.mrb[4].mxu1 %v1782_v39 }
 0x217   :  { %v549_v29 = vpop.f32.mrb[0].mxu1 }
 0x218   :  { %v550_v30 = vadd.f32 %v549_v29, %v178_v25  ;;  %v551_v31 = vpop.f32.mrb[1].mxu1  ;;  %v185_v29 = vsub.s32 2, %v1757_v12 }
 0x219   :  { %v552_v32 = vadd.f32 %v551_v31, %v182_v26  ;;  %v553_v28 = vpop.f32.mrb[2].mxu1  ;;  %v1495_v31 = vld [vmem:[%s2071_s5 + $0x170] ss:$8 sps:$4 sm:$0xff]  }
 0x21a   :  { %v609_v35 = vmul.f32 0.044715, %v550_v30  ;;  %v554_v36 = vadd.f32 %v553_v28, %v178_v25  ;;  %v555_v37 = vpop.f32.mrb[3].mxu1  ;;  %v601_v61 = vmul.f32 0.5, %v550_v30  ;;  %v1492_v25 = vld [vmem:[%s2071_s5 + $0x160] ss:$8 sps:$4 sm:$0xff]   ;;  %v186_v28 = vrot.slane %v1930_v24, %v185_v29 }
 0x21b   :  { %v610_v38 = vmul.f32 0.044715, %v552_v32  ;;  %v556_v27 = vadd.f32 %v555_v37, %v182_v26  ;;  %v602_v0 = vmul.f32 0.5, %v552_v32  ;;  %v1497_v26 = vld [vmem:[%s2071_s5 + $0x174] ss:$8 sps:$4 sm:$0xff]  }
 0x21c   :  { %v617_v39 = vmul.f32 %v609_v35, %v550_v30  ;;  %v613_v34 = vmul.f32 0.044715, %v554_v36  ;;  %v605_v62 = vmul.f32 0.5, %v554_v36  ;;  %v1503_v37 = vld [vmem:[%s2071_s5 + $0x194] ss:$8 sps:$4 sm:$0xff]  }
 0x21d   :  { %v614_v33 = vmul.f32 0.044715, %v556_v27  ;;  %v618_v40 = vmul.f32 %v610_v38, %v552_v32  ;;  %v606_v1 = vmul.f32 0.5, %v556_v27 }
 0x21e   :  { %v625_v41 = vmul.f32 %v617_v39, %v550_v30  ;;  %v621_v42 = vmul.f32 %v613_v34, %v554_v36 }
 0x21f   :  { %v622_v43 = vmul.f32 %v614_v33, %v556_v27  ;;  %v626_v44 = vmul.f32 %v618_v40, %v552_v32 }
 0x220   :  { %v629_v45 = vmul.f32 %v621_v42, %v554_v36  ;;  %v633_v46 = vadd.f32 %v625_v41, %v550_v30  ;;  %v189_v30 = vsub.s32 3, %v1757_v12 }
 0x221   :  { %v630_v47 = vmul.f32 %v622_v43, %v556_v27  ;;  %v634_v48 = vadd.f32 %v626_v44, %v552_v32  ;;  %v1500_v32 = vld [vmem:[%s2071_s5 + $0x184] ss:$8 sps:$4 sm:$0xff]  }
 0x222   :  { %v637_v49 = vadd.f32 %v629_v45, %v554_v36  ;;  %v641_v50 = vmul.f32 0.7978846, %v633_v46  ;;  %v190_v35 = vrot.slane %v1930_v24, %v189_v30  ;;  %v1498_v36 = vld [vmem:[%s2071_s5 + $0x180] ss:$8 sps:$4 sm:$0xff]   ;;  %v1501_v24 = vld [vmem:[%s2071_s5 + $0x190] ss:$8 sps:$4 sm:$0xff]  }
 0x223   :  { %v638_v51 = vadd.f32 %v630_v47, %v556_v27  ;;  %v642_v52 = vmul.f32 0.7978846, %v634_v48  ;;  %v1506_v44 = vld [vmem:[%s2071_s5 + $0x1a4] ss:$8 sps:$4 sm:$0xff]  }
 0x224   :  { %v645_v53 = vmul.f32 0.7978846, %v637_v49  ;;  %1526 = vtanh.f32 %v641_v50 }
 0x225   :  { %v646_v54 = vmul.f32 0.7978846, %v638_v51  ;;  %1528 = vtanh.f32 %v642_v52  ;;  %v1504_v51 = vld [vmem:[%s2071_s5 + $0x1a0] ss:$8 sps:$4 sm:$0xff]  }
 0x226   :  { %1530 = vtanh.f32 %v645_v53 }
 0x227   :  { %1532 = vtanh.f32 %v646_v54  ;;  %v1509_v54 = vld [vmem:[%s2071_s5 + $0x1b4] ss:$8 sps:$4 sm:$0xff]  }
 0x22e   :  { %v1527_v55 = vpop.eup %1526 }
 0x22f   :  { %v1529_v56 = vpop.eup %1528  ;;  %v657_v57 = vadd.f32 1.0, %v1527_v55 }
 0x230   :  { %v1531_v58 = vpop.eup %1530  ;;  %v658_v59 = vadd.f32 1.0, %v1529_v56 }
 0x231   :  { %v1533_v60 = vpop.eup %1532  ;;  %v661_v63 = vadd.f32 1.0, %v1531_v58  ;;  %v665_v3 = vmul.f32 %v657_v57, %v601_v61  ;;  %v1507_v61 = vld [vmem:[%s2071_s5 + $0x1b0] ss:$8 sps:$4 sm:$0xff]  }
 0x232   :  { %v662_v2 = vadd.f32 1.0, %v1533_v60  ;;  %v666_v5 = vmul.f32 %v658_v59, %v602_v0 }
 0x233   :  { %v669_v4 = vmul.f32 %v661_v63, %v605_v62  ;;  %v1512_v62 = vld [vmem:[%s2071_s5 + $0x1c4] ss:$8 sps:$4 sm:$0xff]  }
 0x234   :  { %v670_v6 = vmul.f32 %v662_v2, %v606_v1 }
 0x235   :  { %v677_v7 = vpack.c.bf16 %v669_v4, %v665_v3  ;;  %v1510_v3 = vld [vmem:[%s2071_s5 + $0x1c0] ss:$8 sps:$4 sm:$0xff]   ;;  %v1515_v4 = vld [vmem:[%s2071_s5 + $0x1d4] ss:$8 sps:$4 sm:$0xff]  }
 0x236   :  { %v678_v8 = vpack.c.bf16 %v670_v6, %v666_v5  ;;  %v1513_v5 = vld [vmem:[%s2071_s5 + $0x1d0] ss:$8 sps:$4 sm:$0xff]   ;;  %v1518_v6 = vld [vmem:[%s2071_s5 + $0x1e4] ss:$8 sps:$4 sm:$0xff]  }
 0x238   :  { %1097 = vmatprep.mubr.bf16.mxu0 %v678_v8  ;;  %v1516_v8 = vld [vmem:[%s2071_s5 + $0x1e0] ss:$8 sps:$4 sm:$0xff]  }
 0x239   :  { %1098 = vmatmul.mubr.bf16.vlgmr.msra.gmra.mrb[0].mxu0 %v677_v7 }
 0x23a   :  { %1109 = vmatpush1.bf16.msra.mxu0 %v1474_v9 }
 0x23b   :  { %1110 = vmatprep.subr.bf16.mxu0 %v1479_v10  ;;  %v1521_v10 = vld [vmem:[%s2071_s5 + $0x1f4] ss:$8 sps:$4 sm:$0xff]  }
 0x23e   :  { %1111 = vmatpush1.bf16.msra.mxu0 %v1477_v11 }
 0x23f   :  { %1112 = vmatprep.subr.bf16.mxu0 %v1482_v15 }
 0x242   :  { %1113 = vmatpush1.bf16.msra.mxu0 %v1480_v16 }
 0x243   :  { %1114 = vmatprep.subr.bf16.mxu0 %v1485_v17 }
 0x246   :  { %1115 = vmatpush1.bf16.msra.mxu0 %v1483_v18 }
 0x247   :  { %1116 = vmatprep.subr.bf16.mxu0 %v1488_v19 }
 0x24a   :  { %1117 = vmatpush1.bf16.msra.mxu0 %v1486_v20 }
 0x24b   :  { %1118 = vmatprep.subr.bf16.mxu0 %v1491_v21  ;;  %v1519_v21 = vld [vmem:[%s2071_s5 + $0x1f0] ss:$8 sps:$4 sm:$0xff]  }
 0x24e   :  { %1119 = vmatpush1.bf16.msra.mxu0 %v1489_v22 }
 0x24f   :  { %1120 = vmatprep.subr.bf16.mxu0 %v1494_v23 }
 0x252   :  { %1121 = vmatpush1.bf16.msra.mxu0 %v1492_v25 }
 0x253   :  { %1122 = vmatprep.subr.bf16.mxu0 %v1497_v26 }
 0x256   :  { %1123 = vmatpush1.bf16.msra.mxu0 %v1495_v31 }
 0x257   :  { %v592_v12 = vpop.f32.mrb[4].mxu1  ;;  %1124 = vmatprep.subr.bf16.mxu0 %v1500_v32 }
 0x258   :  { %v593_v38 = vadd.f32 %v592_v12, %v186_v28  ;;  %v594_v27 = vpop.f32.mrb[5].mxu1 }
 0x259   :  { %v1994_v39 = vadd.f32 %v594_v27, %v190_v35  ;;  %v596_v34 = vpop.f32.mrb[6].mxu1 }
 0x25a   :  { %v611_v33 = vmul.f32 0.044715, %v593_v38  ;;  %v597_v40 = vadd.f32 %v596_v34, %v186_v28  ;;  %v598_v41 = vpop.f32.mrb[7].mxu1  ;;  %1125 = vmatpush1.bf16.msra.mxu0 %v1498_v36  ;;  %v603_v18 = vmul.f32 0.5, %v593_v38  ;;  %v1162_v36 = vld [vmem:[%s2069_s0] sm:$0xff] }
 0x25b   :  { %v612_v42 = vmul.f32 0.044715, %v1994_v39  ;;  %v599_v43 = vadd.f32 %v598_v41, %v190_v35  ;;  %1126 = vmatprep.subr.bf16.mxu0 %v1503_v37  ;;  %v604_v22 = vmul.f32 0.5, %v1994_v39  ;;  %v1174_v35 = vld [vmem:[%s2075_s6] sm:$0x3]  ;;  %v1163_v37 = vld [vmem:[%s2069_s0 + $0x8] sm:$0xff] }
 0x25c   :  { %v619_v45 = vmul.f32 %v611_v33, %v593_v38  ;;  %v615_v46 = vmul.f32 0.044715, %v597_v40  ;;  %v607_v19 = vmul.f32 0.5, %v597_v40  ;;  %v1179_v12 = vrot.slane %v1174_v35, %v1760_v13 }
 0x25d   :  { %v620_v47 = vmul.f32 %v612_v42, %v1994_v39  ;;  %v616_v48 = vmul.f32 0.044715, %v599_v43  ;;  %v608_v23 = vmul.f32 0.5, %v599_v43  ;;  %v1183_v27 = vrot.slane %v1174_v35, %v1763_v14 }
 0x25e   :  { %v627_v49 = vmul.f32 %v619_v45, %v593_v38  ;;  %v623_v50 = vmul.f32 %v615_v46, %v597_v40  ;;  %1127 = vmatpush1.bf16.msra.mxu0 %v1501_v24 }
 0x25f   :  { %v628_v52 = vmul.f32 %v620_v47, %v1994_v39  ;;  %v624_v53 = vmul.f32 %v616_v48, %v599_v43  ;;  %1128 = vmatprep.subr.bf16.mxu0 %v1506_v44 }
 0x260   :  { %v635_v55 = vadd.f32 %v627_v49, %v593_v38  ;;  %v631_v56 = vmul.f32 %v623_v50, %v597_v40 }
 0x261   :  { %v632_v57 = vmul.f32 %v624_v53, %v599_v43  ;;  %v636_v58 = vadd.f32 %v628_v52, %v1994_v39  ;;  %v1164_v39 = vld [vmem:[%s2069_s0 + $0x10] sm:$0xff] }
 0x262   :  { %v643_v59 = vmul.f32 0.7978846, %v635_v55  ;;  %v639_v60 = vadd.f32 %v631_v56, %v597_v40  ;;  %1129 = vmatpush1.bf16.msra.mxu0 %v1504_v51  ;;  %v1165_v40 = vld [vmem:[%s2069_s0 + $0x18] sm:$0xff] }
 0x263   :  { %1130 = vmatprep.subr.bf16.mxu0 %v1509_v54  ;;  %v640_v63 = vadd.f32 %v632_v57, %v599_v43  ;;  %v644_v0 = vmul.f32 0.7978846, %v636_v58 }
 0x264   :  { %1534 = vtanh.f32 %v643_v59  ;;  %v647_v1 = vmul.f32 0.7978846, %v639_v60 }
 0x265   :  { %v648_v2 = vmul.f32 0.7978846, %v640_v63  ;;  %1536 = vtanh.f32 %v644_v0 }
 0x266   :  { %1538 = vtanh.f32 %v647_v1  ;;  %1131 = vmatpush1.bf16.msra.mxu0 %v1507_v61 }
 0x267   :  { %1132 = vmatprep.subr.bf16.mxu0 %v1512_v62  ;;  %1540 = vtanh.f32 %v648_v2 }
 0x26a   :  { %1133 = vmatpush1.bf16.msra.mxu0 %v1510_v3 }
 0x26b   :  { %1134 = vmatprep.subr.bf16.mxu0 %v1515_v4 }
 0x26e   :  { %v1535_v7 = vpop.eup %1534  ;;  %1135 = vmatpush1.bf16.msra.mxu0 %v1513_v5 }
 0x26f   :  { %v1537_v9 = vpop.eup %1536  ;;  %1136 = vmatprep.subr.bf16.mxu0 %v1518_v6  ;;  %v659_v11 = vadd.f32 1.0, %v1535_v7 }
 0x270   :  { %v1539_v15 = vpop.eup %1538  ;;  %v660_v16 = vadd.f32 1.0, %v1537_v9 }
 0x271   :  { %v1541_v17 = vpop.eup %1540  ;;  %v663_v20 = vadd.f32 1.0, %v1539_v15  ;;  %v667_v26 = vmul.f32 %v659_v11, %v603_v18 }
 0x272   :  { %1137 = vmatpush1.bf16.msra.mxu0 %v1516_v8  ;;  %v664_v25 = vadd.f32 1.0, %v1541_v17  ;;  %v668_v30 = vmul.f32 %v660_v16, %v604_v22 }
 0x273   :  { %1138 = vmatprep.subr.bf16.mxu0 %v1521_v10  ;;  %v671_v29 = vmul.f32 %v663_v20, %v607_v19 }
 0x274   :  { %v672_v31 = vmul.f32 %v664_v25, %v608_v23 }
 0x275   :  { %v679_v32 = vpack.c.bf16 %v671_v29, %v667_v26 }
 0x276   :  { %1139 = vmatpush1.bf16.msra.mxu0 %v1519_v21  ;;  %v680_v28 = vpack.c.bf16 %v672_v31, %v668_v30 }
 0x278   :  { %1140 = vmatprep.mubr.bf16.mxu0 %v680_v28 }
 0x279   :  { %1141 = vmatmul.mubr.bf16.vlgmr.msra.gmra.mrb[0].mxu0 %v679_v32 }
 0x34c   :  { %v1142_v38 = vpop.f32.mrb[0].mxu0 }
 0x34d   :  { %v1170_v34 = vadd.f32 %v1162_v36, %v1142_v38  ;;  %v1144_v33 = vpop.f32.mrb[1].mxu0 }
 0x34e   :  { %v1171_v41 = vadd.f32 %v1163_v37, %v1144_v33  ;;  %v1146_v24 = vpop.f32.mrb[2].mxu0 }
 0x34f   :  { %v1186_v13 = vadd.f32 %v1179_v12, %v1170_v34  ;;  %v1172_v42 = vadd.f32 %v1164_v39, %v1146_v24  ;;  %v1148_v43 = vpop.f32.mrb[3].mxu0 }
 0x350   :  { %v1187_v44 = vadd.f32 %v1183_v27, %v1171_v41  ;;  %v1173_v45 = vadd.f32 %v1165_v40, %v1148_v43 }
 0x351   :  { %1190 = vst [vmem:[%s2076_s7] sm:$0xff] %v1186_v13  ;;  %v1188_v14 = vadd.f32 %v1179_v12, %v1172_v42 }
 0x352   :  { %1191 = vst [vmem:[%s2076_s7 + $0x8] sm:$0xff] %v1187_v44  ;;  %v1189_v46 = vadd.f32 %v1183_v27, %v1173_v45 }
 0x353   :  { %1192 = vst [vmem:[%s2076_s7 + $0x10] sm:$0xff] %v1188_v14 }
 0x354   :  { %1193 = vst [vmem:[%s2076_s7 + $0x18] sm:$0xff] %v1189_v46 }

</bundles_post_ra>
